<compile_context>
chip_gen: v7x
topology: tpu7x:2x2x1
jax: 0.10.0
libtpu: 0.0.40
codegen_flags: <defaults>
</compile_context>

<pallas_src>
import functools
import math

import jax
import jax.numpy as jnp
from jax.experimental import pallas as pl
from jax.experimental.pallas import tpu as pltpu


def _round_up(n, m):
    return ((n + m - 1) // m) * m


def _layer_norm(v, gamma, beta, eps=1e-5):
    mu = jnp.mean(v, axis=-1, keepdims=True)
    var = jnp.mean((v - mu) ** 2, axis=-1, keepdims=True)
    return (v - mu) * jax.lax.rsqrt(var + eps) * gamma + beta


def _dqn_kernel(x_ref,
                wqkv_ref, wo_ref, bo_ref,
                g1_ref, be1_ref,
                w1_ref, b1_ref, w2_ref, b2_ref,
                g2_ref, be2_ref,
                wq1_ref, bq1_ref, wq2_ref, bq2_ref,
                out_ref, h2_scr, *, heads, head_dim):
    Bt, S, E = x_ref.shape
    H, Dh = heads, head_dim
    HD = H * Dh
    R = Bt * S
    cdt = wqkv_ref.dtype            # matmul operand dtype (f32 or bf16)
    scale = 1.0 / (E ** 0.5)        # reference scales by 1/sqrt(embed)

    # Fold batch into sublanes: [Bt, S, E] -> [Bt*S, E] (leading-dim merge, free).
    x2 = x_ref[...].reshape(R, E)

    # ---- fused QKV projection: one [R, E] x [E, 3*H*Dh] matmul (f32 accumulate) ----
    qkv = jnp.dot(x2, wqkv_ref[...], preferred_element_type=jnp.float32)
    q3 = qkv[:, 0 * HD:1 * HD].reshape(Bt, S, HD)
    k3 = qkv[:, 1 * HD:2 * HD].reshape(Bt, S, HD)
    v3 = qkv[:, 2 * HD:3 * HD].reshape(Bt, S, HD)

    # ---- attention: static per-head loop; the per-head output projection is
    # folded into the loop and summed, so no head-assembly scratch is needed. ----
    attn_out = None
    for h in range(H):
        sl = slice(h * Dh, (h + 1) * Dh)
        q_h = q3[:, :, sl].astype(cdt)
        k_h = k3[:, :, sl].astype(cdt)
        v_h = v3[:, :, sl].astype(cdt)
        s = jnp.einsum("bqd,bkd->bqk", q_h, k_h,
                       preferred_element_type=jnp.float32) * scale   # [Bt, S, S]
        m = jnp.max(s, axis=-1, keepdims=True)
        p = jnp.exp(s - m)
        att = p * pl.reciprocal(jnp.sum(p, axis=-1, keepdims=True), approx=True)
        o_h = jnp.einsum("bqk,bkd->bqd", att.astype(cdt), v_h,
                         preferred_element_type=jnp.float32)          # [Bt, S, Dh]
        part = jnp.dot(o_h.reshape(R, Dh).astype(cdt), wo_ref[h],
                       preferred_element_type=jnp.float32)            # [R, E]
        attn_out = part if attn_out is None else attn_out + part
    attn_out = attn_out + bo_ref[...]

    # ---- residual + norm, feed-forward, residual + norm (stats in f32) ----
    h1 = _layer_norm(attn_out + x2.astype(jnp.float32), g1_ref[...], be1_ref[...])
    ff = jnp.maximum(
        jnp.dot(h1.astype(cdt), w1_ref[...],
                preferred_element_type=jnp.float32) + b1_ref[...], 0.0)
    ff = jnp.dot(ff.astype(cdt), w2_ref[...],
                 preferred_element_type=jnp.float32) + b2_ref[...]
    h2 = _layer_norm(ff + h1, g2_ref[...], be2_ref[...])              # [R, E] f32

    # ---- q_val head: hq[b] = sum_s h2[b, s, :] @ wq1[s]  (batched over Bt).
    # Regroup via a small f32 VMEM scratch + stride-S ref loads (Mosaic-proven);
    # a sublane->lane flatten reshape to [Bt, S*E] risks a lowering failure.
    h2_scr[...] = h2
    n_hidden = bq1_ref.shape[-1]
    hq = jnp.zeros((Bt, n_hidden), jnp.float32)
    for s_idx in range(S):
        rows = h2_scr[pl.ds(s_idx, Bt, stride=S), :]                  # [Bt, E]
        hq = hq + jnp.dot(rows.astype(cdt), wq1_ref[s_idx],
                          preferred_element_type=jnp.float32)
    hq = jnp.maximum(hq + bq1_ref[...], 0.0)                          # [Bt, 64]
    qv = jnp.dot(hq.astype(cdt), wq2_ref[...],
                 preferred_element_type=jnp.float32) + bq2_ref[...]
    out_ref[...] = qv.astype(out_ref.dtype)                           # one [Bt, A] store


def transform_dqn_forward(x, params, *, batch_tile=128,
                          compute_dtype=jnp.float32):
    """x: [B, steps, heads, head_dim] float32 -> [B, actions] float32."""
    B, S, H, Dh = x.shape
    E = H * Dh
    HD = H * Dh
    A = params["wq2"].shape[-1]
    cdt = compute_dtype

    # Batch tile: <= ceil(B/2) so the grid always has >= 2 steps (v7x has 2 TCs),
    # rounded up to the 8-sublane tile, capped by batch_tile and by a rough VMEM
    # budget (~1.6 KiB of live f32 temporaries per folded row; keep per-step use
    # well under v5e's 16 MiB default scoped VMEM; v6e/v7x default to 32 MiB).
    Bt = min(batch_tile, (B + 1) // 2)
    Bt = max(8, _round_up(Bt, 8))
    Bt = min(Bt, 784)                      # 784 * S rows ~= 10 MiB of temporaries

    B_pad = _round_up(B, Bt)
    if B_pad // Bt < 2:
        B_pad = 2 * Bt                     # guarantee >= 2 grid steps

    xe = x.reshape(B, S, E).astype(cdt)
    if B_pad != B:
        # Only the remainder rows are zero; no copy when Bt | B with >= 2 tiles.
        xe = jnp.pad(xe, ((0, B_pad - B), (0, 0), (0, 0)))

    # Fuse the Q/K/V projections of all heads into one [E, 3*H*Dh] matrix
    # (free XLA ops in the wrapper, done once per call).
    wq_cat = jnp.transpose(params["wq"], (1, 0, 2)).reshape(E, HD)
    wk_cat = jnp.transpose(params["wk"], (1, 0, 2)).reshape(E, HD)
    wv_cat = jnp.transpose(params["wv"], (1, 0, 2)).reshape(E, HD)
    wqkv = jnp.concatenate([wq_cat, wk_cat, wv_cat], axis=1).astype(cdt)

    plist = [wqkv, params["wo"].astype(cdt), params["bo"],
             params["g1"], params["be1"],
             params["w1"].astype(cdt), params["b1"],
             params["w2"].astype(cdt), params["b2"],
             params["g2"], params["be2"],
             params["wq1"].astype(cdt), params["bq1"],
             params["wq2"].astype(cdt), params["bq2"]]

    def full_spec(arr):
        nd = arr.ndim
        return pl.BlockSpec(arr.shape, lambda b, _nd=nd: (0,) * _nd)

    kernel = functools.partial(_dqn_kernel, heads=H, head_dim=Dh)

    out = pl.pallas_call(
        kernel,
        out_shape=jax.ShapeDtypeStruct((B_pad, A), jnp.float32),
        grid=(B_pad // Bt,),
        in_specs=[pl.BlockSpec((Bt, S, E), lambda b: (b, 0, 0))]
                 + [full_spec(p) for p in plist],
        out_specs=pl.BlockSpec((Bt, A), lambda b: (b, 0)),
        scratch_shapes=[pltpu.VMEM((Bt * S, E), jnp.float32)],   # encoder output
        compiler_params=pltpu.CompilerParams(
            dimension_semantics=("parallel",)),
    )(xe, *plist)
    return out[:B]


def ref_forward(x, p, compute_dtype=jnp.float32):
    """Pure-JAX reference of the same math (matching matmul-operand casts)."""
    B, S, H, Dh = x.shape
    E = H * Dh
    cdt = compute_dtype
    f32 = jnp.float32
    xe = x.reshape(B, S, E).astype(f32)
    xc = xe.astype(cdt)
    scale = 1.0 / math.sqrt(E)
    q = jnp.einsum("bse,hed->bhsd", xc, p["wq"].astype(cdt), preferred_element_type=f32)
    k = jnp.einsum("bse,hed->bhsd", xc, p["wk"].astype(cdt), preferred_element_type=f32)
    v = jnp.einsum("bse,hed->bhsd", xc, p["wv"].astype(cdt), preferred_element_type=f32)
    scores = jnp.einsum("bhsd,bhtd->bhst", q.astype(cdt), k.astype(cdt),
                        preferred_element_type=f32) * scale
    att = jax.nn.softmax(scores, axis=-1)
    o = jnp.einsum("bhst,bhtd->bhsd", att.astype(cdt), v.astype(cdt),
                   preferred_element_type=f32)
    attn_out = jnp.einsum("bhsd,hde->bse", o.astype(cdt), p["wo"].astype(cdt),
                          preferred_element_type=f32) + p["bo"]

    def ln(vv, g, b):
        mu = vv.mean(-1, keepdims=True)
        var = ((vv - mu) ** 2).mean(-1, keepdims=True)
        return (vv - mu) / jnp.sqrt(var + 1e-5) * g + b

    h1 = ln(attn_out + xc.astype(f32), p["g1"], p["be1"])
    ff = jax.nn.relu(jnp.einsum("bse,ef->bsf", h1.astype(cdt), p["w1"].astype(cdt),
                                preferred_element_type=f32) + p["b1"])
    ff = jnp.einsum("bsf,fe->bse", ff.astype(cdt), p["w2"].astype(cdt),
                    preferred_element_type=f32) + p["b2"]
    h2 = ln(ff + h1, p["g2"], p["be2"])
    flat = h2.reshape(B, S * E)
    wq1 = p["wq1"].reshape(S * E, -1)
    hq = jax.nn.relu(jnp.einsum("bk,ko->bo", flat.astype(cdt), wq1.astype(cdt),
                                preferred_element_type=f32) + p["bq1"])
    return jnp.einsum("bh,ha->ba", hq.astype(cdt), p["wq2"].astype(cdt),
                      preferred_element_type=f32) + p["bq2"]


def make_params(key, steps, heads, head_dim, actions_n=2, forward_expansion=2):
    E = heads * head_dim
    F = forward_expansion * E
    ks = jax.random.split(key, 13)

    def init(k, shape, scale=0.1):
        return jax.random.normal(k, shape, jnp.float32) * scale

    return {
        # attention projections stored per-head: [H, E, Dh] / out proj [H, Dh, E]
        "wq": init(ks[0], (heads, E, head_dim)),
        "wk": init(ks[1], (heads, E, head_dim)),
        "wv": init(ks[2], (heads, E, head_dim)),
        "wo": init(ks[3], (heads, head_dim, E)),
        "bo": init(ks[4], (1, E)),
        "g1": jnp.ones((1, E), jnp.float32),
        "be1": jnp.zeros((1, E), jnp.float32),
        "w1": init(ks[5], (E, F)),
        "b1": init(ks[6], (1, F)),
        "w2": init(ks[7], (F, E)),
        "b2": init(ks[8], (1, E)),
        "g2": jnp.ones((1, E), jnp.float32),
        "be2": jnp.zeros((1, E), jnp.float32),
        # q_val head: Linear(steps*E, 64) stored as [steps, E, 64]
        "wq1": init(ks[9], (steps, E, 64)),
        "bq1": init(ks[10], (1, 64)),
        "wq2": init(ks[11], (64, actions_n)),
        "bq2": init(ks[12], (1, actions_n)),
    }


if __name__ == "__main__":
    # shape = (steps, heads, head_dim) = (8, 4, 8); actions_n = 2.
    B, S, H, Dh = 2, 8, 4, 8
    key = jax.random.PRNGKey(0)
    k_param, k_x = jax.random.split(key)
    params = make_params(k_param, S, H, Dh, actions_n=2, forward_expansion=2)

    # Small batch: Bt=8, padded to 16 -> 2 grid steps (keeps both v7x TCs busy).
    x = jax.random.normal(k_x, (B, S, H, Dh), jnp.float32)
    out = jax.block_until_ready(transform_dqn_forward(x, params))
    ref = jax.block_until_ready(ref_forward(x, params))
    assert out.shape == (B, 2)
    assert jnp.allclose(out, ref, atol=2e-3, rtol=2e-3), (out, ref)

    # Larger batch: exercises the batch-tiling + remainder-padding path (Bt=24).
    B2 = 33
    x2 = jax.random.normal(jax.random.PRNGKey(1), (B2, S, H, Dh), jnp.float32)
    out2 = jax.block_until_ready(transform_dqn_forward(x2, params))
    ref2 = jax.block_until_ready(ref_forward(x2, params))
    assert out2.shape == (B2, 2)
    assert jnp.allclose(out2, ref2, atol=2e-3, rtol=2e-3)

    # bf16 matmul operands (v6e/v7x MXU-native path), f32 accumulation/statistics;
    # compared against a reference that casts matmul operands identically.
    B3 = 64
    x3 = jax.random.normal(jax.random.PRNGKey(2), (B3, S, H, Dh), jnp.float32)
    out3 = jax.block_until_ready(
        transform_dqn_forward(x3, params, compute_dtype=jnp.bfloat16))
    ref3 = jax.block_until_ready(ref_forward(x3, params, compute_dtype=jnp.bfloat16))
    assert out3.shape == (B3, 2)
    assert jnp.allclose(out3, ref3, atol=2e-2, rtol=2e-2)

    print("KERNEL_OK")
</pallas_src>

<mosaic_0001>
module attributes {stable_mosaic.version = 11 : i64} {
  func.func @_dqn_kernel(%arg0: i32, %arg1: memref<8x8x32xf32, #tpu.memory_space<vmem>>, %arg2: memref<32x96xf32, #tpu.memory_space<vmem>>, %arg3: memref<4x8x32xf32, #tpu.memory_space<vmem>>, %arg4: memref<1x32xf32, #tpu.memory_space<vmem>>, %arg5: memref<1x32xf32, #tpu.memory_space<vmem>>, %arg6: memref<1x32xf32, #tpu.memory_space<vmem>>, %arg7: memref<32x64xf32, #tpu.memory_space<vmem>>, %arg8: memref<1x64xf32, #tpu.memory_space<vmem>>, %arg9: memref<64x32xf32, #tpu.memory_space<vmem>>, %arg10: memref<1x32xf32, #tpu.memory_space<vmem>>, %arg11: memref<1x32xf32, #tpu.memory_space<vmem>>, %arg12: memref<1x32xf32, #tpu.memory_space<vmem>>, %arg13: memref<8x32x64xf32, #tpu.memory_space<vmem>>, %arg14: memref<1x64xf32, #tpu.memory_space<vmem>>, %arg15: memref<64x2xf32, #tpu.memory_space<vmem>>, %arg16: memref<1x2xf32, #tpu.memory_space<vmem>>, %arg17: memref<8x2xf32, #tpu.memory_space<vmem>>, %arg18: memref<64x32xf32, #tpu.memory_space<vmem>>) attributes {dimension_semantics = [#tpu.dimension_semantics<parallel>], iteration_bounds = array<i64: 2>, scalar_prefetch = 0 : i64, scratch_operands = 1 : i64, tpu.core_type = #tpu.core_type<tc>, window_params = [{transform_indices = @transform_0, window_bounds = array<i64: 8, 8, 32>}, {pipeline_mode = #tpu.pipeline_mode<synchronous>, transform_indices = @transform_1, window_bounds = array<i64: 32, 96>}, {pipeline_mode = #tpu.pipeline_mode<synchronous>, transform_indices = @transform_2, window_bounds = array<i64: 4, 8, 32>}, {pipeline_mode = #tpu.pipeline_mode<synchronous>, transform_indices = @transform_3, window_bounds = array<i64: 1, 32>}, {pipeline_mode = #tpu.pipeline_mode<synchronous>, transform_indices = @transform_4, window_bounds = array<i64: 1, 32>}, {pipeline_mode = #tpu.pipeline_mode<synchronous>, transform_indices = @transform_5, window_bounds = array<i64: 1, 32>}, {pipeline_mode = #tpu.pipeline_mode<synchronous>, transform_indices = @transform_6, window_bounds = array<i64: 32, 64>}, {pipeline_mode = #tpu.pipeline_mode<synchronous>, transform_indices = @transform_7, window_bounds = array<i64: 1, 64>}, {pipeline_mode = #tpu.pipeline_mode<synchronous>, transform_indices = @transform_8, window_bounds = array<i64: 64, 32>}, {pipeline_mode = #tpu.pipeline_mode<synchronous>, transform_indices = @transform_9, window_bounds = array<i64: 1, 32>}, {pipeline_mode = #tpu.pipeline_mode<synchronous>, transform_indices = @transform_10, window_bounds = array<i64: 1, 32>}, {pipeline_mode = #tpu.pipeline_mode<synchronous>, transform_indices = @transform_11, window_bounds = array<i64: 1, 32>}, {pipeline_mode = #tpu.pipeline_mode<synchronous>, transform_indices = @transform_12, window_bounds = array<i64: 8, 32, 64>}, {pipeline_mode = #tpu.pipeline_mode<synchronous>, transform_indices = @transform_13, window_bounds = array<i64: 1, 64>}, {pipeline_mode = #tpu.pipeline_mode<synchronous>, transform_indices = @transform_14, window_bounds = array<i64: 64, 2>}, {pipeline_mode = #tpu.pipeline_mode<synchronous>, transform_indices = @transform_15, window_bounds = array<i64: 1, 2>}, {transform_indices = @transform_16, window_bounds = array<i64: 8, 2>}]} {
    %c0 = arith.constant 0 : index
    %c0_0 = arith.constant 0 : index
    %c0_1 = arith.constant 0 : index
    %0 = vector.load %arg1[%c0, %c0_0, %c0_1] : memref<8x8x32xf32, #tpu.memory_space<vmem>>, vector<8x8x32xf32>
    %1 = vector.shape_cast %0 : vector<8x8x32xf32> to vector<64x32xf32>
    %c0_2 = arith.constant 0 : index
    %c0_3 = arith.constant 0 : index
    %2 = vector.load %arg2[%c0_2, %c0_3] : memref<32x96xf32, #tpu.memory_space<vmem>>, vector<32x96xf32>
    %cst = arith.constant dense<0.000000e+00> : vector<64x96xf32>
    %3 = tpu.matmul %1, %2, %cst {dimension_numbers = #tpu.dot_dimension_numbers<[1], [0], [0], [1], [0, 0, 1, 1], [], []>} : vector<64x32xf32>, vector<32x96xf32>, vector<64x96xf32> -> vector<64x96xf32>
    %4 = vector.extract_strided_slice %3 {offsets = [0, 0], sizes = [64, 32], strides = [1, 1]} : vector<64x96xf32> to vector<64x32xf32>
    %5 = vector.shape_cast %4 : vector<64x32xf32> to vector<8x8x32xf32>
    %6 = vector.extract_strided_slice %3 {offsets = [0, 32], sizes = [64, 32], strides = [1, 1]} : vector<64x96xf32> to vector<64x32xf32>
    %7 = vector.shape_cast %6 : vector<64x32xf32> to vector<8x8x32xf32>
    %8 = vector.extract_strided_slice %3 {offsets = [0, 64], sizes = [64, 32], strides = [1, 1]} : vector<64x96xf32> to vector<64x32xf32>
    %9 = vector.shape_cast %8 : vector<64x32xf32> to vector<8x8x32xf32>
    %10 = vector.extract_strided_slice %5 {offsets = [0, 0, 0], sizes = [8, 8, 8], strides = [1, 1, 1]} : vector<8x8x32xf32> to vector<8x8x8xf32>
    %11 = vector.extract_strided_slice %7 {offsets = [0, 0, 0], sizes = [8, 8, 8], strides = [1, 1, 1]} : vector<8x8x32xf32> to vector<8x8x8xf32>
    %12 = vector.extract_strided_slice %9 {offsets = [0, 0, 0], sizes = [8, 8, 8], strides = [1, 1, 1]} : vector<8x8x32xf32> to vector<8x8x8xf32>
    "tpu.trace_start"() <{level = 10 : i32, message = "bqd,bkd->bqk"}> : () -> ()
    %cst_4 = arith.constant dense<0.000000e+00> : vector<8x8x8xf32>
    %13 = tpu.matmul %10, %11, %cst_4 {dimension_numbers = #tpu.dot_dimension_numbers<[2], [2], [1], [1], [0, 0, 0, 1, 1, 1], [0], [0]>} : vector<8x8x8xf32>, vector<8x8x8xf32>, vector<8x8x8xf32> -> vector<8x8x8xf32>
    "tpu.trace_stop"() : () -> ()
    %cst_5 = arith.constant 0.176776692 : f32
    %14 = vector.broadcast %cst_5 : f32 to vector<8x8x8xf32>
    %15 = arith.mulf %13, %14 : vector<8x8x8xf32>
    %cst_6 = arith.constant dense<0xFF800000> : vector<8x8xf32>
    %16 = vector.multi_reduction <maximumf>, %15, %cst_6 [2] : vector<8x8x8xf32> to vector<8x8xf32>
    %17 = vector.shape_cast %16 : vector<8x8xf32> to vector<8x8x1xf32>
    %18 = vector.broadcast %17 : vector<8x8x1xf32> to vector<8x8x8xf32>
    %19 = arith.subf %15, %18 : vector<8x8x8xf32>
    %20 = math.exp %19 : vector<8x8x8xf32>
    %cst_7 = arith.constant dense<0.000000e+00> : vector<8x8xf32>
    %21 = vector.multi_reduction <add>, %20, %cst_7 [2] : vector<8x8x8xf32> to vector<8x8xf32>
    %22 = vector.shape_cast %21 : vector<8x8xf32> to vector<8x8x1xf32>
    %23 = tpu.reciprocal %22 {approx = true} : vector<8x8x1xf32> -> vector<8x8x1xf32>
    %24 = vector.broadcast %23 : vector<8x8x1xf32> to vector<8x8x8xf32>
    %25 = arith.mulf %20, %24 : vector<8x8x8xf32>
    "tpu.trace_start"() <{level = 10 : i32, message = "bqk,bkd->bqd"}> : () -> ()
    %cst_8 = arith.constant dense<0.000000e+00> : vector<8x8x8xf32>
    %26 = tpu.matmul %25, %12, %cst_8 {dimension_numbers = #tpu.dot_dimension_numbers<[2], [1], [1], [2], [0, 0, 0, 1, 1, 2], [0], [0]>} : vector<8x8x8xf32>, vector<8x8x8xf32>, vector<8x8x8xf32> -> vector<8x8x8xf32>
    "tpu.trace_stop"() : () -> ()
    %27 = vector.shape_cast %26 : vector<8x8x8xf32> to vector<64x8xf32>
    %c0_9 = arith.constant 0 : index
    %c0_10 = arith.constant 0 : index
    %c0_11 = arith.constant 0 : index
    %28 = vector.load %arg3[%c0_9, %c0_10, %c0_11] : memref<4x8x32xf32, #tpu.memory_space<vmem>>, vector<1x8x32xf32>
    %29 = vector.shape_cast %28 : vector<1x8x32xf32> to vector<8x32xf32>
    %cst_12 = arith.constant dense<0.000000e+00> : vector<64x32xf32>
    %30 = tpu.matmul %27, %29, %cst_12 {dimension_numbers = #tpu.dot_dimension_numbers<[1], [0], [0], [1], [0, 0, 1, 1], [], []>} : vector<64x8xf32>, vector<8x32xf32>, vector<64x32xf32> -> vector<64x32xf32>
    %31 = vector.extract_strided_slice %5 {offsets = [0, 0, 8], sizes = [8, 8, 8], strides = [1, 1, 1]} : vector<8x8x32xf32> to vector<8x8x8xf32>
    %32 = vector.extract_strided_slice %7 {offsets = [0, 0, 8], sizes = [8, 8, 8], strides = [1, 1, 1]} : vector<8x8x32xf32> to vector<8x8x8xf32>
    %33 = vector.extract_strided_slice %9 {offsets = [0, 0, 8], sizes = [8, 8, 8], strides = [1, 1, 1]} : vector<8x8x32xf32> to vector<8x8x8xf32>
    "tpu.trace_start"() <{level = 10 : i32, message = "bqd,bkd->bqk"}> : () -> ()
    %cst_13 = arith.constant dense<0.000000e+00> : vector<8x8x8xf32>
    %34 = tpu.matmul %31, %32, %cst_13 {dimension_numbers = #tpu.dot_dimension_numbers<[2], [2], [1], [1], [0, 0, 0, 1, 1, 1], [0], [0]>} : vector<8x8x8xf32>, vector<8x8x8xf32>, vector<8x8x8xf32> -> vector<8x8x8xf32>
    "tpu.trace_stop"() : () -> ()
    %cst_14 = arith.constant 0.176776692 : f32
    %35 = vector.broadcast %cst_14 : f32 to vector<8x8x8xf32>
    %36 = arith.mulf %34, %35 : vector<8x8x8xf32>
    %cst_15 = arith.constant dense<0xFF800000> : vector<8x8xf32>
    %37 = vector.multi_reduction <maximumf>, %36, %cst_15 [2] : vector<8x8x8xf32> to vector<8x8xf32>
    %38 = vector.shape_cast %37 : vector<8x8xf32> to vector<8x8x1xf32>
    %39 = vector.broadcast %38 : vector<8x8x1xf32> to vector<8x8x8xf32>
    %40 = arith.subf %36, %39 : vector<8x8x8xf32>
    %41 = math.exp %40 : vector<8x8x8xf32>
    %cst_16 = arith.constant dense<0.000000e+00> : vector<8x8xf32>
    %42 = vector.multi_reduction <add>, %41, %cst_16 [2] : vector<8x8x8xf32> to vector<8x8xf32>
    %43 = vector.shape_cast %42 : vector<8x8xf32> to vector<8x8x1xf32>
    %44 = tpu.reciprocal %43 {approx = true} : vector<8x8x1xf32> -> vector<8x8x1xf32>
    %45 = vector.broadcast %44 : vector<8x8x1xf32> to vector<8x8x8xf32>
    %46 = arith.mulf %41, %45 : vector<8x8x8xf32>
    "tpu.trace_start"() <{level = 10 : i32, message = "bqk,bkd->bqd"}> : () -> ()
    %cst_17 = arith.constant dense<0.000000e+00> : vector<8x8x8xf32>
    %47 = tpu.matmul %46, %33, %cst_17 {dimension_numbers = #tpu.dot_dimension_numbers<[2], [1], [1], [2], [0, 0, 0, 1, 1, 2], [0], [0]>} : vector<8x8x8xf32>, vector<8x8x8xf32>, vector<8x8x8xf32> -> vector<8x8x8xf32>
    "tpu.trace_stop"() : () -> ()
    %48 = vector.shape_cast %47 : vector<8x8x8xf32> to vector<64x8xf32>
    %c1 = arith.constant 1 : index
    %c0_18 = arith.constant 0 : index
    %c0_19 = arith.constant 0 : index
    %49 = vector.load %arg3[%c1, %c0_18, %c0_19] : memref<4x8x32xf32, #tpu.memory_space<vmem>>, vector<1x8x32xf32>
    %50 = vector.shape_cast %49 : vector<1x8x32xf32> to vector<8x32xf32>
    %cst_20 = arith.constant dense<0.000000e+00> : vector<64x32xf32>
    %51 = tpu.matmul %48, %50, %cst_20 {dimension_numbers = #tpu.dot_dimension_numbers<[1], [0], [0], [1], [0, 0, 1, 1], [], []>} : vector<64x8xf32>, vector<8x32xf32>, vector<64x32xf32> -> vector<64x32xf32>
    %52 = arith.addf %30, %51 : vector<64x32xf32>
    %53 = vector.extract_strided_slice %5 {offsets = [0, 0, 16], sizes = [8, 8, 8], strides = [1, 1, 1]} : vector<8x8x32xf32> to vector<8x8x8xf32>
    %54 = vector.extract_strided_slice %7 {offsets = [0, 0, 16], sizes = [8, 8, 8], strides = [1, 1, 1]} : vector<8x8x32xf32> to vector<8x8x8xf32>
    %55 = vector.extract_strided_slice %9 {offsets = [0, 0, 16], sizes = [8, 8, 8], strides = [1, 1, 1]} : vector<8x8x32xf32> to vector<8x8x8xf32>
    "tpu.trace_start"() <{level = 10 : i32, message = "bqd,bkd->bqk"}> : () -> ()
    %cst_21 = arith.constant dense<0.000000e+00> : vector<8x8x8xf32>
    %56 = tpu.matmul %53, %54, %cst_21 {dimension_numbers = #tpu.dot_dimension_numbers<[2], [2], [1], [1], [0, 0, 0, 1, 1, 1], [0], [0]>} : vector<8x8x8xf32>, vector<8x8x8xf32>, vector<8x8x8xf32> -> vector<8x8x8xf32>
    "tpu.trace_stop"() : () -> ()
    %cst_22 = arith.constant 0.176776692 : f32
    %57 = vector.broadcast %cst_22 : f32 to vector<8x8x8xf32>
    %58 = arith.mulf %56, %57 : vector<8x8x8xf32>
    %cst_23 = arith.constant dense<0xFF800000> : vector<8x8xf32>
    %59 = vector.multi_reduction <maximumf>, %58, %cst_23 [2] : vector<8x8x8xf32> to vector<8x8xf32>
    %60 = vector.shape_cast %59 : vector<8x8xf32> to vector<8x8x1xf32>
    %61 = vector.broadcast %60 : vector<8x8x1xf32> to vector<8x8x8xf32>
    %62 = arith.subf %58, %61 : vector<8x8x8xf32>
    %63 = math.exp %62 : vector<8x8x8xf32>
    %cst_24 = arith.constant dense<0.000000e+00> : vector<8x8xf32>
    %64 = vector.multi_reduction <add>, %63, %cst_24 [2] : vector<8x8x8xf32> to vector<8x8xf32>
    %65 = vector.shape_cast %64 : vector<8x8xf32> to vector<8x8x1xf32>
    %66 = tpu.reciprocal %65 {approx = true} : vector<8x8x1xf32> -> vector<8x8x1xf32>
    %67 = vector.broadcast %66 : vector<8x8x1xf32> to vector<8x8x8xf32>
    %68 = arith.mulf %63, %67 : vector<8x8x8xf32>
    "tpu.trace_start"() <{level = 10 : i32, message = "bqk,bkd->bqd"}> : () -> ()
    %cst_25 = arith.constant dense<0.000000e+00> : vector<8x8x8xf32>
    %69 = tpu.matmul %68, %55, %cst_25 {dimension_numbers = #tpu.dot_dimension_numbers<[2], [1], [1], [2], [0, 0, 0, 1, 1, 2], [0], [0]>} : vector<8x8x8xf32>, vector<8x8x8xf32>, vector<8x8x8xf32> -> vector<8x8x8xf32>
    "tpu.trace_stop"() : () -> ()
    %70 = vector.shape_cast %69 : vector<8x8x8xf32> to vector<64x8xf32>
    %c2 = arith.constant 2 : index
    %c0_26 = arith.constant 0 : index
    %c0_27 = arith.constant 0 : index
    %71 = vector.load %arg3[%c2, %c0_26, %c0_27] : memref<4x8x32xf32, #tpu.memory_space<vmem>>, vector<1x8x32xf32>
    %72 = vector.shape_cast %71 : vector<1x8x32xf32> to vector<8x32xf32>
    %cst_28 = arith.constant dense<0.000000e+00> : vector<64x32xf32>
    %73 = tpu.matmul %70, %72, %cst_28 {dimension_numbers = #tpu.dot_dimension_numbers<[1], [0], [0], [1], [0, 0, 1, 1], [], []>} : vector<64x8xf32>, vector<8x32xf32>, vector<64x32xf32> -> vector<64x32xf32>
    %74 = arith.addf %52, %73 : vector<64x32xf32>
    %75 = vector.extract_strided_slice %5 {offsets = [0, 0, 24], sizes = [8, 8, 8], strides = [1, 1, 1]} : vector<8x8x32xf32> to vector<8x8x8xf32>
    %76 = vector.extract_strided_slice %7 {offsets = [0, 0, 24], sizes = [8, 8, 8], strides = [1, 1, 1]} : vector<8x8x32xf32> to vector<8x8x8xf32>
    %77 = vector.extract_strided_slice %9 {offsets = [0, 0, 24], sizes = [8, 8, 8], strides = [1, 1, 1]} : vector<8x8x32xf32> to vector<8x8x8xf32>
    "tpu.trace_start"() <{level = 10 : i32, message = "bqd,bkd->bqk"}> : () -> ()
    %cst_29 = arith.constant dense<0.000000e+00> : vector<8x8x8xf32>
    %78 = tpu.matmul %75, %76, %cst_29 {dimension_numbers = #tpu.dot_dimension_numbers<[2], [2], [1], [1], [0, 0, 0, 1, 1, 1], [0], [0]>} : vector<8x8x8xf32>, vector<8x8x8xf32>, vector<8x8x8xf32> -> vector<8x8x8xf32>
    "tpu.trace_stop"() : () -> ()
    %cst_30 = arith.constant 0.176776692 : f32
    %79 = vector.broadcast %cst_30 : f32 to vector<8x8x8xf32>
    %80 = arith.mulf %78, %79 : vector<8x8x8xf32>
    %cst_31 = arith.constant dense<0xFF800000> : vector<8x8xf32>
    %81 = vector.multi_reduction <maximumf>, %80, %cst_31 [2] : vector<8x8x8xf32> to vector<8x8xf32>
    %82 = vector.shape_cast %81 : vector<8x8xf32> to vector<8x8x1xf32>
    %83 = vector.broadcast %82 : vector<8x8x1xf32> to vector<8x8x8xf32>
    %84 = arith.subf %80, %83 : vector<8x8x8xf32>
    %85 = math.exp %84 : vector<8x8x8xf32>
    %cst_32 = arith.constant dense<0.000000e+00> : vector<8x8xf32>
    %86 = vector.multi_reduction <add>, %85, %cst_32 [2] : vector<8x8x8xf32> to vector<8x8xf32>
    %87 = vector.shape_cast %86 : vector<8x8xf32> to vector<8x8x1xf32>
    %88 = tpu.reciprocal %87 {approx = true} : vector<8x8x1xf32> -> vector<8x8x1xf32>
    %89 = vector.broadcast %88 : vector<8x8x1xf32> to vector<8x8x8xf32>
    %90 = arith.mulf %85, %89 : vector<8x8x8xf32>
    "tpu.trace_start"() <{level = 10 : i32, message = "bqk,bkd->bqd"}> : () -> ()
    %cst_33 = arith.constant dense<0.000000e+00> : vector<8x8x8xf32>
    %91 = tpu.matmul %90, %77, %cst_33 {dimension_numbers = #tpu.dot_dimension_numbers<[2], [1], [1], [2], [0, 0, 0, 1, 1, 2], [0], [0]>} : vector<8x8x8xf32>, vector<8x8x8xf32>, vector<8x8x8xf32> -> vector<8x8x8xf32>
    "tpu.trace_stop"() : () -> ()
    %92 = vector.shape_cast %91 : vector<8x8x8xf32> to vector<64x8xf32>
    %c3 = arith.constant 3 : index
    %c0_34 = arith.constant 0 : index
    %c0_35 = arith.constant 0 : index
    %93 = vector.load %arg3[%c3, %c0_34, %c0_35] : memref<4x8x32xf32, #tpu.memory_space<vmem>>, vector<1x8x32xf32>
    %94 = vector.shape_cast %93 : vector<1x8x32xf32> to vector<8x32xf32>
    %cst_36 = arith.constant dense<0.000000e+00> : vector<64x32xf32>
    %95 = tpu.matmul %92, %94, %cst_36 {dimension_numbers = #tpu.dot_dimension_numbers<[1], [0], [0], [1], [0, 0, 1, 1], [], []>} : vector<64x8xf32>, vector<8x32xf32>, vector<64x32xf32> -> vector<64x32xf32>
    %96 = arith.addf %74, %95 : vector<64x32xf32>
    %c0_37 = arith.constant 0 : index
    %c0_38 = arith.constant 0 : index
    %97 = vector.load %arg4[%c0_37, %c0_38] : memref<1x32xf32, #tpu.memory_space<vmem>>, vector<1x32xf32>
    %98 = vector.broadcast %97 : vector<1x32xf32> to vector<64x32xf32>
    %99 = arith.addf %96, %98 : vector<64x32xf32>
    %100 = arith.addf %99, %1 : vector<64x32xf32>
    %c0_39 = arith.constant 0 : index
    %c0_40 = arith.constant 0 : index
    %101 = vector.load %arg5[%c0_39, %c0_40] : memref<1x32xf32, #tpu.memory_space<vmem>>, vector<1x32xf32>
    %c0_41 = arith.constant 0 : index
    %c0_42 = arith.constant 0 : index
    %102 = vector.load %arg6[%c0_41, %c0_42] : memref<1x32xf32, #tpu.memory_space<vmem>>, vector<1x32xf32>
    %cst_43 = arith.constant dense<0.000000e+00> : vector<64xf32>
    %103 = vector.multi_reduction <add>, %100, %cst_43 [1] : vector<64x32xf32> to vector<64xf32>
    %104 = vector.shape_cast %103 : vector<64xf32> to vector<64x1xf32>
    %cst_44 = arith.constant 3.200000e+01 : f32
    %105 = vector.broadcast %cst_44 : f32 to vector<64x1xf32>
    %106 = arith.divf %104, %105 : vector<64x1xf32>
    %107 = vector.broadcast %106 : vector<64x1xf32> to vector<64x32xf32>
    %108 = arith.subf %100, %107 : vector<64x32xf32>
    %109 = arith.mulf %108, %108 : vector<64x32xf32>
    %cst_45 = arith.constant dense<0.000000e+00> : vector<64xf32>
    %110 = vector.multi_reduction <add>, %109, %cst_45 [1] : vector<64x32xf32> to vector<64xf32>
    %111 = vector.shape_cast %110 : vector<64xf32> to vector<64x1xf32>
    %cst_46 = arith.constant 3.200000e+01 : f32
    %112 = vector.broadcast %cst_46 : f32 to vector<64x1xf32>
    %113 = arith.divf %111, %112 : vector<64x1xf32>
    %114 = vector.broadcast %106 : vector<64x1xf32> to vector<64x32xf32>
    %115 = arith.subf %100, %114 : vector<64x32xf32>
    %cst_47 = arith.constant 9.99999974E-6 : f32
    %116 = vector.broadcast %cst_47 : f32 to vector<64x1xf32>
    %117 = arith.addf %113, %116 : vector<64x1xf32>
    %118 = math.rsqrt %117 : vector<64x1xf32>
    %119 = vector.broadcast %118 : vector<64x1xf32> to vector<64x32xf32>
    %120 = arith.mulf %115, %119 : vector<64x32xf32>
    %121 = vector.broadcast %101 : vector<1x32xf32> to vector<64x32xf32>
    %122 = arith.mulf %120, %121 : vector<64x32xf32>
    %123 = vector.broadcast %102 : vector<1x32xf32> to vector<64x32xf32>
    %124 = arith.addf %122, %123 : vector<64x32xf32>
    %c0_48 = arith.constant 0 : index
    %c0_49 = arith.constant 0 : index
    %125 = vector.load %arg7[%c0_48, %c0_49] : memref<32x64xf32, #tpu.memory_space<vmem>>, vector<32x64xf32>
    %cst_50 = arith.constant dense<0.000000e+00> : vector<64x64xf32>
    %126 = tpu.matmul %124, %125, %cst_50 {dimension_numbers = #tpu.dot_dimension_numbers<[1], [0], [0], [1], [0, 0, 1, 1], [], []>} : vector<64x32xf32>, vector<32x64xf32>, vector<64x64xf32> -> vector<64x64xf32>
    %c0_51 = arith.constant 0 : index
    %c0_52 = arith.constant 0 : index
    %127 = vector.load %arg8[%c0_51, %c0_52] : memref<1x64xf32, #tpu.memory_space<vmem>>, vector<1x64xf32>
    %128 = vector.broadcast %127 : vector<1x64xf32> to vector<64x64xf32>
    %129 = arith.addf %126, %128 : vector<64x64xf32>
    %cst_53 = arith.constant 0.000000e+00 : f32
    %130 = vector.broadcast %cst_53 : f32 to vector<64x64xf32>
    %131 = arith.maximumf %129, %130 : vector<64x64xf32>
    %c0_54 = arith.constant 0 : index
    %c0_55 = arith.constant 0 : index
    %132 = vector.load %arg9[%c0_54, %c0_55] : memref<64x32xf32, #tpu.memory_space<vmem>>, vector<64x32xf32>
    %cst_56 = arith.constant dense<0.000000e+00> : vector<64x32xf32>
    %133 = tpu.matmul %131, %132, %cst_56 {dimension_numbers = #tpu.dot_dimension_numbers<[1], [0], [0], [1], [0, 0, 1, 1], [], []>} : vector<64x64xf32>, vector<64x32xf32>, vector<64x32xf32> -> vector<64x32xf32>
    %c0_57 = arith.constant 0 : index
    %c0_58 = arith.constant 0 : index
    %134 = vector.load %arg10[%c0_57, %c0_58] : memref<1x32xf32, #tpu.memory_space<vmem>>, vector<1x32xf32>
    %135 = vector.broadcast %134 : vector<1x32xf32> to vector<64x32xf32>
    %136 = arith.addf %133, %135 : vector<64x32xf32>
    %137 = arith.addf %136, %124 : vector<64x32xf32>
    %c0_59 = arith.constant 0 : index
    %c0_60 = arith.constant 0 : index
    %138 = vector.load %arg11[%c0_59, %c0_60] : memref<1x32xf32, #tpu.memory_space<vmem>>, vector<1x32xf32>
    %c0_61 = arith.constant 0 : index
    %c0_62 = arith.constant 0 : index
    %139 = vector.load %arg12[%c0_61, %c0_62] : memref<1x32xf32, #tpu.memory_space<vmem>>, vector<1x32xf32>
    %cst_63 = arith.constant dense<0.000000e+00> : vector<64xf32>
    %140 = vector.multi_reduction <add>, %137, %cst_63 [1] : vector<64x32xf32> to vector<64xf32>
    %141 = vector.shape_cast %140 : vector<64xf32> to vector<64x1xf32>
    %cst_64 = arith.constant 3.200000e+01 : f32
    %142 = vector.broadcast %cst_64 : f32 to vector<64x1xf32>
    %143 = arith.divf %141, %142 : vector<64x1xf32>
    %144 = vector.broadcast %143 : vector<64x1xf32> to vector<64x32xf32>
    %145 = arith.subf %137, %144 : vector<64x32xf32>
    %146 = arith.mulf %145, %145 : vector<64x32xf32>
    %cst_65 = arith.constant dense<0.000000e+00> : vector<64xf32>
    %147 = vector.multi_reduction <add>, %146, %cst_65 [1] : vector<64x32xf32> to vector<64xf32>
    %148 = vector.shape_cast %147 : vector<64xf32> to vector<64x1xf32>
    %cst_66 = arith.constant 3.200000e+01 : f32
    %149 = vector.broadcast %cst_66 : f32 to vector<64x1xf32>
    %150 = arith.divf %148, %149 : vector<64x1xf32>
    %151 = vector.broadcast %143 : vector<64x1xf32> to vector<64x32xf32>
    %152 = arith.subf %137, %151 : vector<64x32xf32>
    %cst_67 = arith.constant 9.99999974E-6 : f32
    %153 = vector.broadcast %cst_67 : f32 to vector<64x1xf32>
    %154 = arith.addf %150, %153 : vector<64x1xf32>
    %155 = math.rsqrt %154 : vector<64x1xf32>
    %156 = vector.broadcast %155 : vector<64x1xf32> to vector<64x32xf32>
    %157 = arith.mulf %152, %156 : vector<64x32xf32>
    %158 = vector.broadcast %138 : vector<1x32xf32> to vector<64x32xf32>
    %159 = arith.mulf %157, %158 : vector<64x32xf32>
    %160 = vector.broadcast %139 : vector<1x32xf32> to vector<64x32xf32>
    %161 = arith.addf %159, %160 : vector<64x32xf32>
    %c0_68 = arith.constant 0 : index
    %c0_69 = arith.constant 0 : index
    %162 = vector.load %arg18[%c0_68, %c0_69] : memref<64x32xf32, #tpu.memory_space<vmem>>, vector<64x32xf32>
    tpu.vector_store %arg18[%c0_68, %c0_69], %161 {strides = array<i32>} : memref<64x32xf32, #tpu.memory_space<vmem>>, vector<64x32xf32>,
    %cst_70 = arith.constant 0.000000e+00 : f32
    %163 = vector.broadcast %cst_70 : f32 to vector<8x64xf32>
    %c0_71 = arith.constant 0 : index
    %c0_72 = arith.constant 0 : index
    %164 = tpu.strided_load %arg18[%c0_71, %c0_72] {strides = array<i32: 8, 1>} : memref<64x32xf32, #tpu.memory_space<vmem>>, vector<8x32xf32>
    %c0_73 = arith.constant 0 : index
    %c0_74 = arith.constant 0 : index
    %c0_75 = arith.constant 0 : index
    %165 = vector.load %arg13[%c0_73, %c0_74, %c0_75] : memref<8x32x64xf32, #tpu.memory_space<vmem>>, vector<1x32x64xf32>
    %166 = vector.shape_cast %165 : vector<1x32x64xf32> to vector<32x64xf32>
    %cst_76 = arith.constant dense<0.000000e+00> : vector<8x64xf32>
    %167 = tpu.matmul %164, %166, %cst_76 {dimension_numbers = #tpu.dot_dimension_numbers<[1], [0], [0], [1], [0, 0, 1, 1], [], []>} : vector<8x32xf32>, vector<32x64xf32>, vector<8x64xf32> -> vector<8x64xf32>
    %168 = arith.addf %163, %167 : vector<8x64xf32>
    %c1_77 = arith.constant 1 : index
    %c0_78 = arith.constant 0 : index
    %169 = tpu.strided_load %arg18[%c1_77, %c0_78] {strides = array<i32: 8, 1>} : memref<64x32xf32, #tpu.memory_space<vmem>>, vector<8x32xf32>
    %c1_79 = arith.constant 1 : index
    %c0_80 = arith.constant 0 : index
    %c0_81 = arith.constant 0 : index
    %170 = vector.load %arg13[%c1_79, %c0_80, %c0_81] : memref<8x32x64xf32, #tpu.memory_space<vmem>>, vector<1x32x64xf32>
    %171 = vector.shape_cast %170 : vector<1x32x64xf32> to vector<32x64xf32>
    %cst_82 = arith.constant dense<0.000000e+00> : vector<8x64xf32>
    %172 = tpu.matmul %169, %171, %cst_82 {dimension_numbers = #tpu.dot_dimension_numbers<[1], [0], [0], [1], [0, 0, 1, 1], [], []>} : vector<8x32xf32>, vector<32x64xf32>, vector<8x64xf32> -> vector<8x64xf32>
    %173 = arith.addf %168, %172 : vector<8x64xf32>
    %c2_83 = arith.constant 2 : index
    %c0_84 = arith.constant 0 : index
    %174 = tpu.strided_load %arg18[%c2_83, %c0_84] {strides = array<i32: 8, 1>} : memref<64x32xf32, #tpu.memory_space<vmem>>, vector<8x32xf32>
    %c2_85 = arith.constant 2 : index
    %c0_86 = arith.constant 0 : index
    %c0_87 = arith.constant 0 : index
    %175 = vector.load %arg13[%c2_85, %c0_86, %c0_87] : memref<8x32x64xf32, #tpu.memory_space<vmem>>, vector<1x32x64xf32>
    %176 = vector.shape_cast %175 : vector<1x32x64xf32> to vector<32x64xf32>
    %cst_88 = arith.constant dense<0.000000e+00> : vector<8x64xf32>
    %177 = tpu.matmul %174, %176, %cst_88 {dimension_numbers = #tpu.dot_dimension_numbers<[1], [0], [0], [1], [0, 0, 1, 1], [], []>} : vector<8x32xf32>, vector<32x64xf32>, vector<8x64xf32> -> vector<8x64xf32>
    %178 = arith.addf %173, %177 : vector<8x64xf32>
    %c3_89 = arith.constant 3 : index
    %c0_90 = arith.constant 0 : index
    %179 = tpu.strided_load %arg18[%c3_89, %c0_90] {strides = array<i32: 8, 1>} : memref<64x32xf32, #tpu.memory_space<vmem>>, vector<8x32xf32>
    %c3_91 = arith.constant 3 : index
    %c0_92 = arith.constant 0 : index
    %c0_93 = arith.constant 0 : index
    %180 = vector.load %arg13[%c3_91, %c0_92, %c0_93] : memref<8x32x64xf32, #tpu.memory_space<vmem>>, vector<1x32x64xf32>
    %181 = vector.shape_cast %180 : vector<1x32x64xf32> to vector<32x64xf32>
    %cst_94 = arith.constant dense<0.000000e+00> : vector<8x64xf32>
    %182 = tpu.matmul %179, %181, %cst_94 {dimension_numbers = #tpu.dot_dimension_numbers<[1], [0], [0], [1], [0, 0, 1, 1], [], []>} : vector<8x32xf32>, vector<32x64xf32>, vector<8x64xf32> -> vector<8x64xf32>
    %183 = arith.addf %178, %182 : vector<8x64xf32>
    %c4 = arith.constant 4 : index
    %c0_95 = arith.constant 0 : index
    %184 = tpu.strided_load %arg18[%c4, %c0_95] {strides = array<i32: 8, 1>} : memref<64x32xf32, #tpu.memory_space<vmem>>, vector<8x32xf32>
    %c4_96 = arith.constant 4 : index
    %c0_97 = arith.constant 0 : index
    %c0_98 = arith.constant 0 : index
    %185 = vector.load %arg13[%c4_96, %c0_97, %c0_98] : memref<8x32x64xf32, #tpu.memory_space<vmem>>, vector<1x32x64xf32>
    %186 = vector.shape_cast %185 : vector<1x32x64xf32> to vector<32x64xf32>
    %cst_99 = arith.constant dense<0.000000e+00> : vector<8x64xf32>
    %187 = tpu.matmul %184, %186, %cst_99 {dimension_numbers = #tpu.dot_dimension_numbers<[1], [0], [0], [1], [0, 0, 1, 1], [], []>} : vector<8x32xf32>, vector<32x64xf32>, vector<8x64xf32> -> vector<8x64xf32>
    %188 = arith.addf %183, %187 : vector<8x64xf32>
    %c5 = arith.constant 5 : index
    %c0_100 = arith.constant 0 : index
    %189 = tpu.strided_load %arg18[%c5, %c0_100] {strides = array<i32: 8, 1>} : memref<64x32xf32, #tpu.memory_space<vmem>>, vector<8x32xf32>
    %c5_101 = arith.constant 5 : index
    %c0_102 = arith.constant 0 : index
    %c0_103 = arith.constant 0 : index
    %190 = vector.load %arg13[%c5_101, %c0_102, %c0_103] : memref<8x32x64xf32, #tpu.memory_space<vmem>>, vector<1x32x64xf32>
    %191 = vector.shape_cast %190 : vector<1x32x64xf32> to vector<32x64xf32>
    %cst_104 = arith.constant dense<0.000000e+00> : vector<8x64xf32>
    %192 = tpu.matmul %189, %191, %cst_104 {dimension_numbers = #tpu.dot_dimension_numbers<[1], [0], [0], [1], [0, 0, 1, 1], [], []>} : vector<8x32xf32>, vector<32x64xf32>, vector<8x64xf32> -> vector<8x64xf32>
    %193 = arith.addf %188, %192 : vector<8x64xf32>
    %c6 = arith.constant 6 : index
    %c0_105 = arith.constant 0 : index
    %194 = tpu.strided_load %arg18[%c6, %c0_105] {strides = array<i32: 8, 1>} : memref<64x32xf32, #tpu.memory_space<vmem>>, vector<8x32xf32>
    %c6_106 = arith.constant 6 : index
    %c0_107 = arith.constant 0 : index
    %c0_108 = arith.constant 0 : index
    %195 = vector.load %arg13[%c6_106, %c0_107, %c0_108] : memref<8x32x64xf32, #tpu.memory_space<vmem>>, vector<1x32x64xf32>
    %196 = vector.shape_cast %195 : vector<1x32x64xf32> to vector<32x64xf32>
    %cst_109 = arith.constant dense<0.000000e+00> : vector<8x64xf32>
    %197 = tpu.matmul %194, %196, %cst_109 {dimension_numbers = #tpu.dot_dimension_numbers<[1], [0], [0], [1], [0, 0, 1, 1], [], []>} : vector<8x32xf32>, vector<32x64xf32>, vector<8x64xf32> -> vector<8x64xf32>
    %198 = arith.addf %193, %197 : vector<8x64xf32>
    %c7 = arith.constant 7 : index
    %c0_110 = arith.constant 0 : index
    %199 = tpu.strided_load %arg18[%c7, %c0_110] {strides = array<i32: 8, 1>} : memref<64x32xf32, #tpu.memory_space<vmem>>, vector<8x32xf32>
    %c7_111 = arith.constant 7 : index
    %c0_112 = arith.constant 0 : index
    %c0_113 = arith.constant 0 : index
    %200 = vector.load %arg13[%c7_111, %c0_112, %c0_113] : memref<8x32x64xf32, #tpu.memory_space<vmem>>, vector<1x32x64xf32>
    %201 = vector.shape_cast %200 : vector<1x32x64xf32> to vector<32x64xf32>
    %cst_114 = arith.constant dense<0.000000e+00> : vector<8x64xf32>
    %202 = tpu.matmul %199, %201, %cst_114 {dimension_numbers = #tpu.dot_dimension_numbers<[1], [0], [0], [1], [0, 0, 1, 1], [], []>} : vector<8x32xf32>, vector<32x64xf32>, vector<8x64xf32> -> vector<8x64xf32>
    %203 = arith.addf %198, %202 : vector<8x64xf32>
    %c0_115 = arith.constant 0 : index
    %c0_116 = arith.constant 0 : index
    %204 = vector.load %arg14[%c0_115, %c0_116] : memref<1x64xf32, #tpu.memory_space<vmem>>, vector<1x64xf32>
    %205 = vector.broadcast %204 : vector<1x64xf32> to vector<8x64xf32>
    %206 = arith.addf %203, %205 : vector<8x64xf32>
    %cst_117 = arith.constant 0.000000e+00 : f32
    %207 = vector.broadcast %cst_117 : f32 to vector<8x64xf32>
    %208 = arith.maximumf %206, %207 : vector<8x64xf32>
    %c0_118 = arith.constant 0 : index
    %c0_119 = arith.constant 0 : index
    %209 = vector.load %arg15[%c0_118, %c0_119] : memref<64x2xf32, #tpu.memory_space<vmem>>, vector<64x2xf32>
    %cst_120 = arith.constant dense<0.000000e+00> : vector<8x2xf32>
    %210 = tpu.matmul %208, %209, %cst_120 {dimension_numbers = #tpu.dot_dimension_numbers<[1], [0], [0], [1], [0, 0, 1, 1], [], []>} : vector<8x64xf32>, vector<64x2xf32>, vector<8x2xf32> -> vector<8x2xf32>
    %c0_121 = arith.constant 0 : index
    %c0_122 = arith.constant 0 : index
    %211 = vector.load %arg16[%c0_121, %c0_122] : memref<1x2xf32, #tpu.memory_space<vmem>>, vector<1x2xf32>
    %212 = vector.broadcast %211 : vector<1x2xf32> to vector<8x2xf32>
    %213 = arith.addf %210, %212 : vector<8x2xf32>
    %c0_123 = arith.constant 0 : index
    %c0_124 = arith.constant 0 : index
    %214 = vector.load %arg17[%c0_123, %c0_124] : memref<8x2xf32, #tpu.memory_space<vmem>>, vector<8x2xf32>
    tpu.vector_store %arg17[%c0_123, %c0_124], %213 {strides = array<i32>} : memref<8x2xf32, #tpu.memory_space<vmem>>, vector<8x2xf32>,
    return
  }
  func.func @transform_0(%arg0: i32) -> (i32, i32, i32) {
    %c0_i32 = arith.constant 0 : i32
    %c0_i32_0 = arith.constant 0 : i32
    %c0_i32_1 = arith.constant 0 : i32
    return %arg0, %c0_i32, %c0_i32_0 : i32, i32, i32
  }
  func.func @transform_1(%arg0: i32) -> (i32, i32) {
    %c0_i32 = arith.constant 0 : i32
    %c0_i32_0 = arith.constant 0 : i32
    %c0_i32_1 = arith.constant 0 : i32
    return %c0_i32, %c0_i32_0 : i32, i32
  }
  func.func @transform_2(%arg0: i32) -> (i32, i32, i32) {
    %c0_i32 = arith.constant 0 : i32
    %c0_i32_0 = arith.constant 0 : i32
    %c0_i32_1 = arith.constant 0 : i32
    %c0_i32_2 = arith.constant 0 : i32
    return %c0_i32, %c0_i32_0, %c0_i32_1 : i32, i32, i32
  }
  func.func @transform_3(%arg0: i32) -> (i32, i32) {
    %c0_i32 = arith.constant 0 : i32
    %c0_i32_0 = arith.constant 0 : i32
    %c0_i32_1 = arith.constant 0 : i32
    return %c0_i32, %c0_i32_0 : i32, i32
  }
  func.func @transform_4(%arg0: i32) -> (i32, i32) {
    %c0_i32 = arith.constant 0 : i32
    %c0_i32_0 = arith.constant 0 : i32
    %c0_i32_1 = arith.constant 0 : i32
    return %c0_i32, %c0_i32_0 : i32, i32
  }
  func.func @transform_5(%arg0: i32) -> (i32, i32) {
    %c0_i32 = arith.constant 0 : i32
    %c0_i32_0 = arith.constant 0 : i32
    %c0_i32_1 = arith.constant 0 : i32
    return %c0_i32, %c0_i32_0 : i32, i32
  }
  func.func @transform_6(%arg0: i32) -> (i32, i32) {
    %c0_i32 = arith.constant 0 : i32
    %c0_i32_0 = arith.constant 0 : i32
    %c0_i32_1 = arith.constant 0 : i32
    return %c0_i32, %c0_i32_0 : i32, i32
  }
  func.func @transform_7(%arg0: i32) -> (i32, i32) {
    %c0_i32 = arith.constant 0 : i32
    %c0_i32_0 = arith.constant 0 : i32
    %c0_i32_1 = arith.constant 0 : i32
    return %c0_i32, %c0_i32_0 : i32, i32
  }
  func.func @transform_8(%arg0: i32) -> (i32, i32) {
    %c0_i32 = arith.constant 0 : i32
    %c0_i32_0 = arith.constant 0 : i32
    %c0_i32_1 = arith.constant 0 : i32
    return %c0_i32, %c0_i32_0 : i32, i32
  }
  func.func @transform_9(%arg0: i32) -> (i32, i32) {
    %c0_i32 = arith.constant 0 : i32
    %c0_i32_0 = arith.constant 0 : i32
    %c0_i32_1 = arith.constant 0 : i32
    return %c0_i32, %c0_i32_0 : i32, i32
  }
  func.func @transform_10(%arg0: i32) -> (i32, i32) {
    %c0_i32 = arith.constant 0 : i32
    %c0_i32_0 = arith.constant 0 : i32
    %c0_i32_1 = arith.constant 0 : i32
    return %c0_i32, %c0_i32_0 : i32, i32
  }
  func.func @transform_11(%arg0: i32) -> (i32, i32) {
    %c0_i32 = arith.constant 0 : i32
    %c0_i32_0 = arith.constant 0 : i32
    %c0_i32_1 = arith.constant 0 : i32
    return %c0_i32, %c0_i32_0 : i32, i32
  }
  func.func @transform_12(%arg0: i32) -> (i32, i32, i32) {
    %c0_i32 = arith.constant 0 : i32
    %c0_i32_0 = arith.constant 0 : i32
    %c0_i32_1 = arith.constant 0 : i32
    %c0_i32_2 = arith.constant 0 : i32
    return %c0_i32, %c0_i32_0, %c0_i32_1 : i32, i32, i32
  }
  func.func @transform_13(%arg0: i32) -> (i32, i32) {
    %c0_i32 = arith.constant 0 : i32
    %c0_i32_0 = arith.constant 0 : i32
    %c0_i32_1 = arith.constant 0 : i32
    return %c0_i32, %c0_i32_0 : i32, i32
  }
  func.func @transform_14(%arg0: i32) -> (i32, i32) {
    %c0_i32 = arith.constant 0 : i32
    %c0_i32_0 = arith.constant 0 : i32
    %c0_i32_1 = arith.constant 0 : i32
    return %c0_i32, %c0_i32_0 : i32, i32
  }
  func.func @transform_15(%arg0: i32) -> (i32, i32) {
    %c0_i32 = arith.constant 0 : i32
    %c0_i32_0 = arith.constant 0 : i32
    %c0_i32_1 = arith.constant 0 : i32
    return %c0_i32, %c0_i32_0 : i32, i32
  }
  func.func @transform_16(%arg0: i32) -> (i32, i32) {
    %c0_i32 = arith.constant 0 : i32
    %c0_i32_0 = arith.constant 0 : i32
    return %arg0, %c0_i32 : i32, i32
  }
}

</mosaic_0001>

<bundles_post_ra>
// kernel: tpu_custom_call.1
= control target key start
LH: loop header
LB: loop body
LE: loop exit
PB: predicated region body
PF: predicated region fallthrough
CT: control target
= control target key end

     0   :  { %s10784_s0 = inlined_call_operand.vmem [shape: f32[16,8,32], index: 0, kind: input, shape index: {}]   ;;  %s10785_s1 = inlined_call_operand.vmem [shape: f32[32,96], index: 1, kind: input, shape index: {}]   ;;  %s10786_s2 = inlined_call_operand.hbm [shape: f32[4,8,32], index: 2, kind: input, shape index: {}]   ;;  %s10787_s3 = inlined_call_operand.vmem [shape: f32[1,32], index: 3, kind: input, shape index: {}]   ;;  %s10788_s4 = inlined_call_operand.vmem [shape: f32[1,32], index: 4, kind: input, shape index: {}]   ;;  %s10789_s5 = inlined_call_operand.vmem [shape: f32[1,32], index: 5, kind: input, shape index: {}]   ;;  %s10790_s6 = inlined_call_operand.hbm [shape: f32[32,64], index: 6, kind: input, shape index: {}]   ;;  %s10791_s7 = inlined_call_operand.vmem [shape: f32[1,64], index: 7, kind: input, shape index: {}]   ;;  %s10792_s8 = inlined_call_operand.vmem [shape: f32[64,32], index: 8, kind: input, shape index: {}]   ;;  %s10793_s9 = inlined_call_operand.vmem [shape: f32[1,32], index: 9, kind: input, shape index: {}]   ;;  %s10794_s10 = inlined_call_operand.vmem [shape: f32[1,32], index: 10, kind: input, shape index: {}]   ;;  %s10795_s11 = inlined_call_operand.vmem [shape: f32[1,32], index: 11, kind: input, shape index: {}]   ;;  %s10796_s12 = inlined_call_operand.hbm [shape: f32[8,32,64], index: 12, kind: input, shape index: {}]   ;;  %s10797_s13 = inlined_call_operand.vmem [shape: f32[1,64], index: 13, kind: input, shape index: {}]   ;;  %s10798_s14 = inlined_call_operand.vmem [shape: f32[64,2], index: 14, kind: input, shape index: {}]   ;;  %s10799_s15 = inlined_call_operand.vmem [shape: f32[1,2], index: 15, kind: input, shape index: {}]   ;;  %s10800_s16 = inlined_call_operand.vmem [shape: f32[16,2], index: 16, kind: output, shape index: {}]  }
   0x1   :  { %10804 = sst [smem:[#allocation11_spill]] %s10784_s0 }
   0x2   :  { %10805 = sst [smem:[#allocation12_spill]] %s10797_s13 }
   0x3   :  { %10806 = sst [smem:[#allocation13_spill]] %s10799_s15 }
   0x4   :  { %10807 = sst [smem:[#allocation14_spill]] %s10800_s16 }
   0x5   :  { %21 = vsyncpa [#allocation4], 0 }
   0x6   :  { %22 = vsyncpa [#allocation6], 0  ;;  %s9529_s21 = smov 0  }
   0x7 LB: > { %10808 = sst [smem:[#allocation10_spill]] %s9423_s21  ;;  %s9535_s22 = sadd.s32 4294967295, %s9423_s21   ;;  %s9423_s21 = sphi %s9529_s21, %s28_s21  }
   0x8   : > { %p7998_p0 = scmp.ge.s32.totalorder %s9423_s21, 1  ;;  %p400_p1 = scmp.lt.s32.totalorder %s9423_s21, 3 }
   0x9   : > { %p10801_p2 = scmp.eq.s32.totalorder %s9535_s22, 0  ;;  %s9425_s24 = smov [#allocation5]  }
   0xa   : > { %p9540_p3 = pnand %p7998_p0, %p400_p1  ;;  %s437_s25 = sshll.u32 %s9425_s24, 4  ;;  %s438_s25 = int_to_ptr.vmem [resolvable:$true] %s437_s25 }
   0xb   : > { %s9426_s26 = smov [#allocation3]   ;;  %s9427_s29 = smov [#allocation7]  }
   0xc   : > { %s10809_s23 = scalar_select %p9540_p3, 1, 0 }
   0xd   : > { %p9114_p4 = pneg %p9540_p3  ;;  %s415_s27 = sshll.u32 %s9426_s26, 4  ;;  %s9552_s27 = int_to_ptr.vmem [resolvable:$true] %s415_s27 }
   0xe   : > { %s465_s30 = sshll.u32 %s9427_s29, 4  ;;  %s9325_s18 = scalar_lea.hbm %s10790_s6, 512  ;;  %s9554_s30 = int_to_ptr.vmem [resolvable:$true] %s465_s30 }
   0xf   : > { %p9548_p5 = pnand %p10801_p2, %p9114_p4  ;;  %p9326_p6 = scmp.ne.s32.totalorder %s10790_s6, %s9325_s18 }
  0x10   : > { %p9332_p10 = scmp.lt.u32.totalorder %s9325_s18, %s10790_s6 }
  0x11   : > { %p9564_p7 = pneg %p9548_p5 }
  0x13   : > { %p9328_p8 = pnand %p9564_p7, %p9326_p6 }
  0x15   : > { %p9329_p9 = pneg %p9328_p8 }
  0x17   : > { %p9334_p11 = pnand %p9332_p10, %p9329_p9 }
  0x19   : > { %9337 = shalt.err (!%p9334_p11)
}
  0x1a   : > { %s9338_s0 = scalar_lea.vmem %s438_s25, 512  ;;  %p9346_p1 = scmp.lt.s32.totalorder %s438_s25, %s438_s25 }
  0x1b   : > { %p9339_p12 = scmp.ne.s32.totalorder %s438_s25, %s9338_s0  ;;  %p9347_p4 = scmp.lt.s32.totalorder %s9338_s0, %s9338_s0 }
  0x1d   : > { %p9341_p13 = pnand %p9339_p12, %p9564_p7  ;;  %p9348_p2 = por %p9347_p4, %p9346_p1 }
  0x1f   : > { %p9342_p0 = pneg %p9341_p13 }
  0x21   : > { %p9349_p3 = pnand %p9348_p2, %p9342_p0 }
  0x23   : > { %9352 = shalt.err (!%p9349_p3)
}
  0x24   : > { %s9428_s17 = smov 128   ;;  %s9429_s19 = smov 8  }
  0x25   : > { %9120 = dma.hbm_to_vmem [thread:$0]  (!%p9548_p5), %s10790_s6, 512, %s438_s25, [#allocation6], %s9428_s17, %s9428_s17, %s9429_s19  }
  0x26   : > { %s9353_s21 = scalar_lea.hbm %s10786_s2, 512 }
  0x27   : > { %p9354_p2 = scmp.ne.s32.totalorder %s10786_s2, %s9353_s21  ;;  %p9360_p8 = scmp.lt.u32.totalorder %s9353_s21, %s10786_s2 }
  0x29   : > { %p9356_p3 = pnand %p9354_p2, %p9564_p7 }
  0x2b   : > { %p9357_p6 = pneg %p9356_p3 }
  0x2d   : > { %p9362_p9 = pnand %p9360_p8, %p9357_p6 }
  0x2f   : > { %9365 = shalt.err (!%p9362_p9)
}
  0x30   : > { %s9366_s25 = scalar_lea.vmem %s9552_s27, 512  ;;  %p9374_p13 = scmp.lt.s32.totalorder %s9552_s27, %s9552_s27 }
  0x31   : > { %p9367_p10 = scmp.ne.s32.totalorder %s9552_s27, %s9366_s25  ;;  %p9375_p0 = scmp.lt.s32.totalorder %s9366_s25, %s9366_s25 }
  0x33   : > { %p9369_p11 = pnand %p9367_p10, %p9564_p7  ;;  %p9376_p1 = por %p9375_p0, %p9374_p13 }
  0x35   : > { %p9370_p12 = pneg %p9369_p11 }
  0x37   : > { %p9377_p4 = pnand %p9376_p1, %p9370_p12 }
  0x39   : > { %9380 = shalt.err (!%p9377_p4)
}
  0x3a   : > { %9117 = dma.hbm_to_vmem [thread:$0]  (!%p9548_p5), %s10786_s2, 512, %s9552_s27, [#allocation4], %s9428_s17, %s9428_s17, %s9429_s19  }
  0x3b   : > { %s9381_s18 = scalar_lea.hbm %s10796_s12, 4096 }
  0x3c   : > { %p9382_p2 = scmp.ne.s32.totalorder %s10796_s12, %s9381_s18  ;;  %p9388_p8 = scmp.lt.u32.totalorder %s9381_s18, %s10796_s12 }
  0x3e   : > { %p9384_p3 = pnand %p9382_p2, %p9564_p7 }
  0x40   : > { %p9385_p6 = pneg %p9384_p3 }
  0x42   : > { %p9390_p9 = pnand %p9388_p8, %p9385_p6 }
  0x44   : > { %9393 = shalt.err (!%p9390_p9)
}
  0x45   : > { %s9394_s27 = scalar_lea.vmem %s9554_s30, 4096  ;;  %p9402_p13 = scmp.lt.s32.totalorder %s9554_s30, %s9554_s30 }
  0x46   : > { %p9395_p10 = scmp.ne.s32.totalorder %s9554_s30, %s9394_s27  ;;  %p9403_p0 = scmp.lt.s32.totalorder %s9394_s27, %s9394_s27 }
  0x48   : > { %p9397_p11 = pnand %p9395_p10, %p9564_p7  ;;  %p9404_p1 = por %p9403_p0, %p9402_p13 }
  0x4a   : > { %p9398_p12 = pneg %p9397_p11 }
  0x4c   : > { %p9405_p4 = pnand %p9404_p1, %p9398_p12 }
  0x4e   : > { %9408 = shalt.err (!%p9405_p4)
}
  0x4f   : > { %9123 = dma.hbm_to_vmem [thread:$0]  (!%p9548_p5), %s10796_s12, 4096, %s9554_s30, [#allocation6], %s9428_s17, %s9428_s17, %s9429_s19  }
  0x50   : > { %p10812_p2 = scmp.ne.s32.totalorder %s10809_s23, 0 }
  0x51   : > { %p10813_p7 = scmp.eq.s32.totalorder (!%p10812_p2), %s9535_s22, 0 }
  0x52   : > { %499 = sbr.rel (%p10812_p2) target bundleno = 4890 (0x131a), region = 84 }
  0x59   : > { %9414 = dma.done.wait (%p10813_p7), [#allocation4], 512   ;;  %p10814_p3 = pmov %p10813_p7 }
  0x5b   : > { %9416 = vsyncadd (%p10814_p3), [#allocation4], 4294966784  ;;  %p10815_p6 = pmov %p10814_p3 }
  0x5c   : > { %p10816_p8 = pmov %p10814_p3 }
  0x5d   : > { %9418 = dma.done.wait (%p10815_p6), [#allocation6], 4608  }
  0x5e   : > { %9420 = vsyncadd (%p10816_p8), [#allocation6], 4294962688  ;;  %s8007_s28 = sshll.u32 %s9535_s22, 3  ;;  %s10817_s17 = sld [smem:[#allocation11_spill]]  ;;  %vm578_vm0 = vcmask 261120   ;;  %v574_v0 = vld [vmem:[%s10785_s1] sm:$0xff] }
  0x5f   : > { %p557_p9 = scmp.lt.s32.totalorder %s8007_s28, 15  ;;  %v575_v1 = vld [vmem:[%s10785_s1 + $0x8] sm:$0xff]  ;;  %v576_v2 = vld [vmem:[%s10785_s1 + $0x10] sm:$0xff]  ;;  %v577_v4 = vld [vmem:[%s10785_s1 + $0x18] sm:$0xff]  ;;  %v9430_v14 = vmov 0.0   ;;  %vm9431_vm1 = vmmov 0  }
  0x60   : > { %v8986_v3 = vpack.c.bf16 %v575_v1, %v574_v0  ;;  %v8990_v6 = vpack.c.bf16 %v577_v4, %v576_v2  ;;  %8460 = vmatprep.subr.mxu1 %v9430_v14  ;;  %8462 = vmatprep.mubr.msk.f32.mxu1 %vm9431_vm1, %v9430_v14  ;;  %s9432_s27 = smov 96   ;;  %vm711_vm2 = vcmask 64512   ;;  %s9433_s25 = smov 64   ;;  %vm6873_vm3 = vcmask 523264  }
  0x61   : > { %s10823_s28 = smov (!%p557_p9, %s8007_s28), 15  ;;  %s9434_s13 = smov 120   ;;  %vm7910_vm4 = vcmask 15360  }
  0x62   : > { %s8008_s30 = sshll.u32 %s10823_s28, 3  ;;  %8987 = vmatprep.subr.bf16.mxu0 %v8986_v3  ;;  %s9435_s28 = smov 88  }
  0x63   : > { %8989 = vmatpush3.bf16.msra.mxu0 %v8986_v3  ;;  %s9437_s24 = smov 80   ;;  %s9438_s23 = smov 112  }
  0x64   : > { %s9649_s19 = scalar_lea.vmem %s10817_s17, %s8008_s30  ;;  %8991 = vmatprep.subr.bf16.mxu0 %v8990_v6  ;;  %s9436_s30 = smov 56  }
  0x65   : > { %v566_v5 = vld [vmem:[%s9649_s19] sm:$0xff]  ;;  %v567_v7 = vld [vmem:[%s9649_s19 + $0x8] sm:$0xff]  ;;  %v568_v8 = vld [vmem:[%s9649_s19 + $0x10] sm:$0xff]  ;;  %s9439_s17 = smov 48   ;;  %s9440_s15 = smov 104  }
  0x66   : > { %8443 = vmatprep.mubr.msk.f32.mxu0 %vm578_vm0, %v566_v5  ;;  %v569_v9 = vld [vmem:[%s9649_s19 + $0x18] sm:$0xff]  ;;  %v570_v10 = vld [vmem:[%s9649_s19 + $0x20] sm:$0xff]  ;;  %v571_v11 = vld [vmem:[%s9649_s19 + $0x28] sm:$0xff]  ;;  %s9441_s16 = smov 72   ;;  %s9442_s21 = smov 40  }
  0x67   : > { %8993 = vmatpush3.bf16.msra.mxu0 %v8990_v6  ;;  %v572_v12 = vld [vmem:[%s9649_s19 + $0x30] sm:$0xff]  ;;  %v573_v13 = vld [vmem:[%s9649_s19 + $0x38] sm:$0xff]  ;;  %p562_p5 = scmp.lt.s32.totalorder %s9535_s22, 1  ;;  %s10819_s20 = sld [smem:[#allocation13_spill]] }
  0x68   : > { %8455 = vmatprep.subr.mxu0 %v9430_v14  ;;  %s10820_s29 = sld [smem:[#allocation14_spill]] }
  0x69   : > { %s10825_s22 = smov (!%p562_p5, %s9535_s22), 1 }
  0x6a   : > { %8444 = vmatmul.mubr.msk.f32.vlgmr.msra.gmra.mrb[0].mxu0 %vm578_vm0, %v567_v7 }
  0x6b   : > { %8446 = vmatprep.mubr.msk.f32.mxu0 %vm578_vm0, %v568_v8 }
  0x6e   : > { %8447 = vmatmul.mubr.msk.f32.gmra.mrb[2].mxu0 %vm578_vm0, %v569_v9 }
  0x6f   : > { %8449 = vmatprep.mubr.msk.f32.mxu0 %vm578_vm0, %v570_v10 }
  0x72   : > { %8450 = vmatmul.mubr.msk.f32.gmra.mrb[4].mxu0 %vm578_vm0, %v571_v11 }
  0x73   : > { %8452 = vmatprep.mubr.msk.f32.mxu0 %vm578_vm0, %v572_v12 }
  0x76   : > { %8453 = vmatmul.mubr.msk.f32.gmra.mrb[6].mxu0 %vm578_vm0, %v573_v13 }
  0x77   : > { %8457 = vmatprep.mubr.msk.f32.mxu0 %vm9431_vm1, %v9430_v14 }
 0x13d   : > { %v9685_v15 = vpop.f32.mrb[0].mxu0 }
 0x13e   : > { %787 = vrot.lane.b32.xlu0 %v9685_v15, %s9432_s27  ;;  %v9688_v16 = vpop.f32.mrb[1].mxu0 }
 0x13f   : > { %709 = vrot.lane.b32.xlu1 %v9688_v16, %s9432_s27 }
 0x141   : > { %v9691_v17 = vpop.f32.mrb[2].mxu0 }
 0x142   : > { %v9693_v18 = vpop.f32.mrb[3].mxu0 }
 0x143   : > { %941 = vrot.lane.b32.xlu1 %v9691_v17, %s9432_s27  ;;  %864 = vrot.lane.b32.xlu0 %v9693_v18, %s9432_s27 }
 0x145   : > { %v9697_v19 = vpop.f32.mrb[4].mxu0 }
 0x146   : > { %v9699_v20 = vpop.f32.mrb[5].mxu0 }
 0x147   : > { %1095 = vrot.lane.b32.xlu0 %v9697_v19, %s9432_s27 }
 0x149   : > { %v9702_v21 = vpop.f32.mrb[6].mxu0 }
 0x14a   : > { %1249 = vrot.lane.b32.xlu1 %v9702_v21, %s9432_s27  ;;  %v9705_v22 = vpop.f32.mrb[7].mxu0 }
 0x14b   : > { %1018 = vrot.lane.b32.xlu0 %v9699_v20, %s9432_s27 }
 0x14e   : > { %1172 = vrot.lane.b32.xlu1 %v9705_v22, %s9432_s27 }
 0x1b0   : > { %v788_v23 = vpop.permute.xlu0 %787 }
 0x1b1   : > { %8461 = vmatpush3.xpose.msk.msra.mxu1 %vm711_vm2, %v788_v23  ;;  %v710_v24 = vpop.permute.xlu1 %709 }
 0x1b2   : > { %8456 = vmatpush3.xpose.msk.msra.mxu0 %vm711_vm2, %v710_v24  ;;  %8465 = vmatprep.subr.mxu1 %v9430_v14 }
 0x1b3   : > { %8480 = vmatprep.subr.mxu0 %v9430_v14 }
 0x1b4   : > { %8463 = vmatmul.mubr.msk.f32.vlgmr.msra.gmra.mrb[0].mxu1 %vm711_vm2, %v9685_v15 }
 0x1b5   : > { %8458 = vmatmul.mubr.msk.f32.vlgmr.msra.gmra.mrb[8].mxu0 %vm711_vm2, %v9688_v16  ;;  %v865_v25 = vpop.permute.xlu0 %864  ;;  %8467 = vmatprep.mubr.msk.f32.mxu1 %vm9431_vm1, %v9430_v14  ;;  %v942_v26 = vpop.permute.xlu1 %941 }
 0x1b6   : > { %8466 = vmatpush3.xpose.msk.msra.mxu1 %vm711_vm2, %v865_v25  ;;  %8482 = vmatprep.mubr.msk.f32.mxu0 %vm9431_vm1, %v9430_v14 }
 0x1b7   : > { %8470 = vmatprep.subr.mxu1 %v9430_v14 }
 0x1b9   : > { %8468 = vmatmul.mubr.msk.f32.vlgmr.msra.gmra.mrb[2].mxu1 %vm711_vm2, %v9693_v18  ;;  %v1096_v27 = vpop.permute.xlu0 %1095 }
 0x1ba   : > { %8471 = vmatpush3.xpose.msk.msra.mxu1 %vm711_vm2, %v942_v26  ;;  %8481 = vmatpush3.xpose.msk.msra.mxu0 %vm711_vm2, %v1096_v27 }
 0x1bb   : > { %8472 = vmatprep.mubr.msk.f32.mxu1 %vm9431_vm1, %v9430_v14  ;;  %8475 = vmatprep.subr.mxu1 %v9430_v14 }
 0x1bc   : > { %8490 = vmatprep.subr.mxu0 %v9430_v14  ;;  %v1250_v28 = vpop.permute.xlu1 %1249 }
 0x1bd   : > { %8473 = vmatmul.mubr.msk.f32.vlgmr.msra.gmra.mrb[4].mxu1 %vm711_vm2, %v9691_v17  ;;  %8483 = vmatmul.mubr.msk.f32.vlgmr.msra.gmra.mrb[10].mxu0 %vm711_vm2, %v9697_v19  ;;  %v1019_v29 = vpop.permute.xlu0 %1018 }
 0x1be   : > { %8476 = vmatpush3.xpose.msk.msra.mxu1 %vm711_vm2, %v1019_v29  ;;  %8491 = vmatpush3.xpose.msk.msra.mxu0 %vm711_vm2, %v1250_v28 }
 0x1bf   : > { %8477 = vmatprep.mubr.msk.f32.mxu1 %vm9431_vm1, %v9430_v14  ;;  %8492 = vmatprep.mubr.msk.f32.mxu0 %vm9431_vm1, %v9430_v14 }
 0x1c0   : > { %8485 = vmatprep.subr.mxu1 %v9430_v14  ;;  %v1173_v30 = vpop.permute.xlu1 %1172  ;;  %8500 = vmatprep.subr.mxu0 %v9430_v14 }
 0x1c1   : > { %8478 = vmatmul.mubr.msk.f32.vlgmr.msra.gmra.mrb[6].mxu1 %vm711_vm2, %v9699_v20  ;;  %8493 = vmatmul.mubr.msk.f32.vlgmr.msra.gmra.mrb[12].mxu0 %vm711_vm2, %v9702_v21 }
 0x1c2   : > { %8486 = vmatpush3.xpose.msk.msra.mxu1 %vm711_vm2, %v1173_v30  ;;  %8487 = vmatprep.mubr.msk.f32.mxu1 %vm9431_vm1, %v9430_v14 }
 0x1c3   : > { %8502 = vmatprep.mubr.msk.f32.mxu0 %vm9431_vm1, %v9430_v14  ;;  %8495 = vmatprep.subr.mxu1 %v9430_v14 }
 0x1c5   : > { %8488 = vmatmul.mubr.msk.f32.vlgmr.msra.gmra.mrb[8].mxu1 %vm711_vm2, %v9705_v22 }
 0x1c6   : > { %8497 = vmatprep.mubr.msk.f32.mxu1 %vm9431_vm1, %v9430_v14 }
 0x287   : > { %v859_v31 = vpop.f32.mrb[0].mxu1 }
 0x288   : > { %v1326_v32 = vmul.f32 0.17677669, %v859_v31  ;;  %v9757_v33 = vpop.f32.mrb[8].mxu0  ;;  %v8464_v34 = vpop.f32.mrb[1].mxu1 }
 0x289   : > { %v8459_v35 = vpop.f32.mrb[9].mxu0  ;;  %v9797_v23 = vmul.f32 0.17677669, %v9757_v33 }
 0x28a   : > { %v1336_v36 = vsel %vm711_vm2, %v1326_v32, -inf }
 0x28b   : > { %1337 = vmax.xlane.f32.xlu0 %v1336_v36  ;;  %v1333_v25 = vsel %vm711_vm2, %v9797_v23, -inf }
 0x28c   : > { %v936_v37 = vpop.f32.mrb[2].mxu1 }
 0x28d   : > { %v8469_v38 = vpop.f32.mrb[3].mxu1  ;;  %v9784_v12 = vmul.f32 0.17677669, %v936_v37 }
 0x28f   : > { %v1339_v13 = vsel %vm711_vm2, %v9784_v12, -inf }
 0x290   : > { %v1013_v39 = vpop.f32.mrb[4].mxu1  ;;  %v1167_v40 = vpop.f32.mrb[10].mxu0 }
 0x291   : > { %v1328_v41 = vmul.f32 0.17677669, %v1013_v39  ;;  %v1330_v42 = vmul.f32 0.17677669, %v1167_v40  ;;  %v8474_v43 = vpop.f32.mrb[5].mxu1  ;;  %v8484_v44 = vpop.f32.mrb[11].mxu0 }
 0x293   : > { %v1342_v45 = vsel %vm711_vm2, %v1328_v41, -inf  ;;  %v1348_v46 = vsel %vm711_vm2, %v1330_v42, -inf }
 0x294   : > { %v1090_v47 = vpop.f32.mrb[6].mxu1  ;;  %1343 = vmax.xlane.f32.xlu1 %v1342_v45  ;;  %1349 = vmax.xlane.f32.xlu0 %v1348_v46  ;;  %v1321_v48 = vpop.f32.mrb[12].mxu0 }
 0x295   : > { %v1332_v49 = vmul.f32 0.17677669, %v1321_v48  ;;  %v8479_v50 = vpop.f32.mrb[7].mxu1  ;;  %v8494_v51 = vpop.f32.mrb[13].mxu0  ;;  %v9799_v24 = vmul.f32 0.17677669, %v1090_v47 }
 0x297   : > { %v1354_v52 = vsel %vm711_vm2, %v1332_v49, -inf  ;;  %v1345_v27 = vsel %vm711_vm2, %v9799_v24, -inf }
 0x298   : > { %v1244_v53 = vpop.f32.mrb[8].mxu1  ;;  %1355 = vmax.xlane.f32.xlu0 %v1354_v52 }
 0x299   : > { %v8489_v54 = vpop.f32.mrb[9].mxu1  ;;  %v9803_v26 = vmul.f32 0.17677669, %v1244_v53 }
 0x29b   : > { %v1351_v28 = vsel %vm711_vm2, %v9803_v26, -inf }
 0x2a5   : > { %1497 = vrot.lane.b32.xlu1 %v9685_v15, %s9433_s25 }
 0x318   : > { %v1338_v55 = vpop.xlane.xlu0 %1337 }
 0x319   : > { %v1358_v56 = vsub.f32 %v1326_v32, %v1338_v55 }
 0x31b   : > { %v1367_v57 = vmul.f32 1.442695, %v1358_v56 }
 0x31d   : > { %9157 = vpow2.f32 %v1367_v57 }
 0x321   : > { %v1344_v58 = vpop.xlane.xlu1 %1343  ;;  %v1350_v59 = vpop.xlane.xlu0 %1349 }
 0x322   : > { %v1360_v60 = vsub.f32 %v1328_v41, %v1344_v58  ;;  %v1362_v61 = vsub.f32 %v1330_v42, %v1350_v59 }
 0x324   : > { %v1371_v62 = vmul.f32 1.442695, %v1360_v60  ;;  %v1375_v63 = vmul.f32 1.442695, %v1362_v61 }
 0x325   : > { %v1498_v0 = vpop.permute.xlu1 %1497  ;;  %v1356_v7 = vpop.xlane.xlu0 %1355 }
 0x326   : > { %9159 = vpow2.f32 %v1371_v62  ;;  %8501 = vmatpush3.msra.mxu0 %v1498_v0  ;;  %v1364_v8 = vsub.f32 %v1332_v49, %v1356_v7 }
 0x327   : > { %v9158_v1 = vpop.eup %9157  ;;  %9161 = vpow2.f32 %v1375_v63  ;;  %8510 = vmatprep.subr.mxu0 %v9430_v14 }
 0x328   : > { %v1384_v2 = vsel %vm711_vm2, %v9158_v1, 0.0  ;;  %v1379_v9 = vmul.f32 1.442695, %v1364_v8 }
 0x329   : > { %1385 = vadd.xlane.f32.xlu1 %v1384_v2 }
 0x32a   : > { %9163 = vpow2.f32 %v1379_v9 }
 0x330   : > { %v9160_v3 = vpop.eup %9159 }
 0x331   : > { %v9162_v4 = vpop.eup %9161  ;;  %v1390_v5 = vsel %vm711_vm2, %v9160_v3, 0.0 }
 0x332   : > { %v1396_v6 = vsel %vm711_vm2, %v9162_v4, 0.0  ;;  %1391 = vadd.xlane.f32.xlu0 %v1390_v5 }
 0x333   : > { %1397 = vadd.xlane.f32.xlu1 %v1396_v6 }
 0x334   : > { %v9164_v10 = vpop.eup %9163 }
 0x335   : > { %v1402_v11 = vsel %vm711_vm2, %v9164_v10, 0.0 }
 0x344   : > { %1801 = vrot.lane.b32.xlu1 %v9697_v19, %s9433_s25 }
 0x348   : > { %1953 = vrot.lane.b32.xlu1 %v9702_v21, %s9433_s25  ;;  %1649 = vrot.lane.b32.xlu0 %v9691_v17, %s9433_s25 }
 0x34c   : > { %2108 = vrot.lane.b32.xlu1 %v9685_v15, %s9434_s13 }
 0x350   : > { %2264 = vrot.lane.b32.xlu1 %v9691_v17, %s9434_s13 }
 0x354   : > { %2420 = vrot.lane.b32.xlu1 %v9697_v19, %s9434_s13 }
 0x358   : > { %2576 = vrot.lane.b32.xlu1 %v9702_v21, %s9434_s13 }
 0x367   : > { %1403 = vadd.xlane.f32.xlu0 %v1402_v11 }
 0x37c   : > { %1340 = vmax.xlane.f32.xlu1 %v1339_v13 }
 0x37d   : > { %2110 = vrot.lane.b32.xlu0 %v9685_v15, %s9435_s28 }
 0x381   : > { %2266 = vrot.lane.b32.xlu0 %v9691_v17, %s9435_s28 }
 0x385   : > { %2422 = vrot.lane.b32.xlu0 %v9697_v19, %s9435_s28 }
 0x389   : > { %2578 = vrot.lane.b32.xlu0 %v9702_v21, %s9435_s28 }
 0x3a8   : > { %1334 = vmax.xlane.f32.xlu0 %v1333_v25 }
 0x3ac   : > { %1346 = vmax.xlane.f32.xlu0 %v1345_v27 }
 0x3b0   : > { %1352 = vmax.xlane.f32.xlu0 %v1351_v28 }
 0x3b6   : > { %v1386_v29 = vpop.xlane.xlu1 %1385 }
 0x3b7   : > { %9165 = vrcp.f32 %v1386_v29 }
 0x3bf   : > { %v1392_v30 = vpop.xlane.xlu0 %1391 }
 0x3c0   : > { %v1398_v31 = vpop.xlane.xlu1 %1397  ;;  %9167 = vrcp.f32 %v1392_v30 }
 0x3c1   : > { %v9166_v32 = vpop.eup %9165  ;;  %9169 = vrcp.f32 %v1398_v31 }
 0x3c2   : > { %v1414_v33 = vmul.f32 %v9166_v32, %v9158_v1 }
 0x3c3   : > { %v1650_v34 = vpop.permute.xlu0 %1649 }
 0x3c4   : > { %8503 = vmatmul.mubr.msk.f32.vlgmr.msra.gmra.mrb[14].mxu0 %vm711_vm2, %v1414_v33  ;;  %v1802_v36 = vpop.permute.xlu1 %1801 }
 0x3c5   : > { %8511 = vmatpush3.msra.mxu0 %v1650_v34  ;;  %8512 = vmatprep.mubr.msk.f32.mxu0 %vm9431_vm1, %v9430_v14 }
 0x3c6   : > { %8520 = vmatprep.subr.mxu0 %v9430_v14 }
 0x3c8   : > { %v1954_v40 = vpop.permute.xlu1 %1953 }
 0x3ca   : > { %v9168_v35 = vpop.eup %9167 }
 0x3cb   : > { %v1416_v37 = vmul.f32 %v9168_v35, %v9160_v3  ;;  %v9170_v38 = vpop.eup %9169 }
 0x3cc   : > { %v1418_v39 = vmul.f32 %v9170_v38, %v9162_v4  ;;  %v2109_v41 = vpop.permute.xlu1 %2108 }
 0x3cd   : > { %8513 = vmatmul.mubr.msk.f32.vlgmr.msra.gmra.mrb[16].mxu0 %vm711_vm2, %v1416_v37 }
 0x3ce   : > { %8521 = vmatpush3.msra.mxu0 %v1802_v36  ;;  %8522 = vmatprep.mubr.msk.f32.mxu0 %vm9431_vm1, %v9430_v14 }
 0x3cf   : > { %8530 = vmatprep.subr.mxu0 %v9430_v14 }
 0x3d0   : > { %v2265_v43 = vpop.permute.xlu1 %2264 }
 0x3d1   : > { %8523 = vmatmul.mubr.msk.f32.vlgmr.msra.gmra.mrb[18].mxu0 %vm711_vm2, %v1418_v39 }
 0x3d2   : > { %8531 = vmatpush3.msra.mxu0 %v1954_v40  ;;  %8532 = vmatprep.mubr.msk.f32.mxu0 %vm9431_vm1, %v9430_v14 }
 0x3d3   : > { %8540 = vmatprep.subr.mxu0 %v9430_v14 }
 0x3d4   : > { %v2421_v46 = vpop.permute.xlu1 %2420 }
 0x3d8   : > { %v2577_v49 = vpop.permute.xlu1 %2576 }
 0x3f4   : > { %v1404_v42 = vpop.xlane.xlu0 %1403 }
 0x3f5   : > { %9171 = vrcp.f32 %v1404_v42 }
 0x3f8   : > { %v2111_v44 = vpop.permute.xlu0 %2110 }
 0x3fc   : > { %v2267_v48 = vpop.permute.xlu0 %2266 }
 0x3ff   : > { %v9172_v45 = vpop.eup %9171 }
 0x400   : > { %v1420_v47 = vmul.f32 %v9172_v45, %v9164_v10  ;;  %v2423_v50 = vpop.permute.xlu0 %2422 }
 0x402   : > { %8533 = vmatmul.mubr.msk.f32.vlgmr.msra.gmra.mrb[20].mxu0 %vm711_vm2, %v1420_v47 }
 0x403   : > { %8541 = vmatpush3.xpose.msk.msra.mxu0 %vm711_vm2, %v2111_v44  ;;  %8542 = vmatprep.mubr.msk.f32.mxu0 %vm9431_vm1, %v9430_v14 }
 0x404   : > { %8550 = vmatprep.subr.mxu0 %v9430_v14  ;;  %v2579_v54 = vpop.permute.xlu0 %2578 }
 0x406   : > { %8543 = vmatmul.mubr.msk.f32.vlgmr.msra.gmra.mrb[22].mxu0 %vm711_vm2, %v2109_v41 }
 0x407   : > { %8551 = vmatpush3.xpose.msk.msra.mxu0 %vm711_vm2, %v2267_v48  ;;  %8552 = vmatprep.mubr.msk.f32.mxu0 %vm9431_vm1, %v9430_v14 }
 0x408   : > { %8560 = vmatprep.subr.mxu0 %v9430_v14 }
 0x409   : > { %v1341_v51 = vpop.xlane.xlu1 %1340 }
 0x40a   : > { %v1359_v52 = vsub.f32 %v9784_v12, %v1341_v51  ;;  %8553 = vmatmul.mubr.msk.f32.vlgmr.msra.gmra.mrb[24].mxu0 %vm711_vm2, %v2265_v43 }
 0x40b   : > { %8561 = vmatpush3.xpose.msk.msra.mxu0 %vm711_vm2, %v2423_v50  ;;  %8562 = vmatprep.mubr.msk.f32.mxu0 %vm9431_vm1, %v9430_v14 }
 0x40c   : > { %v1369_v53 = vmul.f32 1.442695, %v1359_v52  ;;  %8570 = vmatprep.subr.mxu0 %v9430_v14 }
 0x40e   : > { %9173 = vpow2.f32 %v1369_v53  ;;  %8563 = vmatmul.mubr.msk.f32.vlgmr.msra.gmra.mrb[26].mxu0 %vm711_vm2, %v2421_v46 }
 0x40f   : > { %8571 = vmatpush3.xpose.msk.msra.mxu0 %vm711_vm2, %v2579_v54  ;;  %8572 = vmatprep.mubr.msk.f32.mxu0 %vm9431_vm1, %v9430_v14 }
 0x410   : > { %8580 = vmatprep.subr.mxu0 %v9430_v14 }
 0x412   : > { %8573 = vmatmul.mubr.msk.f32.vlgmr.msra.gmra.mrb[28].mxu0 %vm711_vm2, %v2577_v49 }
 0x413   : > { %8582 = vmatprep.mubr.msk.f32.mxu0 %vm9431_vm1, %v9430_v14 }
 0x418   : > { %v9845_v55 = vpop.eup %9173 }
 0x419   : > { %v1387_v56 = vsel %vm711_vm2, %v9845_v55, 0.0 }
 0x41a   : > { %1388 = vadd.xlane.f32.xlu0 %v1387_v56 }
 0x430   : > { %1573 = vrot.lane.b32.xlu0 %v9693_v18, %s9433_s25 }
 0x435   : > { %v1335_v57 = vpop.xlane.xlu0 %1334 }
 0x436   : > { %v1357_v58 = vsub.f32 %v9797_v23, %v1335_v57 }
 0x438   : > { %v1365_v59 = vmul.f32 1.442695, %v1357_v58 }
 0x439   : > { %v1347_v60 = vpop.xlane.xlu0 %1346 }
 0x43a   : > { %9175 = vpow2.f32 %v1365_v59  ;;  %v1361_v4 = vsub.f32 %v9799_v24, %v1347_v60 }
 0x43c   : > { %v1373_v5 = vmul.f32 1.442695, %v1361_v4 }
 0x43d   : > { %v1353_v61 = vpop.xlane.xlu0 %1352 }
 0x43e   : > { %v1363_v62 = vsub.f32 %v9803_v26, %v1353_v61 }
 0x440   : > { %v1377_v63 = vmul.f32 1.442695, %v1363_v62 }
 0x442   : > { %9177 = vpow2.f32 %v1377_v63 }
 0x443   : > { %9179 = vpow2.f32 %v1373_v5 }
 0x444   : > { %v9176_v0 = vpop.eup %9175 }
 0x445   : > { %v1381_v1 = vsel %vm711_vm2, %v9176_v0, 0.0 }
 0x446   : > { %1382 = vadd.xlane.f32.xlu1 %v1381_v1 }
 0x44c   : > { %v9854_v2 = vpop.eup %9177 }
 0x44d   : > { %v1399_v3 = vsel %vm711_vm2, %v9854_v2, 0.0  ;;  %v9871_v6 = vpop.eup %9179 }
 0x44e   : > { %v1393_v7 = vsel %vm711_vm2, %v9871_v6, 0.0 }
 0x44f   : > { %1400 = vadd.xlane.f32.xlu0 %v1399_v3 }
 0x457   : > { %1421 = vrot.lane.b32.xlu1 %v9688_v16, %s9433_s25 }
 0x45b   : > { %1725 = vrot.lane.b32.xlu1 %v9699_v20, %s9433_s25 }
 0x465   : > { %2032 = vrot.lane.b32.xlu0 %v9688_v16, %s9435_s28 }
 0x469   : > { %2188 = vrot.lane.b32.xlu0 %v9693_v18, %s9435_s28 }
 0x46d   : > { %2344 = vrot.lane.b32.xlu0 %v9699_v20, %s9435_s28 }
 0x471   : > { %2500 = vrot.lane.b32.xlu0 %v9705_v22, %s9435_s28 }
 0x47f   : > { %1394 = vadd.xlane.f32.xlu1 %v1393_v7 }
 0x490   : > { %1877 = vrot.lane.b32.xlu1 %v9705_v22, %s9433_s25 }
 0x494   : > { %2030 = vrot.lane.b32.xlu1 %v9688_v16, %s9434_s13 }
 0x497   : > { %v9879_v8 = vpop.f32.mrb[14].mxu0 }
 0x498   : > { %2186 = vrot.lane.b32.xlu1 %v9693_v18, %s9434_s13  ;;  %v8504_v9 = vpop.f32.mrb[15].mxu0 }
 0x49c   : > { %2342 = vrot.lane.b32.xlu1 %v9699_v20, %s9434_s13 }
 0x4a0   : > { %2498 = vrot.lane.b32.xlu1 %v9705_v22, %s9434_s13  ;;  %v9887_v10 = vpop.f32.mrb[16].mxu0 }
 0x4a1   : > { %v8514_v11 = vpop.f32.mrb[17].mxu0 }
 0x4a4   : > { %v9889_v12 = vpop.f32.mrb[18].mxu0 }
 0x4a5   : > { %v8524_v13 = vpop.f32.mrb[19].mxu0 }
 0x4a7   : > { %v1389_v23 = vpop.xlane.xlu0 %1388 }
 0x4ab   : > { %v1574_v39 = vpop.permute.xlu0 %1573 }
 0x4d3   : > { %v1383_v24 = vpop.xlane.xlu1 %1382 }
 0x4d4   : > { %9181 = vrcp.f32 %v1383_v24 }
 0x4d5   : > { %v9891_v25 = vpop.f32.mrb[20].mxu0  ;;  %9183 = vrcp.f32 %v1389_v23 }
 0x4d6   : > { %v8534_v26 = vpop.f32.mrb[21].mxu0 }
 0x4d7   : > { %v1422_v27 = vpop.permute.xlu1 %1421 }
 0x4d8   : > { %8496 = vmatpush3.msra.mxu1 %v1422_v27 }
 0x4d9   : > { %v2182_v28 = vpop.f32.mrb[22].mxu0  ;;  %8505 = vmatprep.subr.mxu1 %v9430_v14 }
 0x4da   : > { %v9894_v29 = vmul.f32 0.17677669, %v2182_v28  ;;  %v8544_v30 = vpop.f32.mrb[23].mxu0 }
 0x4db   : > { %v1726_v45 = vpop.permute.xlu1 %1725 }
 0x4dc   : > { %v2665_v31 = vsel %vm711_vm2, %v9894_v29, -inf  ;;  %v1401_v50 = vpop.xlane.xlu0 %1400 }
 0x4dd   : > { %2666 = vmax.xlane.f32.xlu0 %v2665_v31  ;;  %v2338_v32 = vpop.f32.mrb[24].mxu0 }
 0x4de   : > { %v9182_v33 = vpop.eup %9181  ;;  %v9898_v34 = vmul.f32 0.17677669, %v2338_v32  ;;  %v8554_v35 = vpop.f32.mrb[25].mxu0 }
 0x4df   : > { %v1413_v36 = vmul.f32 %v9182_v33, %v9176_v0  ;;  %v9184_v37 = vpop.eup %9183 }
 0x4e0   : > { %v2671_v38 = vsel %vm711_vm2, %v9898_v34, -inf  ;;  %v1415_v43 = vmul.f32 %v9184_v37, %v9845_v55  ;;  %v2033_v56 = vpop.permute.xlu0 %2032 }
 0x4e1   : > { %8498 = vmatmul.mubr.msk.f32.vlgmr.msra.gmra.mrb[10].mxu1 %vm711_vm2, %v1413_v36  ;;  %2672 = vmax.xlane.f32.xlu1 %v2671_v38  ;;  %v2494_v40 = vpop.f32.mrb[26].mxu0 }
 0x4e2   : > { %8506 = vmatpush3.msra.mxu1 %v1574_v39  ;;  %v9903_v41 = vmul.f32 0.17677669, %v2494_v40  ;;  %v8564_v42 = vpop.f32.mrb[27].mxu0  ;;  %8507 = vmatprep.mubr.msk.f32.mxu1 %vm9431_vm1, %v9430_v14 }
 0x4e3   : > { %8515 = vmatprep.subr.mxu1 %v9430_v14 }
 0x4e4   : > { %v2677_v44 = vsel %vm711_vm2, %v9903_v41, -inf  ;;  %v2189_v59 = vpop.permute.xlu0 %2188 }
 0x4e5   : > { %8508 = vmatmul.mubr.msk.f32.vlgmr.msra.gmra.mrb[12].mxu1 %vm711_vm2, %v1415_v43  ;;  %2678 = vmax.xlane.f32.xlu0 %v2677_v44  ;;  %v2650_v46 = vpop.f32.mrb[28].mxu0 }
 0x4e6   : > { %8516 = vmatpush3.msra.mxu1 %v1726_v45  ;;  %v9912_v47 = vmul.f32 0.17677669, %v2650_v46  ;;  %v8574_v48 = vpop.f32.mrb[29].mxu0  ;;  %8517 = vmatprep.mubr.msk.f32.mxu1 %vm9431_vm1, %v9430_v14 }
 0x4e7   : > { %8525 = vmatprep.subr.mxu1 %v9430_v14 }
 0x4e8   : > { %v2683_v49 = vsel %vm711_vm2, %v9912_v47, -inf  ;;  %v2345_v61 = vpop.permute.xlu0 %2344 }
 0x4e9   : > { %2684 = vmax.xlane.f32.xlu0 %v2683_v49 }
 0x4ec   : > { %v2501_v63 = vpop.permute.xlu0 %2500 }
 0x4f2   : > { %2826 = vrot.lane.b32.xlu1 %v9685_v15, %s9436_s30 }
 0x4f6   : > { %3130 = vrot.lane.b32.xlu1 %v9697_v19, %s9436_s30 }
 0x4ff   : > { %2978 = vrot.lane.b32.xlu0 %v9691_v17, %s9436_s30 }
 0x50c   : > { %v1395_v51 = vpop.xlane.xlu1 %1394 }
 0x50d   : > { %9185 = vrcp.f32 %v1395_v51 }
 0x50e   : > { %9187 = vrcp.f32 %v1401_v50 }
 0x510   : > { %v1878_v53 = vpop.permute.xlu1 %1877 }
 0x514   : > { %v2031_v58 = vpop.permute.xlu1 %2030 }
 0x517   : > { %v9186_v52 = vpop.eup %9185 }
 0x518   : > { %v1417_v54 = vmul.f32 %v9186_v52, %v9871_v6  ;;  %v9188_v55 = vpop.eup %9187  ;;  %v2187_v60 = vpop.permute.xlu1 %2186 }
 0x519   : > { %v1419_v57 = vmul.f32 %v9188_v55, %v9854_v2 }
 0x51a   : > { %8518 = vmatmul.mubr.msk.f32.vlgmr.msra.gmra.mrb[14].mxu1 %vm711_vm2, %v1417_v54 }
 0x51b   : > { %8526 = vmatpush3.msra.mxu1 %v1878_v53  ;;  %8527 = vmatprep.mubr.msk.f32.mxu1 %vm9431_vm1, %v9430_v14 }
 0x51c   : > { %8535 = vmatprep.subr.mxu1 %v9430_v14  ;;  %v2343_v62 = vpop.permute.xlu1 %2342 }
 0x51e   : > { %8528 = vmatmul.mubr.msk.f32.vlgmr.msra.gmra.mrb[16].mxu1 %vm711_vm2, %v1419_v57 }
 0x51f   : > { %8537 = vmatprep.mubr.msk.f32.mxu1 %vm9431_vm1, %v9430_v14 }
 0x520   : > { %v2499_v0 = vpop.permute.xlu1 %2498 }
 0x522   : > { %8536 = vmatpush3.xpose.msk.msra.mxu1 %vm711_vm2, %v2033_v56 }
 0x523   : > { %8545 = vmatprep.subr.mxu1 %v9430_v14 }
 0x525   : > { %8538 = vmatmul.mubr.msk.f32.vlgmr.msra.gmra.mrb[18].mxu1 %vm711_vm2, %v2031_v58 }
 0x526   : > { %8546 = vmatpush3.xpose.msk.msra.mxu1 %vm711_vm2, %v2189_v59  ;;  %8547 = vmatprep.mubr.msk.f32.mxu1 %vm9431_vm1, %v9430_v14 }
 0x527   : > { %8555 = vmatprep.subr.mxu1 %v9430_v14 }
 0x529   : > { %8548 = vmatmul.mubr.msk.f32.vlgmr.msra.gmra.mrb[20].mxu1 %vm711_vm2, %v2187_v60 }
 0x52a   : > { %8556 = vmatpush3.xpose.msk.msra.mxu1 %vm711_vm2, %v2345_v61  ;;  %8557 = vmatprep.mubr.msk.f32.mxu1 %vm9431_vm1, %v9430_v14 }
 0x52b   : > { %8565 = vmatprep.subr.mxu1 %v9430_v14 }
 0x52d   : > { %8558 = vmatmul.mubr.msk.f32.vlgmr.msra.gmra.mrb[22].mxu1 %vm711_vm2, %v2343_v62 }
 0x52e   : > { %8566 = vmatpush3.xpose.msk.msra.mxu1 %vm711_vm2, %v2501_v63  ;;  %8567 = vmatprep.mubr.msk.f32.mxu1 %vm9431_vm1, %v9430_v14 }
 0x52f   : > { %8575 = vmatprep.subr.mxu1 %v9430_v14 }
 0x531   : > { %8568 = vmatmul.mubr.msk.f32.vlgmr.msra.gmra.mrb[24].mxu1 %vm711_vm2, %v2499_v0 }
 0x532   : > { %8577 = vmatprep.mubr.msk.f32.mxu1 %vm9431_vm1, %v9430_v14 }
 0x56a   : > { %v2667_v1 = vpop.xlane.xlu0 %2666 }
 0x56b   : > { %v2687_v2 = vsub.f32 %v9894_v29, %v2667_v1 }
 0x56d   : > { %v2696_v3 = vmul.f32 1.442695, %v2687_v2 }
 0x56e   : > { %v2673_v4 = vpop.xlane.xlu1 %2672 }
 0x56f   : > { %9189 = vpow2.f32 %v2696_v3  ;;  %v2689_v5 = vsub.f32 %v9898_v34, %v2673_v4 }
 0x571   : > { %v2700_v6 = vmul.f32 1.442695, %v2689_v5 }
 0x572   : > { %v2827_v7 = vpop.permute.xlu1 %2826  ;;  %v2679_v9 = vpop.xlane.xlu0 %2678 }
 0x573   : > { %9191 = vpow2.f32 %v2700_v6  ;;  %v2691_v11 = vsub.f32 %v9903_v41, %v2679_v9  ;;  %8581 = vmatpush3.msra.mxu0 %v2827_v7 }
 0x574   : > { %8590 = vmatprep.subr.mxu0 %v9430_v14 }
 0x575   : > { %v2704_v13 = vmul.f32 1.442695, %v2691_v11 }
 0x576   : > { %v2685_v30 = vpop.xlane.xlu0 %2684  ;;  %v3131_v54 = vpop.permute.xlu1 %3130 }
 0x577   : > { %9193 = vpow2.f32 %v2704_v13  ;;  %v2693_v31 = vsub.f32 %v9912_v47, %v2685_v30 }
 0x579   : > { %v9958_v23 = vpop.eup %9189  ;;  %v2708_v32 = vmul.f32 1.442695, %v2693_v31 }
 0x57a   : > { %v2713_v24 = vsel %vm711_vm2, %v9958_v23, 0.0  ;;  %v2979_v59 = vpop.permute.xlu0 %2978 }
 0x57b   : > { %2714 = vadd.xlane.f32.xlu1 %v2713_v24  ;;  %9195 = vpow2.f32 %v2708_v32 }
 0x57d   : > { %v9962_v26 = vpop.eup %9191 }
 0x57e   : > { %v2719_v27 = vsel %vm711_vm2, %v9962_v26, 0.0 }
 0x57f   : > { %2720 = vadd.xlane.f32.xlu0 %v2719_v27 }
 0x581   : > { %v9966_v28 = vpop.eup %9193 }
 0x582   : > { %v2725_v29 = vsel %vm711_vm2, %v9966_v28, 0.0 }
 0x583   : > { %2726 = vadd.xlane.f32.xlu1 %v2725_v29 }
 0x585   : > { %v9980_v33 = vpop.eup %9195 }
 0x586   : > { %v2731_v34 = vsel %vm711_vm2, %v9980_v33, 0.0 }
 0x594   : > { %3282 = vrot.lane.b32.xlu1 %v9702_v21, %s9436_s30 }
 0x595   : > { %3620 = vrot.lane.b32.xlu0 %v9688_v16, %s9437_s24 }
 0x598   : > { %3618 = vrot.lane.b32.xlu1 %v9688_v16, %s9438_s23 }
 0x59c   : > { %3696 = vrot.lane.b32.xlu1 %v9685_v15, %s9438_s23 }
 0x5a0   : > { %3774 = vrot.lane.b32.xlu1 %v9693_v18, %s9438_s23 }
 0x5a4   : > { %3852 = vrot.lane.b32.xlu1 %v9691_v17, %s9438_s23 }
 0x5a8   : > { %3930 = vrot.lane.b32.xlu1 %v9699_v20, %s9438_s23 }
 0x5ac   : > { %4008 = vrot.lane.b32.xlu1 %v9697_v19, %s9438_s23 }
 0x5b0   : > { %4086 = vrot.lane.b32.xlu1 %v9705_v22, %s9438_s23 }
 0x5b4   : > { %v9985_v35 = vpop.f32.mrb[10].mxu1  ;;  %4164 = vrot.lane.b32.xlu1 %v9702_v21, %s9438_s23  ;;  %2732 = vadd.xlane.f32.xlu0 %v2731_v34 }
 0x5b5   : > { %v8499_v36 = vpop.f32.mrb[11].mxu1 }
 0x5b8   : > { %v9988_v37 = vpop.f32.mrb[12].mxu1 }
 0x5b9   : > { %v8509_v38 = vpop.f32.mrb[13].mxu1 }
 0x5ca   : > { %3698 = vrot.lane.b32.xlu0 %v9685_v15, %s9437_s24 }
 0x5ce   : > { %3776 = vrot.lane.b32.xlu0 %v9693_v18, %s9437_s24 }
 0x5d2   : > { %3854 = vrot.lane.b32.xlu0 %v9691_v17, %s9437_s24 }
 0x5d6   : > { %3932 = vrot.lane.b32.xlu0 %v9699_v20, %s9437_s24 }
 0x5da   : > { %4010 = vrot.lane.b32.xlu0 %v9697_v19, %s9437_s24 }
 0x5de   : > { %4088 = vrot.lane.b32.xlu0 %v9705_v22, %s9437_s24 }
 0x5e2   : > { %4166 = vrot.lane.b32.xlu0 %v9702_v21, %s9437_s24 }
 0x5ed   : > { %v9997_v39 = vpop.f32.mrb[14].mxu1 }
 0x5ee   : > { %v8519_v40 = vpop.f32.mrb[15].mxu1 }
 0x5f1   : > { %v9999_v41 = vpop.f32.mrb[16].mxu1 }
 0x5f2   : > { %v8529_v42 = vpop.f32.mrb[17].mxu1 }
 0x5f8   : > { %v2104_v43 = vpop.f32.mrb[18].mxu1 }
 0x5f9   : > { %v8539_v44 = vpop.f32.mrb[19].mxu1  ;;  %v10001_v45 = vmul.f32 0.17677669, %v2104_v43 }
 0x5fb   : > { %v2662_v51 = vsel %vm711_vm2, %v10001_v45, -inf }
 0x5fc   : > { %v2260_v46 = vpop.f32.mrb[20].mxu1 }
 0x5fd   : > { %v10003_v47 = vmul.f32 0.17677669, %v2260_v46  ;;  %v8549_v48 = vpop.f32.mrb[21].mxu1 }
 0x5ff   : > { %v2668_v49 = vsel %vm711_vm2, %v10003_v47, -inf }
 0x600   : > { %v2416_v50 = vpop.f32.mrb[22].mxu1  ;;  %2669 = vmax.xlane.f32.xlu1 %v2668_v49 }
 0x601   : > { %v10009_v52 = vmul.f32 0.17677669, %v2416_v50  ;;  %v8559_v53 = vpop.f32.mrb[23].mxu1  ;;  %2663 = vmax.xlane.f32.xlu0 %v2662_v51 }
 0x603   : > { %v2674_v56 = vsel %vm711_vm2, %v10009_v52, -inf }
 0x604   : > { %v2572_v55 = vpop.f32.mrb[24].mxu1 }
 0x605   : > { %v10013_v57 = vmul.f32 0.17677669, %v2572_v55  ;;  %v8569_v58 = vpop.f32.mrb[25].mxu1  ;;  %2675 = vmax.xlane.f32.xlu0 %v2674_v56 }
 0x607   : > { %v2680_v61 = vsel %vm711_vm2, %v10013_v57, -inf }
 0x608   : > { %v2715_v60 = vpop.xlane.xlu1 %2714 }
 0x609   : > { %9197 = vrcp.f32 %v2715_v60  ;;  %2681 = vmax.xlane.f32.xlu0 %v2680_v61 }
 0x60c   : > { %v2721_v62 = vpop.xlane.xlu0 %2720 }
 0x60d   : > { %9199 = vrcp.f32 %v2721_v62 }
 0x610   : > { %v2727_v63 = vpop.xlane.xlu1 %2726  ;;  %v3621_v7 = vpop.permute.xlu0 %3620 }
 0x611   : > { %9201 = vrcp.f32 %v2727_v63 }
 0x613   : > { %v9198_v0 = vpop.eup %9197 }
 0x614   : > { %v2743_v1 = vmul.f32 %v9198_v0, %v9958_v23  ;;  %v3283_v6 = vpop.permute.xlu1 %3282 }
 0x616   : > { %8583 = vmatmul.mubr.msk.f32.vlgmr.msra.gmra.mrb[30].mxu0 %vm711_vm2, %v2743_v1 }
 0x617   : > { %v9200_v2 = vpop.eup %9199  ;;  %8591 = vmatpush3.msra.mxu0 %v2979_v59  ;;  %8592 = vmatprep.mubr.msk.f32.mxu0 %vm9431_vm1, %v9430_v14 }
 0x618   : > { %8600 = vmatprep.subr.mxu0 %v9430_v14  ;;  %v2745_v3 = vmul.f32 %v9200_v2, %v9962_v26  ;;  %v3619_v11 = vpop.permute.xlu1 %3618 }
 0x61a   : > { %8593 = vmatmul.mubr.msk.f32.vlgmr.msra.gmra.mrb[32].mxu0 %vm711_vm2, %v2745_v3 }
 0x61b   : > { %v9202_v4 = vpop.eup %9201  ;;  %8601 = vmatpush3.msra.mxu0 %v3131_v54  ;;  %8602 = vmatprep.mubr.msk.f32.mxu0 %vm9431_vm1, %v9430_v14 }
 0x61c   : > { %8610 = vmatprep.subr.mxu0 %v9430_v14  ;;  %v2747_v5 = vmul.f32 %v9202_v4, %v9966_v28  ;;  %v3697_v23 = vpop.permute.xlu1 %3696 }
 0x61e   : > { %8603 = vmatmul.mubr.msk.f32.vlgmr.msra.gmra.mrb[34].mxu0 %vm711_vm2, %v2747_v5 }
 0x61f   : > { %8611 = vmatpush3.msra.mxu0 %v3283_v6  ;;  %8612 = vmatprep.mubr.msk.f32.mxu0 %vm9431_vm1, %v9430_v14 }
 0x620   : > { %8643 = vmatprep.subr.mxu0 %v9430_v14  ;;  %v3775_v28 = vpop.permute.xlu1 %3774 }
 0x624   : > { %v3853_v30 = vpop.permute.xlu1 %3852 }
 0x628   : > { %v3931_v32 = vpop.permute.xlu1 %3930 }
 0x62c   : > { %v4009_v34 = vpop.permute.xlu1 %4008 }
 0x630   : > { %v4087_v38 = vpop.permute.xlu1 %4086 }
 0x634   : > { %v4165_v42 = vpop.permute.xlu1 %4164 }
 0x641   : > { %v2733_v9 = vpop.xlane.xlu0 %2732 }
 0x642   : > { %9203 = vrcp.f32 %v2733_v9 }
 0x645   : > { %v3699_v13 = vpop.permute.xlu0 %3698 }
 0x649   : > { %v3777_v26 = vpop.permute.xlu0 %3776 }
 0x64c   : > { %v9204_v24 = vpop.eup %9203 }
 0x64d   : > { %v2749_v27 = vmul.f32 %v9204_v24, %v9980_v33  ;;  %v3855_v29 = vpop.permute.xlu0 %3854 }
 0x64f   : > { %8613 = vmatmul.mubr.msk.f32.vlgmr.msra.gmra.mrb[36].mxu0 %vm711_vm2, %v2749_v27 }
 0x650   : > { %8644 = vmatpush3.xpose.msk.msra.mxu0 %vm711_vm2, %v3621_v7  ;;  %8645 = vmatprep.mubr.msk.f32.mxu0 %vm9431_vm1, %v9430_v14 }
 0x651   : > { %8648 = vmatprep.subr.mxu0 %v9430_v14  ;;  %v3933_v31 = vpop.permute.xlu0 %3932 }
 0x653   : > { %8646 = vmatmul.mubr.msk.f32.vlgmr.msra.gmra.mrb[38].mxu0 %vm711_vm2, %v3619_v11 }
 0x654   : > { %8649 = vmatpush3.xpose.msk.msra.mxu0 %vm711_vm2, %v3699_v13  ;;  %8650 = vmatprep.mubr.msk.f32.mxu0 %vm9431_vm1, %v9430_v14 }
 0x655   : > { %8653 = vmatprep.subr.mxu0 %v9430_v14  ;;  %v4011_v33 = vpop.permute.xlu0 %4010 }
 0x657   : > { %8651 = vmatmul.mubr.msk.f32.vlgmr.msra.gmra.mrb[40].mxu0 %vm711_vm2, %v3697_v23 }
 0x658   : > { %8654 = vmatpush3.xpose.msk.msra.mxu0 %vm711_vm2, %v3777_v26  ;;  %8655 = vmatprep.mubr.msk.f32.mxu0 %vm9431_vm1, %v9430_v14 }
 0x659   : > { %8658 = vmatprep.subr.mxu0 %v9430_v14  ;;  %v4089_v36 = vpop.permute.xlu0 %4088 }
 0x65b   : > { %8656 = vmatmul.mubr.msk.f32.vlgmr.msra.gmra.mrb[42].mxu0 %vm711_vm2, %v3775_v28 }
 0x65c   : > { %8659 = vmatpush3.xpose.msk.msra.mxu0 %vm711_vm2, %v3855_v29  ;;  %8660 = vmatprep.mubr.msk.f32.mxu0 %vm9431_vm1, %v9430_v14 }
 0x65d   : > { %8663 = vmatprep.subr.mxu0 %v9430_v14  ;;  %v4167_v40 = vpop.permute.xlu0 %4166 }
 0x65f   : > { %8661 = vmatmul.mubr.msk.f32.vlgmr.msra.gmra.mrb[44].mxu0 %vm711_vm2, %v3853_v30 }
 0x660   : > { %8664 = vmatpush3.xpose.msk.msra.mxu0 %vm711_vm2, %v3933_v31  ;;  %8665 = vmatprep.mubr.msk.f32.mxu0 %vm9431_vm1, %v9430_v14 }
 0x661   : > { %8668 = vmatprep.subr.mxu0 %v9430_v14 }
 0x663   : > { %8666 = vmatmul.mubr.msk.f32.vlgmr.msra.gmra.mrb[46].mxu0 %vm711_vm2, %v3931_v32 }
 0x664   : > { %8669 = vmatpush3.xpose.msk.msra.mxu0 %vm711_vm2, %v4011_v33  ;;  %8670 = vmatprep.mubr.msk.f32.mxu0 %vm9431_vm1, %v9430_v14 }
 0x665   : > { %8673 = vmatprep.subr.mxu0 %v9430_v14 }
 0x667   : > { %8671 = vmatmul.mubr.msk.f32.vlgmr.msra.gmra.mrb[48].mxu0 %vm711_vm2, %v4009_v34 }
 0x668   : > { %8674 = vmatpush3.xpose.msk.msra.mxu0 %vm711_vm2, %v4089_v36  ;;  %8675 = vmatprep.mubr.msk.f32.mxu0 %vm9431_vm1, %v9430_v14 }
 0x669   : > { %8678 = vmatprep.subr.mxu0 %v9430_v14 }
 0x66b   : > { %8676 = vmatmul.mubr.msk.f32.vlgmr.msra.gmra.mrb[50].mxu0 %vm711_vm2, %v4087_v38 }
 0x66c   : > { %8679 = vmatpush3.xpose.msk.msra.mxu0 %vm711_vm2, %v4167_v40  ;;  %8680 = vmatprep.mubr.msk.f32.mxu0 %vm9431_vm1, %v9430_v14 }
 0x66d   : > { %8688 = vmatprep.subr.mxu0 %v9430_v14 }
 0x66f   : > { %8681 = vmatmul.mubr.msk.f32.vlgmr.msra.gmra.mrb[52].mxu0 %vm711_vm2, %v4165_v42 }
 0x670   : > { %8690 = vmatprep.mubr.msk.f32.mxu0 %vm9431_vm1, %v9430_v14 }
 0x68d   : > { %v2670_v43 = vpop.xlane.xlu1 %2669 }
 0x68e   : > { %v2688_v44 = vsub.f32 %v10003_v47, %v2670_v43  ;;  %v2664_v46 = vpop.xlane.xlu0 %2663 }
 0x68f   : > { %v2686_v48 = vsub.f32 %v10001_v45, %v2664_v46 }
 0x690   : > { %v2698_v49 = vmul.f32 1.442695, %v2688_v44 }
 0x691   : > { %v2694_v50 = vmul.f32 1.442695, %v2686_v48 }
 0x692   : > { %9205 = vpow2.f32 %v2698_v49  ;;  %v2676_v51 = vpop.xlane.xlu0 %2675 }
 0x693   : > { %9207 = vpow2.f32 %v2694_v50  ;;  %v2690_v53 = vsub.f32 %v10009_v52, %v2676_v51 }
 0x695   : > { %v2702_v54 = vmul.f32 1.442695, %v2690_v53 }
 0x696   : > { %v2682_v55 = vpop.xlane.xlu0 %2681 }
 0x697   : > { %9209 = vpow2.f32 %v2702_v54  ;;  %v2692_v56 = vsub.f32 %v10013_v57, %v2682_v55 }
 0x699   : > { %v2706_v58 = vmul.f32 1.442695, %v2692_v56 }
 0x69b   : > { %9211 = vpow2.f32 %v2706_v58 }
 0x69c   : > { %v10080_v59 = vpop.eup %9205 }
 0x69d   : > { %v9208_v47 = vpop.eup %9207  ;;  %v2716_v45 = vsel %vm711_vm2, %v10080_v59, 0.0 }
 0x69e   : > { %2717 = vadd.xlane.f32.xlu0 %v2716_v45  ;;  %v2710_v60 = vsel %vm711_vm2, %v9208_v47, 0.0 }
 0x69f   : > { %2711 = vadd.xlane.f32.xlu1 %v2710_v60 }
 0x6a1   : > { %v10085_v61 = vpop.eup %9209 }
 0x6a2   : > { %v2722_v52 = vsel %vm711_vm2, %v10085_v61, 0.0 }
 0x6a3   : > { %2723 = vadd.xlane.f32.xlu1 %v2722_v52 }
 0x6a5   : > { %v10089_v62 = vpop.eup %9211 }
 0x6a6   : > { %v2728_v57 = vsel %vm711_vm2, %v10089_v62, 0.0 }
 0x6a7   : > { %2729 = vadd.xlane.f32.xlu0 %v2728_v57 }
 0x6b4   : > { %2750 = vrot.lane.b32.xlu1 %v9688_v16, %s9436_s30 }
 0x6b8   : > { %3054 = vrot.lane.b32.xlu1 %v9699_v20, %s9436_s30 }
 0x6bc   : > { %3206 = vrot.lane.b32.xlu1 %v9705_v22, %s9436_s30 }
 0x6bd   : > { %2902 = vrot.lane.b32.xlu0 %v9693_v18, %s9436_s30 }
 0x6e9   : > { %v10101_v63 = vpop.f32.mrb[30].mxu0 }
 0x6ea   : > { %v8584_v0 = vpop.f32.mrb[31].mxu0 }
 0x6ed   : > { %v10103_v1 = vpop.f32.mrb[32].mxu0 }
 0x6ee   : > { %v8594_v2 = vpop.f32.mrb[33].mxu0 }
 0x6f1   : > { %v10105_v3 = vpop.f32.mrb[34].mxu0 }
 0x6f2   : > { %v8604_v4 = vpop.f32.mrb[35].mxu0 }
 0x722   : > { %v10107_v5 = vpop.f32.mrb[36].mxu0 }
 0x723   : > { %v8614_v6 = vpop.f32.mrb[37].mxu0 }
 0x726   : > { %v3692_v7 = vpop.f32.mrb[38].mxu0 }
 0x727   : > { %v10109_v9 = vmul.f32 0.17677669, %v3692_v7  ;;  %v8647_v11 = vpop.f32.mrb[39].mxu0 }
 0x729   : > { %v4250_v13 = vsel %vm711_vm2, %v10109_v9, -inf }
 0x72a   : > { %4251 = vmax.xlane.f32.xlu0 %v4250_v13  ;;  %v3770_v23 = vpop.f32.mrb[40].mxu0 }
 0x72b   : > { %v10113_v24 = vmul.f32 0.17677669, %v3770_v23  ;;  %v8652_v26 = vpop.f32.mrb[41].mxu0  ;;  %v2718_v27 = vpop.xlane.xlu0 %2717 }
 0x72c   : > { %v2712_v28 = vpop.xlane.xlu1 %2711 }
 0x72d   : > { %9213 = vrcp.f32 %v2712_v28  ;;  %v4253_v29 = vsel %vm711_vm2, %v10113_v24, -inf }
 0x72e   : > { %4254 = vmax.xlane.f32.xlu1 %v4253_v29  ;;  %v3848_v30 = vpop.f32.mrb[42].mxu0  ;;  %9215 = vrcp.f32 %v2718_v27 }
 0x72f   : > { %v10117_v31 = vmul.f32 0.17677669, %v3848_v30  ;;  %v8657_v32 = vpop.f32.mrb[43].mxu0 }
 0x730   : > { %v2724_v33 = vpop.xlane.xlu1 %2723 }
 0x731   : > { %v4256_v34 = vsel %vm711_vm2, %v10117_v31, -inf  ;;  %9217 = vrcp.f32 %v2724_v33 }
 0x732   : > { %4257 = vmax.xlane.f32.xlu0 %v4256_v34  ;;  %v3926_v36 = vpop.f32.mrb[44].mxu0 }
 0x733   : > { %v10121_v38 = vmul.f32 0.17677669, %v3926_v36  ;;  %v8662_v40 = vpop.f32.mrb[45].mxu0 }
 0x734   : > { %v2751_v42 = vpop.permute.xlu1 %2750  ;;  %v2730_v43 = vpop.xlane.xlu0 %2729 }
 0x735   : > { %8576 = vmatpush3.msra.mxu1 %v2751_v42  ;;  %v4259_v44 = vsel %vm711_vm2, %v10121_v38, -inf  ;;  %9219 = vrcp.f32 %v2730_v43 }
 0x736   : > { %4260 = vmax.xlane.f32.xlu0 %v4259_v44  ;;  %v4004_v46 = vpop.f32.mrb[46].mxu0  ;;  %8585 = vmatprep.subr.mxu1 %v9430_v14 }
 0x737   : > { %v9214_v48 = vpop.eup %9213  ;;  %v10126_v49 = vmul.f32 0.17677669, %v4004_v46  ;;  %v8667_v50 = vpop.f32.mrb[47].mxu0 }
 0x738   : > { %v2903_v51 = vpop.permute.xlu0 %2902  ;;  %v2742_v53 = vmul.f32 %v9214_v48, %v9208_v47  ;;  %v9216_v54 = vpop.eup %9215 }
 0x739   : > { %v4262_v55 = vsel %vm711_vm2, %v10126_v49, -inf  ;;  %v3055_v60 = vpop.permute.xlu1 %3054  ;;  %v2744_v47 = vmul.f32 %v9216_v54, %v10080_v59 }
 0x73a   : > { %8578 = vmatmul.mubr.msk.f32.vlgmr.msra.gmra.mrb[26].mxu1 %vm711_vm2, %v2742_v53  ;;  %4263 = vmax.xlane.f32.xlu1 %v4262_v55  ;;  %v4082_v56 = vpop.f32.mrb[48].mxu0 }
 0x73b   : > { %8586 = vmatpush3.msra.mxu1 %v2903_v51  ;;  %v10131_v58 = vmul.f32 0.17677669, %v4082_v56  ;;  %v8672_v45 = vpop.f32.mrb[49].mxu0  ;;  %8587 = vmatprep.mubr.msk.f32.mxu1 %vm9431_vm1, %v9430_v14  ;;  %v9218_v52 = vpop.eup %9217 }
 0x73c   : > { %8595 = vmatprep.subr.mxu1 %v9430_v14  ;;  %v2746_v6 = vmul.f32 %v9218_v52, %v10085_v61  ;;  %v3359_v61 = vld [vmem:[#allocation3 + $0x8] sm:$0xff] }
 0x73d   : > { %v4265_v57 = vsel %vm711_vm2, %v10131_v58, -inf  ;;  %v3207_v11 = vpop.permute.xlu1 %3206 }
 0x73e   : > { %8588 = vmatmul.mubr.msk.f32.vlgmr.msra.gmra.mrb[28].mxu1 %vm711_vm2, %v2744_v47  ;;  %4266 = vmax.xlane.f32.xlu0 %v4265_v57  ;;  %v4160_v0 = vpop.f32.mrb[50].mxu0 }
 0x73f   : > { %8596 = vmatpush3.msra.mxu1 %v3055_v60  ;;  %v10140_v2 = vmul.f32 0.17677669, %v4160_v0  ;;  %v8677_v4 = vpop.f32.mrb[51].mxu0  ;;  %8597 = vmatprep.mubr.msk.f32.mxu1 %vm9431_vm1, %v9430_v14  ;;  %v9220_v59 = vpop.eup %9219 }
 0x740   : > { %8605 = vmatprep.subr.mxu1 %v9430_v14  ;;  %v2748_v27 = vmul.f32 %v9220_v59, %v10089_v62  ;;  %v10166_v62 = vld [vmem:[#allocation3] sm:$0xff] }
 0x741   : > { %v4268_v7 = vsel %vm711_vm2, %v10140_v2, -inf }
 0x742   : > { %8598 = vmatmul.mubr.msk.f32.vlgmr.msra.gmra.mrb[30].mxu1 %vm711_vm2, %v2746_v6  ;;  %4269 = vmax.xlane.f32.xlu1 %v4268_v7  ;;  %v4238_v13 = vpop.f32.mrb[52].mxu0 }
 0x743   : > { %8606 = vmatpush3.msra.mxu1 %v3207_v11  ;;  %v4249_v23 = vmul.f32 0.17677669, %v4238_v13  ;;  %v8682_v26 = vpop.f32.mrb[53].mxu0  ;;  %8607 = vmatprep.mubr.msk.f32.mxu1 %vm9431_vm1, %v9430_v14 }
 0x744   : > { %8615 = vmatprep.subr.mxu1 %v3359_v61 }
 0x745   : > { %v4271_v28 = vsel %vm711_vm2, %v4249_v23, -inf }
 0x746   : > { %8608 = vmatmul.mubr.msk.f32.vlgmr.msra.gmra.mrb[32].mxu1 %vm711_vm2, %v2748_v27  ;;  %4272 = vmax.xlane.f32.xlu0 %v4271_v28 }
 0x747   : > { %8616 = vmatpush3.msra.mxu1 %v3359_v61 }
 0x748   : > { %8629 = vmatprep.subr.mxu1 %v10166_v62 }
 0x753   : > { %4338 = vrot.lane.b32.xlu1 %v9688_v16, %s9439_s17 }
 0x757   : > { %4490 = vrot.lane.b32.xlu1 %v9693_v18, %s9439_s17 }
 0x75b   : > { %4566 = vrot.lane.b32.xlu1 %v9691_v17, %s9439_s17 }
 0x75c   : > { %4414 = vrot.lane.b32.xlu0 %v9685_v15, %s9439_s17 }
 0x75f   : > { %4718 = vrot.lane.b32.xlu1 %v9697_v19, %s9439_s17 }
 0x760   : > { %4642 = vrot.lane.b32.xlu0 %v9699_v20, %s9439_s17 }
 0x7b7   : > { %v4252_v29 = vpop.xlane.xlu0 %4251 }
 0x7b8   : > { %v4274_v30 = vsub.f32 %v10109_v9, %v4252_v29 }
 0x7ba   : > { %v4282_v32 = vmul.f32 1.442695, %v4274_v30 }
 0x7bb   : > { %v4255_v33 = vpop.xlane.xlu1 %4254 }
 0x7bc   : > { %9221 = vpow2.f32 %v4282_v32  ;;  %v4275_v34 = vsub.f32 %v10113_v24, %v4255_v33 }
 0x7be   : > { %v4284_v36 = vmul.f32 1.442695, %v4275_v34 }
 0x7bf   : > { %v4258_v40 = vpop.xlane.xlu0 %4257 }
 0x7c0   : > { %9223 = vpow2.f32 %v4284_v36  ;;  %v4276_v42 = vsub.f32 %v10117_v31, %v4258_v40 }
 0x7c2   : > { %v4286_v43 = vmul.f32 1.442695, %v4276_v42 }
 0x7c3   : > { %v4261_v44 = vpop.xlane.xlu0 %4260 }
 0x7c4   : > { %9225 = vpow2.f32 %v4286_v43  ;;  %v4277_v46 = vsub.f32 %v10121_v38, %v4261_v44 }
 0x7c6   : > { %v10173_v48 = vpop.eup %9221  ;;  %v4288_v50 = vmul.f32 1.442695, %v4277_v46 }
 0x7c7   : > { %v4264_v51 = vpop.xlane.xlu1 %4263  ;;  %v4298_v9 = vsel %vm711_vm2, %v10173_v48, 0.0 }
 0x7c8   : > { %9227 = vpow2.f32 %v4288_v50  ;;  %v4278_v24 = vsub.f32 %v10126_v49, %v4264_v51  ;;  %4299 = vadd.xlane.f32.xlu1 %v4298_v9 }
 0x7ca   : > { %v10178_v53 = vpop.eup %9223  ;;  %v4290_v54 = vmul.f32 1.442695, %v4278_v24 }
 0x7cb   : > { %v4267_v31 = vpop.xlane.xlu0 %4266  ;;  %v4301_v55 = vsel %vm711_vm2, %v10178_v53, 0.0 }
 0x7cc   : > { %9229 = vpow2.f32 %v4290_v54  ;;  %v4279_v38 = vsub.f32 %v10131_v58, %v4267_v31  ;;  %4302 = vadd.xlane.f32.xlu0 %v4301_v55  ;;  %v4947_v55 = vld [vmem:[#allocation3 + $0x10] sm:$0xff] }
 0x7ce   : > { %v10183_v56 = vpop.eup %9225  ;;  %v4292_v45 = vmul.f32 1.442695, %v4279_v38 }
 0x7cf   : > { %v4270_v60 = vpop.xlane.xlu1 %4269  ;;  %v4304_v47 = vsel %vm711_vm2, %v10183_v56, 0.0 }
 0x7d0   : > { %9231 = vpow2.f32 %v4292_v45  ;;  %v4280_v49 = vsub.f32 %v10140_v2, %v4270_v60  ;;  %4305 = vadd.xlane.f32.xlu1 %v4304_v47 }
 0x7d2   : > { %v10188_v52 = vpop.eup %9227  ;;  %v4294_v57 = vmul.f32 1.442695, %v4280_v49 }
 0x7d3   : > { %v4273_v0 = vpop.xlane.xlu0 %4272  ;;  %v4307_v4 = vsel %vm711_vm2, %v10188_v52, 0.0 }
 0x7d4   : > { %9233 = vpow2.f32 %v4294_v57  ;;  %v4281_v58 = vsub.f32 %v4249_v23, %v4273_v0  ;;  %4308 = vadd.xlane.f32.xlu0 %v4307_v4 }
 0x7d6   : > { %v10192_v6 = vpop.eup %9229  ;;  %v4296_v59 = vmul.f32 1.442695, %v4281_v58 }
 0x7d7   : > { %v4415_v7 = vpop.permute.xlu0 %4414  ;;  %v4310_v11 = vsel %vm711_vm2, %v10192_v6, 0.0 }
 0x7d8   : > { %9235 = vpow2.f32 %v4296_v59  ;;  %4311 = vadd.xlane.f32.xlu1 %v4310_v11  ;;  %8689 = vmatpush3.msra.mxu0 %v4415_v7 }
 0x7d9   : > { %8698 = vmatprep.subr.mxu0 %v9430_v14 }
 0x7da   : > { %v10197_v2 = vpop.eup %9231 }
 0x7db   : > { %v4313_v13 = vsel %vm711_vm2, %v10197_v2, 0.0 }
 0x7dc   : > { %4314 = vadd.xlane.f32.xlu0 %v4313_v13 }
 0x7de   : > { %v10201_v23 = vpop.eup %9233 }
 0x7df   : > { %v4316_v26 = vsel %vm711_vm2, %v10201_v23, 0.0 }
 0x7e0   : > { %4317 = vadd.xlane.f32.xlu1 %v4316_v26 }
 0x7e2   : > { %v10205_v27 = vpop.eup %9235 }
 0x7e3   : > { %v4319_v28 = vsel %vm711_vm2, %v10205_v27, 0.0 }
 0x7e4   : > { %4320 = vadd.xlane.f32.xlu0 %v4319_v28 }
 0x7f1   : > { %4870 = vrot.lane.b32.xlu1 %v9702_v21, %s9439_s17 }
 0x7f5   : > { %5085 = vrot.lane.b32.xlu1 %v9688_v16, %s9440_s15 }
 0x7f9   : > { %5163 = vrot.lane.b32.xlu1 %v9685_v15, %s9440_s15 }
 0x7fa   : > { %4794 = vrot.lane.b32.xlu0 %v9705_v22, %s9439_s17 }
 0x7fd   : > { %5241 = vrot.lane.b32.xlu1 %v9693_v18, %s9440_s15 }
 0x7fe   : > { %5087 = vrot.lane.b32.xlu0 %v9688_v16, %s9441_s16 }
 0x801   : > { %5319 = vrot.lane.b32.xlu1 %v9691_v17, %s9440_s15 }
 0x802   : > { %5165 = vrot.lane.b32.xlu0 %v9685_v15, %s9441_s16 }
 0x805   : > { %5477 = vrot.lane.b32.xlu1 %v9697_v19, %s9441_s16 }
 0x806   : > { %5243 = vrot.lane.b32.xlu0 %v9693_v18, %s9441_s16 }
 0x809   : > { %5475 = vrot.lane.b32.xlu1 %v9697_v19, %s9440_s15 }
 0x80a   : > { %5321 = vrot.lane.b32.xlu0 %v9691_v17, %s9441_s16 }
 0x80d   : > { %v2822_v61 = vpop.f32.mrb[26].mxu1  ;;  %5633 = vrot.lane.b32.xlu1 %v9702_v21, %s9441_s16 }
 0x80e   : > { %v8579_v29 = vpop.f32.mrb[27].mxu1  ;;  %8617 = vmatprep.mubr.msk.f32.mxu1 %vm711_vm2, %v2822_v61  ;;  %5399 = vrot.lane.b32.xlu0 %v9699_v20, %s9441_s16 }
 0x80f   : > { %8618 = vmatmul.mubr.msk.f32.vlgmr.msra.gmra.mrb[34].mxu1 %vm711_vm2, %v10101_v63 }
 0x810   : > { %8630 = vmatpush3.msra.mxu1 %v10166_v62 }
 0x811   : > { %v2974_v30 = vpop.f32.mrb[28].mxu1  ;;  %5631 = vrot.lane.b32.xlu1 %v9702_v21, %s9440_s15  ;;  %8683 = vmatprep.subr.mxu1 %v9430_v14 }
 0x812   : > { %v8589_v32 = vpop.f32.mrb[29].mxu1  ;;  %8620 = vmatprep.mubr.msk.f32.mxu1 %vm711_vm2, %v2974_v30  ;;  %5397 = vrot.lane.b32.xlu0 %v9699_v20, %s9440_s15 }
 0x813   : > { %8621 = vmatmul.mubr.msk.f32.gmra.mrb[36].mxu1 %vm711_vm2, %v10103_v1  ;;  %v4339_v1 = vpop.permute.xlu1 %4338 }
 0x815   : > { %v3126_v33 = vpop.f32.mrb[30].mxu1 }
 0x816   : > { %v8599_v34 = vpop.f32.mrb[31].mxu1  ;;  %8623 = vmatprep.mubr.msk.f32.mxu1 %vm711_vm2, %v3126_v33  ;;  %5555 = vrot.lane.b32.xlu0 %v9705_v22, %s9441_s16  ;;  %s8009_s16 = sshll.u32 %s10825_s22, 3 }
 0x817   : > { %8624 = vmatmul.mubr.msk.f32.gmra.mrb[38].mxu1 %vm711_vm2, %v10105_v3  ;;  %v4643_v3 = vpop.permute.xlu0 %4642  ;;  %s565_s0 = scalar_lea.vmem %s10820_s29, %s8009_s16 }
 0x819   : > { %v3278_v63 = vpop.f32.mrb[32].mxu1 }
 0x81a   : > { %v8609_v62 = vpop.f32.mrb[33].mxu1  ;;  %8626 = vmatprep.mubr.msk.f32.mxu1 %vm711_vm2, %v3278_v63  ;;  %5553 = vrot.lane.b32.xlu0 %v9705_v22, %s9440_s15  ;;  %s10818_s15 = sld [smem:[#allocation12_spill]] }
 0x81b   : > { %8627 = vmatmul.mubr.msk.f32.gmra.mrb[40].mxu1 %vm711_vm2, %v10107_v5 }
 0x81c   : > { %8631 = vmatprep.mubr.msk.f32.mxu1 %vm711_vm2, %v9985_v35 }
 0x81f   : > { %8632 = vmatmul.mubr.msk.f32.vlgmr.msra.gmra.mrb[34].mxu1 %vm711_vm2, %v9879_v8  ;;  %v4491_v8 = vpop.permute.xlu1 %4490 }
 0x820   : > { %8684 = vmatpush3.msra.mxu1 %v4339_v1  ;;  %8634 = vmatprep.mubr.msk.f32.mxu1 %vm711_vm2, %v9988_v37 }
 0x821   : > { %8693 = vmatprep.subr.mxu1 %v9430_v14 }
 0x823   : > { %8635 = vmatmul.mubr.msk.f32.gmra.mrb[36].mxu1 %vm711_vm2, %v9887_v10  ;;  %v4567_v35 = vpop.permute.xlu1 %4566 }
 0x824   : > { %8637 = vmatprep.mubr.msk.f32.mxu1 %vm711_vm2, %v9997_v39 }
 0x827   : > { %8638 = vmatmul.mubr.msk.f32.gmra.mrb[38].mxu1 %vm711_vm2, %v9889_v12  ;;  %v4719_v37 = vpop.permute.xlu1 %4718 }
 0x828   : > { %8640 = vmatprep.mubr.msk.f32.mxu1 %vm711_vm2, %v9999_v41 }
 0x82b   : > { %8641 = vmatmul.mubr.msk.f32.gmra.mrb[40].mxu1 %vm711_vm2, %v9891_v25 }
 0x82c   : > { %8685 = vmatprep.mubr.msk.f32.mxu1 %vm9431_vm1, %v9430_v14 }
 0x855   : > { %v4300_v10 = vpop.xlane.xlu1 %4299 }
 0x856   : > { %9237 = vrcp.f32 %v4300_v10 }
 0x859   : > { %v4303_v5 = vpop.xlane.xlu0 %4302 }
 0x85a   : > { %9239 = vrcp.f32 %v4303_v5 }
 0x85d   : > { %v4306_v39 = vpop.xlane.xlu1 %4305 }
 0x85e   : > { %9241 = vrcp.f32 %v4306_v39 }
 0x860   : > { %v9238_v12 = vpop.eup %9237 }
 0x861   : > { %v4330_v36 = vmul.f32 %v9238_v12, %v10173_v48  ;;  %v4309_v41 = vpop.xlane.xlu0 %4308 }
 0x862   : > { %9243 = vrcp.f32 %v4309_v41 }
 0x863   : > { %8686 = vmatmul.mubr.msk.f32.vlgmr.msra.gmra.mrb[42].mxu1 %vm711_vm2, %v4330_v36 }
 0x864   : > { %v9240_v25 = vpop.eup %9239  ;;  %8694 = vmatpush3.msra.mxu1 %v4491_v8  ;;  %8695 = vmatprep.mubr.msk.f32.mxu1 %vm9431_vm1, %v9430_v14 }
 0x865   : > { %v4331_v40 = vmul.f32 %v9240_v25, %v10178_v53  ;;  %v4312_v42 = vpop.xlane.xlu1 %4311  ;;  %8703 = vmatprep.subr.mxu1 %v9430_v14 }
 0x866   : > { %9245 = vrcp.f32 %v4312_v42 }
 0x867   : > { %8691 = vmatmul.mubr.msk.f32.vlgmr.msra.gmra.mrb[54].mxu0 %vm711_vm2, %v4331_v40 }
 0x868   : > { %v9242_v43 = vpop.eup %9241  ;;  %8699 = vmatpush3.msra.mxu0 %v4567_v35  ;;  %8700 = vmatprep.mubr.msk.f32.mxu0 %vm9431_vm1, %v9430_v14 }
 0x869   : > { %v4332_v44 = vmul.f32 %v9242_v43, %v10183_v56  ;;  %v4315_v46 = vpop.xlane.xlu0 %4314  ;;  %8708 = vmatprep.subr.mxu0 %v9430_v14 }
 0x86a   : > { %9247 = vrcp.f32 %v4315_v46 }
 0x86b   : > { %8696 = vmatmul.mubr.msk.f32.vlgmr.msra.gmra.mrb[44].mxu1 %vm711_vm2, %v4332_v44 }
 0x86c   : > { %v9244_v48 = vpop.eup %9243  ;;  %8704 = vmatpush3.msra.mxu1 %v4643_v3  ;;  %8705 = vmatprep.mubr.msk.f32.mxu1 %vm9431_vm1, %v9430_v14 }
 0x86d   : > { %v4333_v50 = vmul.f32 %v9244_v48, %v10188_v52  ;;  %v4318_v51 = vpop.xlane.xlu1 %4317  ;;  %8713 = vmatprep.subr.mxu1 %v9430_v14 }
 0x86e   : > { %9249 = vrcp.f32 %v4318_v51 }
 0x86f   : > { %8701 = vmatmul.mubr.msk.f32.vlgmr.msra.gmra.mrb[56].mxu0 %vm711_vm2, %v4333_v50 }
 0x870   : > { %v9246_v9 = vpop.eup %9245  ;;  %8709 = vmatpush3.msra.mxu0 %v4719_v37  ;;  %8710 = vmatprep.mubr.msk.f32.mxu0 %vm9431_vm1, %v9430_v14 }
 0x871   : > { %v4334_v24 = vmul.f32 %v9246_v9, %v10192_v6  ;;  %v4871_v53 = vpop.permute.xlu1 %4870  ;;  %v4321_v54 = vpop.xlane.xlu0 %4320  ;;  %8718 = vmatprep.subr.mxu0 %v9430_v14 }
 0x872   : > { %9251 = vrcp.f32 %v4321_v54 }
 0x873   : > { %8706 = vmatmul.mubr.msk.f32.vlgmr.msra.gmra.mrb[46].mxu1 %vm711_vm2, %v4334_v24 }
 0x874   : > { %v9248_v31 = vpop.eup %9247  ;;  %8715 = vmatprep.mubr.msk.f32.mxu1 %vm9431_vm1, %v9430_v14 }
 0x875   : > { %v4335_v38 = vmul.f32 %v9248_v31, %v10197_v2  ;;  %v5086_v56 = vpop.permute.xlu1 %5085  ;;  %v4795_v45 = vpop.permute.xlu0 %4794 }
 0x876   : > { %8714 = vmatpush3.msra.mxu1 %v4795_v45 }
 0x877   : > { %8711 = vmatmul.mubr.msk.f32.vlgmr.msra.gmra.mrb[58].mxu0 %vm711_vm2, %v4335_v38  ;;  %8723 = vmatprep.subr.mxu1 %v4947_v55 }
 0x878   : > { %v9250_v60 = vpop.eup %9249  ;;  %8719 = vmatpush3.msra.mxu0 %v4871_v53  ;;  %8720 = vmatprep.mubr.msk.f32.mxu0 %vm9431_vm1, %v9430_v14 }
 0x879   : > { %v4336_v47 = vmul.f32 %v9250_v60, %v10201_v23  ;;  %v5164_v49 = vpop.permute.xlu1 %5163  ;;  %v5088_v52 = vpop.permute.xlu0 %5087  ;;  %8737 = vmatprep.subr.mxu0 %v9430_v14 }
 0x87b   : > { %8716 = vmatmul.mubr.msk.f32.vlgmr.msra.gmra.mrb[48].mxu1 %vm711_vm2, %v4336_v47 }
 0x87c   : > { %v9252_v57 = vpop.eup %9251  ;;  %8724 = vmatpush3.msra.mxu1 %v4947_v55 }
 0x87d   : > { %v4337_v0 = vmul.f32 %v9252_v57, %v10205_v27  ;;  %v5242_v4 = vpop.permute.xlu1 %5241  ;;  %8757 = vmatprep.subr.mxu1 %v9430_v14  ;;  %v5166_v58 = vpop.permute.xlu0 %5165 }
 0x87f   : > { %8721 = vmatmul.mubr.msk.f32.vlgmr.msra.gmra.mrb[60].mxu0 %vm711_vm2, %v4337_v0 }
 0x880   : > { %8738 = vmatpush3.xpose.msk.msra.mxu0 %vm711_vm2, %v5088_v52  ;;  %8739 = vmatprep.mubr.msk.f32.mxu0 %vm9431_vm1, %v9430_v14 }
 0x881   : > { %v5320_v6 = vpop.permute.xlu1 %5319  ;;  %8742 = vmatprep.subr.mxu0 %v9430_v14  ;;  %v5244_v59 = vpop.permute.xlu0 %5243 }
 0x883   : > { %8740 = vmatmul.mubr.msk.f32.vlgmr.msra.gmra.mrb[62].mxu0 %vm711_vm2, %v5086_v56 }
 0x884   : > { %8743 = vmatpush3.xpose.msk.msra.mxu0 %vm711_vm2, %v5166_v58  ;;  %8744 = vmatprep.mubr.msk.f32.mxu0 %vm9431_vm1, %v9430_v14 }
 0x885   : > { %v5478_v7 = vpop.permute.xlu1 %5477  ;;  %8747 = vmatprep.subr.mxu0 %v9430_v14  ;;  %v5322_v2 = vpop.permute.xlu0 %5321 }
 0x887   : > { %8745 = vmatmul.mubr.msk.f32.vlgmr.msra.gmra.mrb[64].mxu0 %vm711_vm2, %v5164_v49 }
 0x888   : > { %8748 = vmatpush3.xpose.msk.msra.mxu0 %vm711_vm2, %v5244_v59  ;;  %8749 = vmatprep.mubr.msk.f32.mxu0 %vm9431_vm1, %v9430_v14 }
 0x889   : > { %8752 = vmatprep.subr.mxu0 %v9430_v14  ;;  %v5476_v11 = vpop.permute.xlu1 %5475  ;;  %v5400_v61 = vpop.permute.xlu0 %5399 }
 0x88b   : > { %8750 = vmatmul.mubr.msk.f32.vlgmr.msra.gmra.mrb[66].mxu0 %vm711_vm2, %v5242_v4 }
 0x88c   : > { %8753 = vmatpush3.xpose.msk.msra.mxu0 %vm711_vm2, %v5322_v2  ;;  %8754 = vmatprep.mubr.msk.f32.mxu0 %vm9431_vm1, %v9430_v14 }
 0x88d   : > { %8762 = vmatprep.subr.mxu0 %v9430_v14  ;;  %v5634_v13 = vpop.permute.xlu1 %5633  ;;  %v5398_v35 = vpop.permute.xlu0 %5397 }
 0x88f   : > { %8755 = vmatmul.mubr.msk.f32.vlgmr.msra.gmra.mrb[68].mxu0 %vm711_vm2, %v5320_v6 }
 0x890   : > { %8763 = vmatpush3.xpose.msk.msra.mxu0 %vm711_vm2, %v5478_v7  ;;  %8764 = vmatprep.mubr.msk.f32.mxu0 %vm9431_vm1, %v9430_v14 }
 0x891   : > { %8772 = vmatprep.subr.mxu0 %v9430_v14  ;;  %v5632_v23 = vpop.permute.xlu1 %5631  ;;  %v5556_v39 = vpop.permute.xlu0 %5555 }
 0x893   : > { %8765 = vmatmul.mubr.msk.f32.vlgmr.msra.gmra.mrb[70].mxu0 %vm711_vm2, %v5476_v11 }
 0x894   : > { %8773 = vmatpush3.xpose.msk.msra.mxu0 %vm711_vm2, %v5634_v13  ;;  %8774 = vmatprep.mubr.msk.f32.mxu0 %vm9431_vm1, %v9430_v14 }
 0x895   : > { %8782 = vmatprep.subr.mxu0 %v9430_v14  ;;  %v5554_v40 = vpop.permute.xlu0 %5553 }
 0x897   : > { %8775 = vmatmul.mubr.msk.f32.vlgmr.msra.gmra.mrb[72].mxu0 %vm711_vm2, %v5632_v23 }
 0x898   : > { %8784 = vmatprep.mubr.msk.f32.mxu0 %vm9431_vm1, %v9430_v14 }
 0x936   : > { %v4410_v26 = vpop.f32.mrb[42].mxu1 }
 0x937   : > { %v8687_v27 = vpop.f32.mrb[43].mxu1  ;;  %8725 = vmatprep.mubr.msk.f32.mxu1 %vm711_vm2, %v4410_v26 }
 0x93a   : > { %v4486_v28 = vpop.f32.mrb[54].mxu0 }
 0x93b   : > { %v8692_v29 = vpop.f32.mrb[55].mxu0  ;;  %8726 = vmatmul.mubr.msk.f32.vlgmr.msra.gmra.mrb[34].mxu1 %vm711_vm2, %v4486_v28 }
 0x93c   : > { %8758 = vmatpush3.xpose.msk.msra.mxu1 %vm711_vm2, %v5400_v61 }
 0x93d   : > { %8767 = vmatprep.subr.mxu1 %v9430_v14 }
 0x93e   : > { %v4562_v30 = vpop.f32.mrb[44].mxu1 }
 0x93f   : > { %v8697_v32 = vpop.f32.mrb[45].mxu1  ;;  %8728 = vmatprep.mubr.msk.f32.mxu1 %vm711_vm2, %v4562_v30 }
 0x942   : > { %v4638_v33 = vpop.f32.mrb[56].mxu0 }
 0x943   : > { %v8702_v34 = vpop.f32.mrb[57].mxu0  ;;  %8729 = vmatmul.mubr.msk.f32.gmra.mrb[36].mxu1 %vm711_vm2, %v4638_v33 }
 0x946   : > { %v4714_v63 = vpop.f32.mrb[46].mxu1 }
 0x947   : > { %v8707_v62 = vpop.f32.mrb[47].mxu1  ;;  %8731 = vmatprep.mubr.msk.f32.mxu1 %vm711_vm2, %v4714_v63 }
 0x94a   : > { %v4790_v1 = vpop.f32.mrb[58].mxu0 }
 0x94b   : > { %v8712_v8 = vpop.f32.mrb[59].mxu0  ;;  %8732 = vmatmul.mubr.msk.f32.gmra.mrb[38].mxu1 %vm711_vm2, %v4790_v1 }
 0x94e   : > { %v4866_v37 = vpop.f32.mrb[48].mxu1 }
 0x94f   : > { %v8717_v3 = vpop.f32.mrb[49].mxu1  ;;  %8734 = vmatprep.mubr.msk.f32.mxu1 %vm711_vm2, %v4866_v37 }
 0x952   : > { %v4942_v10 = vpop.f32.mrb[60].mxu0 }
 0x953   : > { %v8722_v5 = vpop.f32.mrb[61].mxu0  ;;  %8735 = vmatmul.mubr.msk.f32.gmra.mrb[40].mxu1 %vm711_vm2, %v4942_v10 }
 0x954   : > { %8759 = vmatprep.mubr.msk.f32.mxu1 %vm9431_vm1, %v9430_v14 }
 0x956   : > { %v5159_v12 = vpop.f32.mrb[62].mxu0 }
 0x957   : > { %v10348_v36 = vmul.f32 0.17677669, %v5159_v12  ;;  %v8741_v41 = vpop.f32.mrb[63].mxu0  ;;  %8760 = vmatmul.mubr.msk.f32.vlgmr.msra.gmra.mrb[50].mxu1 %vm711_vm2, %v5398_v35 }
 0x958   : > { %8768 = vmatpush3.xpose.msk.msra.mxu1 %vm711_vm2, %v5556_v39  ;;  %8769 = vmatprep.mubr.msk.f32.mxu1 %vm9431_vm1, %v9430_v14 }
 0x959   : > { %v5717_v25 = vsel %vm711_vm2, %v10348_v36, -inf  ;;  %8777 = vmatprep.subr.mxu1 %v9430_v14 }
 0x95a   : > { %5718 = vmax.xlane.f32.xlu0 %v5717_v25  ;;  %v5237_v42 = vpop.f32.mrb[64].mxu0 }
 0x95b   : > { %v5710_v43 = vmul.f32 0.17677669, %v5237_v42  ;;  %v8746_v44 = vpop.f32.mrb[65].mxu0  ;;  %8770 = vmatmul.mubr.msk.f32.vlgmr.msra.gmra.mrb[52].mxu1 %vm711_vm2, %v5554_v40 }
 0x95c   : > { %8779 = vmatprep.mubr.msk.f32.mxu1 %vm9431_vm1, %v9430_v14 }
 0x95d   : > { %v5720_v46 = vsel %vm711_vm2, %v5710_v43, -inf }
 0x95e   : > { %5721 = vmax.xlane.f32.xlu1 %v5720_v46  ;;  %v5315_v48 = vpop.f32.mrb[66].mxu0 }
 0x95f   : > { %v5711_v50 = vmul.f32 0.17677669, %v5315_v48  ;;  %v8751_v51 = vpop.f32.mrb[67].mxu0 }
 0x961   : > { %v5723_v9 = vsel %vm711_vm2, %v5711_v50, -inf }
 0x962   : > { %5724 = vmax.xlane.f32.xlu0 %v5723_v9  ;;  %v5393_v24 = vpop.f32.mrb[68].mxu0 }
 0x963   : > { %v5712_v53 = vmul.f32 0.17677669, %v5393_v24  ;;  %v8756_v54 = vpop.f32.mrb[69].mxu0 }
 0x965   : > { %v5726_v31 = vsel %vm711_vm2, %v5712_v53, -inf }
 0x966   : > { %5727 = vmax.xlane.f32.xlu0 %v5726_v31  ;;  %v5549_v55 = vpop.f32.mrb[70].mxu0 }
 0x967   : > { %v5714_v38 = vmul.f32 0.17677669, %v5549_v55  ;;  %v8766_v56 = vpop.f32.mrb[71].mxu0 }
 0x969   : > { %v5732_v45 = vsel %vm711_vm2, %v5714_v38, -inf }
 0x96a   : > { %5733 = vmax.xlane.f32.xlu0 %v5732_v45  ;;  %v5705_v60 = vpop.f32.mrb[72].mxu0 }
 0x96b   : > { %v5716_v47 = vmul.f32 0.17677669, %v5705_v60  ;;  %v8776_v49 = vpop.f32.mrb[73].mxu0 }
 0x96d   : > { %v5738_v52 = vsel %vm711_vm2, %v5716_v47, -inf }
 0x96e   : > { %5739 = vmax.xlane.f32.xlu0 %v5738_v52 }
 0x9e7   : > { %v5719_v57 = vpop.xlane.xlu0 %5718 }
 0x9e8   : > { %v5741_v1 = vsub.f32 %v10348_v36, %v5719_v57 }
 0x9ea   : > { %v5749_v8 = vmul.f32 1.442695, %v5741_v1 }
 0x9eb   : > { %v5722_v0 = vpop.xlane.xlu1 %5721 }
 0x9ec   : > { %v5742_v4 = vsub.f32 %v5710_v43, %v5722_v0 }
 0x9ee   : > { %v5751_v58 = vmul.f32 1.442695, %v5742_v4 }
 0x9ef   : > { %v5725_v6 = vpop.xlane.xlu0 %5724 }
 0x9f0   : > { %9253 = vpow2.f32 %v5751_v58  ;;  %v5743_v35 = vsub.f32 %v5711_v50, %v5725_v6 }
 0x9f2   : > { %v5753_v37 = vmul.f32 1.442695, %v5743_v35 }
 0x9f3   : > { %v5728_v59 = vpop.xlane.xlu0 %5727 }
 0x9f4   : > { %v5744_v7 = vsub.f32 %v5712_v53, %v5728_v59 }
 0x9f6   : > { %v5755_v11 = vmul.f32 1.442695, %v5744_v7 }
 0x9f7   : > { %v5734_v2 = vpop.xlane.xlu0 %5733 }
 0x9f8   : > { %9255 = vpow2.f32 %v5755_v11  ;;  %v5746_v13 = vsub.f32 %v5714_v38, %v5734_v2 }
 0x9fa   : > { %v9254_v23 = vpop.eup %9253  ;;  %v5759_v26 = vmul.f32 1.442695, %v5746_v13 }
 0x9fb   : > { %v5740_v27 = vpop.xlane.xlu0 %5739  ;;  %v5768_v28 = vsel %vm711_vm2, %v9254_v23, 0.0 }
 0x9fc   : > { %9257 = vpow2.f32 %v5759_v26  ;;  %v5748_v61 = vsub.f32 %v5716_v47, %v5740_v27  ;;  %5769 = vadd.xlane.f32.xlu0 %v5768_v28 }
 0x9fe   : > { %v5763_v29 = vmul.f32 1.442695, %v5748_v61 }
 0xa00   : > { %9259 = vpow2.f32 %v5763_v29  ;;  %v6414_v29 = vld [vmem:[#allocation3 + $0x18] sm:$0xff] }
 0xa01   : > { %9261 = vpow2.f32 %v5749_v8 }
 0xa02   : > { %v10366_v30 = vpop.eup %9255  ;;  %9263 = vpow2.f32 %v5753_v37 }
 0xa03   : > { %v5774_v32 = vsel %vm711_vm2, %v10366_v30, 0.0 }
 0xa04   : > { %5775 = vadd.xlane.f32.xlu0 %v5774_v32 }
 0xa06   : > { %v10370_v33 = vpop.eup %9257 }
 0xa07   : > { %v5780_v34 = vsel %vm711_vm2, %v10370_v33, 0.0 }
 0xa08   : > { %5781 = vadd.xlane.f32.xlu0 %v5780_v34 }
 0xa0a   : > { %v10374_v63 = vpop.eup %9259 }
 0xa0b   : > { %v5786_v62 = vsel %vm711_vm2, %v10374_v63, 0.0  ;;  %v9262_v25 = vpop.eup %9261 }
 0xa0c   : > { %5787 = vadd.xlane.f32.xlu0 %v5786_v62  ;;  %v9264_v40 = vpop.eup %9263 }
 0xa0d   : > { %v5771_v42 = vsel %vm711_vm2, %v9264_v40, 0.0 }
 0xa22   : > { %5881 = vrot.lane.b32.xlu0 %v9685_v15, %s9442_s21 }
 0xa26   : > { %6109 = vrot.lane.b32.xlu0 %v9699_v20, %s9442_s21  ;;  %v5765_v20 = vsel %vm711_vm2, %v9262_v25, 0.0 }
 0xa2a   : > { %v5471_v3 = vpop.f32.mrb[50].mxu1  ;;  %6261 = vrot.lane.b32.xlu0 %v9705_v22, %s9442_s21 }
 0xa2b   : > { %v5713_v10 = vmul.f32 0.17677669, %v5471_v3  ;;  %v8761_v5 = vpop.f32.mrb[51].mxu1 }
 0xa2d   : > { %v5729_v39 = vsel %vm711_vm2, %v5713_v10, -inf }
 0xa2e   : > { %v5627_v12 = vpop.f32.mrb[52].mxu1  ;;  %5730 = vmax.xlane.f32.xlu1 %v5729_v39 }
 0xa2f   : > { %v5715_v36 = vmul.f32 0.17677669, %v5627_v12  ;;  %v8771_v15 = vpop.f32.mrb[53].mxu1 }
 0xa31   : > { %v5735_v41 = vsel %vm711_vm2, %v5715_v36, -inf }
 0xa32   : > { %5736 = vmax.xlane.f32.xlu1 %v5735_v41 }
 0xa36   : > { %5766 = vadd.xlane.f32.xlu1 %v5765_v20 }
 0xa3a   : > { %5772 = vadd.xlane.f32.xlu1 %v5771_v42 }
 0xa4b   : > { %5805 = vrot.lane.b32.xlu1 %v9688_v16, %s9442_s21 }
 0xa4f   : > { %5957 = vrot.lane.b32.xlu1 %v9693_v18, %s9442_s21 }
 0xa53   : > { %6033 = vrot.lane.b32.xlu1 %v9691_v17, %s9442_s21 }
 0xa57   : > { %6185 = vrot.lane.b32.xlu1 %v9697_v19, %s9442_s21 }
 0xa89   : > { %v5770_v22 = vpop.xlane.xlu0 %5769 }
 0xa8a   : > { %9265 = vrcp.f32 %v5770_v22 }
 0xa91   : > { %v5776_v43 = vpop.xlane.xlu0 %5775 }
 0xa94   : > { %v9266_v48 = vpop.eup %9265 }
 0xa95   : > { %v5782_v44 = vpop.xlane.xlu0 %5781  ;;  %v5798_v50 = vmul.f32 %v9266_v48, %v9254_v23 }
 0xa99   : > { %v5788_v46 = vpop.xlane.xlu0 %5787 }
 0xa9d   : > { %v5882_v51 = vpop.permute.xlu0 %5881 }
 0xa9e   : > { %8783 = vmatpush3.msra.mxu0 %v5882_v51 }
 0xa9f   : > { %8785 = vmatmul.mubr.msk.f32.vlgmr.msra.gmra.mrb[74].mxu0 %vm711_vm2, %v5798_v50  ;;  %8792 = vmatprep.subr.mxu0 %v9430_v14 }
 0xaa0   : > { %8794 = vmatprep.mubr.msk.f32.mxu0 %vm9431_vm1, %v9430_v14 }
 0xaa1   : > { %v6110_v59 = vpop.permute.xlu0 %6109 }
 0xabb   : > { %v5731_v16 = vpop.xlane.xlu1 %5730 }
 0xabc   : > { %v5745_v17 = vsub.f32 %v5713_v10, %v5731_v16 }
 0xabe   : > { %v5757_v18 = vmul.f32 1.442695, %v5745_v17 }
 0xabf   : > { %v5737_v19 = vpop.xlane.xlu1 %5736 }
 0xac0   : > { %9267 = vpow2.f32 %v5757_v18  ;;  %v5747_v9 = vsub.f32 %v5715_v36, %v5737_v19 }
 0xac2   : > { %v5761_v24 = vmul.f32 1.442695, %v5747_v9  ;;  %v9319_v9 = vld [vmem:[%s9649_s19 + $0x10] sm:$0xff] }
 0xac3   : > { %v5767_v53 = vpop.xlane.xlu1 %5766 }
 0xac4   : > { %9269 = vpow2.f32 %v5761_v24 }
 0xac5   : > { %9271 = vrcp.f32 %v5767_v53  ;;  %v9320_v53 = vld [vmem:[%s9649_s19 + $0x18] sm:$0xff] }
 0xac6   : > { %9273 = vrcp.f32 %v5776_v43  ;;  %v9317_v43 = vld [vmem:[%s9649_s19 + $0x8] sm:$0xff] }
 0xac7   : > { %v5773_v54 = vpop.xlane.xlu1 %5772 }
 0xac8   : > { %9275 = vrcp.f32 %v5773_v54 }
 0xac9   : > { %9277 = vrcp.f32 %v5782_v44 }
 0xaca   : > { %v9268_v31 = vpop.eup %9267  ;;  %9279 = vrcp.f32 %v5788_v46  ;;  %v9318_v46 = vld [vmem:[%s9649_s19] sm:$0xff] }
 0xacb   : > { %v5806_v55 = vpop.permute.xlu1 %5805  ;;  %v5777_v38 = vsel %vm711_vm2, %v9268_v31, 0.0 }
 0xacc   : > { %5778 = vadd.xlane.f32.xlu1 %v5777_v38  ;;  %8778 = vmatpush3.msra.mxu1 %v5806_v55 }
 0xacd   : > { %8787 = vmatprep.subr.mxu1 %v9430_v14 }
 0xace   : > { %v9270_v56 = vpop.eup %9269 }
 0xacf   : > { %v9272_v45 = vpop.eup %9271  ;;  %v5958_v60 = vpop.permute.xlu1 %5957  ;;  %v5783_v47 = vsel %vm711_vm2, %v9270_v56, 0.0 }
 0xad0   : > { %v9274_v49 = vpop.eup %9273  ;;  %v5797_v52 = vmul.f32 %v9272_v45, %v9262_v25  ;;  %5784 = vadd.xlane.f32.xlu1 %v5783_v47  ;;  %v8146_v25 = vld [vmem:[%s10787_s3] ss:$0 sm:$0xff] }
 0xad1   : > { %v5800_v0 = vmul.f32 %v9274_v49, %v10366_v30  ;;  %v6262_v30 = vpop.permute.xlu0 %6261 }
 0xad2   : > { %v9276_v57 = vpop.eup %9275  ;;  %8780 = vmatmul.mubr.msk.f32.vlgmr.msra.gmra.mrb[54].mxu1 %vm711_vm2, %v5797_v52 }
 0xad3   : > { %v5799_v4 = vmul.f32 %v9276_v57, %v9264_v40  ;;  %8788 = vmatpush3.msra.mxu1 %v5958_v60  ;;  %v6034_v58 = vpop.permute.xlu1 %6033  ;;  %8789 = vmatprep.mubr.msk.f32.mxu1 %vm9431_vm1, %v9430_v14  ;;  %v9278_v6 = vpop.eup %9277 }
 0xad4   : > { %8793 = vmatpush3.msra.mxu0 %v6034_v58  ;;  %8797 = vmatprep.subr.mxu1 %v9430_v14  ;;  %v5802_v7 = vmul.f32 %v9278_v6, %v10370_v33  ;;  %v9280_v23 = vpop.eup %9279  ;;  %v9322_v6 = vld [vmem:[%s9649_s19 + $0x20] sm:$0xff] }
 0xad5   : > { %8795 = vmatmul.mubr.msk.f32.vlgmr.msra.gmra.mrb[76].mxu0 %vm711_vm2, %v5800_v0  ;;  %8802 = vmatprep.subr.mxu0 %v9430_v14  ;;  %v5804_v26 = vmul.f32 %v9280_v23, %v10374_v63  ;;  %v9321_v0 = vld [vmem:[%s9649_s19 + $0x28] sm:$0xff] }
 0xad6   : > { %8790 = vmatmul.mubr.msk.f32.vlgmr.msra.gmra.mrb[56].mxu1 %vm711_vm2, %v5799_v4  ;;  %8804 = vmatprep.mubr.msk.f32.mxu0 %vm9431_vm1, %v9430_v14 }
 0xad7   : > { %8798 = vmatpush3.msra.mxu1 %v6110_v59  ;;  %v6186_v11 = vpop.permute.xlu1 %6185  ;;  %8799 = vmatprep.mubr.msk.f32.mxu1 %vm9431_vm1, %v9430_v14 }
 0xad8   : > { %8803 = vmatpush3.msra.mxu0 %v6186_v11  ;;  %8807 = vmatprep.subr.mxu1 %v9430_v14 }
 0xad9   : > { %8805 = vmatmul.mubr.msk.f32.vlgmr.msra.gmra.mrb[78].mxu0 %vm711_vm2, %v5802_v7  ;;  %8812 = vmatprep.subr.mxu0 %v9430_v14 }
 0xada   : > { %8814 = vmatprep.mubr.msk.f32.mxu0 %vm9431_vm1, %v9430_v14 }
 0xae1   : > { %6337 = vrot.lane.b32.xlu1 %v9702_v21, %s9442_s21 }
 0xb59   : > { %v5779_v2 = vpop.xlane.xlu1 %5778 }
 0xb5a   : > { %9281 = vrcp.f32 %v5779_v2 }
 0xb5d   : > { %v5785_v13 = vpop.xlane.xlu1 %5784 }
 0xb5e   : > { %9283 = vrcp.f32 %v5785_v13 }
 0xb61   : > { %v6338_v27 = vpop.permute.xlu1 %6337 }
 0xb62   : > { %8813 = vmatpush3.msra.mxu0 %v6338_v27 }
 0xb63   : > { %8815 = vmatmul.mubr.msk.f32.vlgmr.msra.gmra.mrb[80].mxu0 %vm711_vm2, %v5804_v26 }
 0xb64   : > { %v9282_v28 = vpop.eup %9281 }
 0xb65   : > { %v5801_v61 = vmul.f32 %v9282_v28, %v9268_v31 }
 0xb67   : > { %8800 = vmatmul.mubr.msk.f32.vlgmr.msra.gmra.mrb[58].mxu1 %vm711_vm2, %v5801_v61 }
 0xb68   : > { %v9284_v32 = vpop.eup %9283  ;;  %8808 = vmatpush3.msra.mxu1 %v6262_v30  ;;  %8809 = vmatprep.mubr.msk.f32.mxu1 %vm9431_vm1, %v9430_v14 }
 0xb69   : > { %v5803_v21 = vmul.f32 %v9284_v32, %v9270_v56  ;;  %8817 = vmatprep.subr.mxu1 %v6414_v29 }
 0xb6b   : > { %8810 = vmatmul.mubr.msk.f32.vlgmr.msra.gmra.mrb[60].mxu1 %vm711_vm2, %v5803_v21  ;;  %v9324_v21 = vld [vmem:[%s9649_s19 + $0x30] sm:$0xff] }
 0xb6c   : > { %8818 = vmatpush3.msra.mxu1 %v6414_v29  ;;  %v9323_v29 = vld [vmem:[%s9649_s19 + $0x38] sm:$0xff] }
 0xb72   : > { %v5953_v33 = vpop.f32.mrb[74].mxu0 }
 0xb73   : > { %v8786_v34 = vpop.f32.mrb[75].mxu0 }
 0xba5   : > { %v5877_v63 = vpop.f32.mrb[54].mxu1 }
 0xba6   : > { %v8781_v62 = vpop.f32.mrb[55].mxu1  ;;  %8819 = vmatprep.mubr.msk.f32.mxu1 %vm711_vm2, %v5877_v63 }
 0xba7   : > { %8820 = vmatmul.mubr.msk.f32.vlgmr.msra.gmra.mrb[34].mxu1 %vm711_vm2, %v5953_v33 }
 0xba8   : > { %v6105_v1 = vpop.f32.mrb[76].mxu0 }
 0xba9   : > { %v6029_v8 = vpop.f32.mrb[56].mxu1  ;;  %v8796_v35 = vpop.f32.mrb[77].mxu0 }
 0xbaa   : > { %v8791_v37 = vpop.f32.mrb[57].mxu1  ;;  %8822 = vmatprep.mubr.msk.f32.mxu1 %vm711_vm2, %v6029_v8 }
 0xbab   : > { %8823 = vmatmul.mubr.msk.f32.gmra.mrb[36].mxu1 %vm711_vm2, %v6105_v1 }
 0xbac   : > { %v6257_v3 = vpop.f32.mrb[78].mxu0 }
 0xbad   : > { %v8806_v10 = vpop.f32.mrb[79].mxu0 }
 0xc36   : > { %v6409_v5 = vpop.f32.mrb[80].mxu0 }
 0xc37   : > { %v8816_v39 = vpop.f32.mrb[81].mxu0 }
 0xc3a   : > { %v6181_v12 = vpop.f32.mrb[58].mxu1 }
 0xc3b   : > { %v8801_v36 = vpop.f32.mrb[59].mxu1  ;;  %8825 = vmatprep.mubr.msk.f32.mxu1 %vm711_vm2, %v6181_v12 }
 0xc3c   : > { %8826 = vmatmul.mubr.msk.f32.gmra.mrb[38].mxu1 %vm711_vm2, %v6257_v3 }
 0xc3e   : > { %v6333_v15 = vpop.f32.mrb[60].mxu1 }
 0xc3f   : > { %v8811_v41 = vpop.f32.mrb[61].mxu1  ;;  %8828 = vmatprep.mubr.msk.f32.mxu1 %vm711_vm2, %v6333_v15  ;;  %v6710_v15 = vld [vmem:[#allocation5] sm:$0xff] }
 0xc40   : > { %8829 = vmatmul.mubr.msk.f32.gmra.mrb[40].mxu1 %vm711_vm2, %v6409_v5  ;;  %v6711_v41 = vld [vmem:[#allocation5 + $0x8] sm:$0xff] }
 0xc7a   : > { %v8821_v20 = vpop.f32.mrb[34].mxu1 }
 0xc7b   : > { %v6560_v40 = vadd.f32 %v8821_v20, %v8146_v25  ;;  %v6505_v42 = vpop.f32.mrb[35].mxu1  ;;  %v6712_v20 = vld [vmem:[#allocation5 + $0x10] sm:$0xff] }
 0xc7c   : > { %v6559_v22 = vadd.f32 %v8146_v25, %v6505_v42 }
 0xc7d   : > { %v6568_v44 = vadd.f32 %v9317_v43, %v6560_v40  ;;  %v6713_v40 = vld [vmem:[#allocation5 + $0x18] sm:$0xff] }
 0xc7e   : > { %v6567_v48 = vadd.f32 %v9318_v46, %v6559_v22  ;;  %v8824_v50 = vpop.f32.mrb[36].mxu1  ;;  %v8998_v42 = vpack.c.bf16 %v6713_v40, %v6712_v20  ;;  %v6865_v20 = vld [vmem:[%s10792_s8 + $0x38] sm:$0xff] }
 0xc7f   : > { %v6515_v51 = vpop.f32.mrb[37].mxu1  ;;  %v6580_v16 = vsel %vm578_vm0, %v6568_v44, 0.0  ;;  %v6562_v17 = vadd.f32 %v8824_v50, %v8146_v25 }
 0xc80   : > { %v6561_v18 = vadd.f32 %v8146_v25, %v6515_v51  ;;  %6581 = vadd.xlane.f32.xlu1 %v6580_v16  ;;  %v6577_v19 = vsel %vm578_vm0, %v6567_v48, 0.0 }
 0xc81   : > { %6578 = vadd.xlane.f32.xlu0 %v6577_v19  ;;  %v6570_v54 = vadd.f32 %v9320_v53, %v6562_v17 }
 0xc82   : > { %v6569_v24 = vadd.f32 %v9319_v9, %v6561_v18 }
 0xc83   : > { %v6586_v55 = vsel %vm578_vm0, %v6570_v54, 0.0 }
 0xc84   : > { %v6583_v31 = vsel %vm578_vm0, %v6569_v24, 0.0 }
 0xc85   : > { %6584 = vadd.xlane.f32.xlu0 %v6583_v31 }
 0xc89   : > { %6587 = vadd.xlane.f32.xlu0 %v6586_v55 }
 0xd0d   : > { %v6582_v38 = vpop.xlane.xlu1 %6581 }
 0xd0e   : > { %v6579_v56 = vpop.xlane.xlu0 %6578  ;;  %v6603_v60 = vmul.f32 0.03125, %v6582_v38 }
 0xd0f   : > { %v8827_v45 = vpop.f32.mrb[38].mxu1  ;;  %v6602_v52 = vmul.f32 0.03125, %v6579_v56 }
 0xd10   : > { %v6564_v47 = vadd.f32 %v8827_v45, %v8146_v25  ;;  %v6525_v49 = vpop.f32.mrb[39].mxu1  ;;  %v10451_v11 = vsub.f32 %v6568_v44, %v6603_v60 }
 0xd11   : > { %v6563_v57 = vadd.f32 %v8146_v25, %v6525_v49  ;;  %v10454_v26 = vsub.f32 %v6567_v48, %v6602_v52 }
 0xd12   : > { %v6572_v4 = vadd.f32 %v9321_v0, %v6564_v47  ;;  %v6585_v58 = vpop.xlane.xlu0 %6584  ;;  %v6619_v62 = vmul.f32 %v10451_v11, %v10451_v11 }
 0xd13   : > { %v6571_v59 = vadd.f32 %v9322_v6, %v6563_v57  ;;  %v8830_v7 = vpop.f32.mrb[40].mxu1  ;;  %v6604_v27 = vmul.f32 0.03125, %v6585_v58  ;;  %v6618_v37 = vmul.f32 %v10454_v26, %v10454_v26 }
 0xd14   : > { %v6566_v2 = vadd.f32 %v8830_v7, %v8146_v25  ;;  %v6535_v13 = vpop.f32.mrb[41].mxu1  ;;  %v6592_v23 = vsel %vm578_vm0, %v6572_v4, 0.0  ;;  %v6629_v3 = vsel %vm578_vm0, %v6619_v62, 0.0 }
 0xd15   : > { %v6565_v28 = vadd.f32 %v8146_v25, %v6535_v13  ;;  %6593 = vadd.xlane.f32.xlu0 %v6592_v23  ;;  %v6589_v61 = vsel %vm578_vm0, %v6571_v59, 0.0  ;;  %v10462_v1 = vsub.f32 %v6569_v24, %v6604_v27  ;;  %v6626_v5 = vsel %vm578_vm0, %v6618_v37, 0.0  ;;  %v10500_v23 = vld [vmem:[%s10788_s4] ss:$0 sm:$0xff] }
 0xd16   : > { %v6574_v30 = vadd.f32 %v9323_v29, %v6566_v2  ;;  %v6588_v32 = vpop.xlane.xlu0 %6587  ;;  %6590 = vadd.xlane.f32.xlu1 %v6589_v61  ;;  %v8994_v25 = vpack.c.bf16 %v6711_v41, %v6710_v15  ;;  %v10507_v29 = vld [vmem:[%s10789_s5] ss:$0 sm:$0xff]  ;;  %v6863_v15 = vld [vmem:[%s10792_s8 + $0x28] sm:$0xff] }
 0xd17   : > { %v6573_v33 = vadd.f32 %v9324_v21, %v6565_v28  ;;  %v6605_v34 = vmul.f32 0.03125, %v6588_v32  ;;  %v6620_v39 = vmul.f32 %v10462_v1, %v10462_v1 }
 0xd18   : > { %v6598_v63 = vsel %vm578_vm0, %v6574_v30, 0.0  ;;  %8995 = vmatprep.subr.bf16.mxu0 %v8994_v25 }
 0xd19   : > { %v10464_v8 = vsub.f32 %v6570_v54, %v6605_v34  ;;  %6599 = vadd.xlane.f32.xlu0 %v6598_v63  ;;  %v6595_v35 = vsel %vm578_vm0, %v6573_v33, 0.0  ;;  %v6632_v36 = vsel %vm578_vm0, %v6620_v39, 0.0  ;;  %8997 = vmatpush3.bf16.msra.mxu0 %v8994_v25  ;;  %v6861_v39 = vld [vmem:[%s10792_s8 + $0x18] sm:$0xff]  ;;  %v6864_v25 = vld [vmem:[%s10792_s8 + $0x30] sm:$0xff] }
 0xd1a   : > { %6596 = vadd.xlane.f32.xlu1 %v6595_v35  ;;  %8999 = vmatprep.subr.bf16.mxu0 %v8998_v42  ;;  %v9014_v40 = vpack.c.bf16 %v6865_v20, %v6864_v25 }
 0xd1b   : > { %v6621_v10 = vmul.f32 %v10464_v8, %v10464_v8 }
 0xd1d   : > { %6630 = vadd.xlane.f32.xlu0 %v6629_v3  ;;  %v6635_v12 = vsel %vm578_vm0, %v6621_v10, 0.0  ;;  %9001 = vmatpush3.bf16.msra.mxu0 %v8998_v42  ;;  %v6859_v3 = vld [vmem:[%s10792_s8 + $0x8] sm:$0xff]  ;;  %v6860_v10 = vld [vmem:[%s10792_s8 + $0x10] sm:$0xff] }
 0xd1e   : > { %6627 = vadd.xlane.f32.xlu1 %v6626_v5 }
 0xd21   : > { %6636 = vadd.xlane.f32.xlu0 %v6635_v12  ;;  %v9006_v12 = vpack.c.bf16 %v6861_v39, %v6860_v10 }
 0xd22   : > { %6633 = vadd.xlane.f32.xlu1 %v6632_v36  ;;  %v6862_v36 = vld [vmem:[%s10792_s8 + $0x20] sm:$0xff] }
 0xd23   : > { %v9010_v41 = vpack.c.bf16 %v6863_v15, %v6862_v36  ;;  %v8158_v36 = vld [vmem:[%s10793_s9] ss:$0 sm:$0xff] }
 0xda2   : > { %v6594_v22 = vpop.xlane.xlu0 %6593 }
 0xda3   : > { %v6607_v43 = vmul.f32 0.03125, %v6594_v22  ;;  %v6591_v44 = vpop.xlane.xlu1 %6590 }
 0xda4   : > { %v6606_v46 = vmul.f32 0.03125, %v6591_v44 }
 0xda5   : > { %v10477_v48 = vsub.f32 %v6572_v4, %v6607_v43 }
 0xda6   : > { %v10479_v50 = vsub.f32 %v6571_v59, %v6606_v46  ;;  %v6600_v51 = vpop.xlane.xlu0 %6599 }
 0xda7   : > { %v6609_v16 = vmul.f32 0.03125, %v6600_v51  ;;  %v6597_v17 = vpop.xlane.xlu1 %6596  ;;  %v6623_v18 = vmul.f32 %v10477_v48, %v10477_v48 }
 0xda8   : > { %v6608_v19 = vmul.f32 0.03125, %v6597_v17  ;;  %v6622_v9 = vmul.f32 %v10479_v50, %v10479_v50 }
 0xda9   : > { %v10485_v24 = vsub.f32 %v6574_v30, %v6609_v16  ;;  %v6641_v53 = vsel %vm578_vm0, %v6623_v18, 0.0 }
 0xdaa   : > { %v10488_v54 = vsub.f32 %v6573_v33, %v6608_v19  ;;  %6642 = vadd.xlane.f32.xlu0 %v6641_v53  ;;  %v6631_v31 = vpop.xlane.xlu0 %6630  ;;  %v6638_v55 = vsel %vm578_vm0, %v6622_v9, 0.0 }
 0xdab   : > { %v6651_v38 = vmul.f32 0.03125, %v6631_v31  ;;  %6639 = vadd.xlane.f32.xlu1 %v6638_v55  ;;  %v6628_v56 = vpop.xlane.xlu1 %6627  ;;  %v6625_v45 = vmul.f32 %v10485_v24, %v10485_v24 }
 0xdac   : > { %v6650_v60 = vmul.f32 0.03125, %v6628_v56  ;;  %v6624_v47 = vmul.f32 %v10488_v54, %v10488_v54 }
 0xdad   : > { %v6659_v49 = vadd.f32 1e-05, %v6651_v38  ;;  %v6647_v52 = vsel %vm578_vm0, %v6625_v45, 0.0 }
 0xdae   : > { %v6658_v57 = vadd.f32 1e-05, %v6650_v60  ;;  %6648 = vadd.xlane.f32.xlu0 %v6647_v52  ;;  %v6637_v0 = vpop.xlane.xlu0 %6636  ;;  %v6644_v4 = vsel %vm578_vm0, %v6624_v47, 0.0 }
 0xdaf   : > { %9285 = vrsqrt.f32 %v6659_v49  ;;  %v6653_v58 = vmul.f32 0.03125, %v6637_v0  ;;  %6645 = vadd.xlane.f32.xlu1 %v6644_v4  ;;  %v6634_v6 = vpop.xlane.xlu1 %6633 }
 0xdb0   : > { %9287 = vrsqrt.f32 %v6658_v57  ;;  %v6652_v59 = vmul.f32 0.03125, %v6634_v6 }
 0xdb1   : > { %v6661_v7 = vadd.f32 1e-05, %v6653_v58 }
 0xdb2   : > { %v6660_v2 = vadd.f32 1e-05, %v6652_v59 }
 0xdb3   : > { %9289 = vrsqrt.f32 %v6661_v7 }
 0xdb4   : > { %9291 = vrsqrt.f32 %v6660_v2 }
 0xdb9   : > { %v9286_v13 = vpop.eup %9285 }
 0xdba   : > { %v9288_v27 = vpop.eup %9287  ;;  %v6675_v28 = vmul.f32 %v9286_v13, %v10451_v11 }
 0xdbb   : > { %v6674_v61 = vmul.f32 %v9288_v27, %v10454_v26 }
 0xdbc   : > { %v6689_v30 = vmul.f32 %v10500_v23, %v6675_v28 }
 0xdbd   : > { %v9290_v32 = vpop.eup %9289  ;;  %v6688_v21 = vmul.f32 %v10500_v23, %v6674_v61 }
 0xdbe   : > { %v9292_v33 = vpop.eup %9291  ;;  %v6677_v34 = vmul.f32 %v9290_v32, %v10464_v8  ;;  %v10517_v26 = vadd.f32 %v10507_v29, %v6689_v30 }
 0xdbf   : > { %v10513_v63 = vadd.f32 %v10507_v29, %v6688_v21  ;;  %v6676_v11 = vmul.f32 %v9292_v33, %v10462_v1  ;;  %v6858_v1 = vld [vmem:[%s10792_s8] sm:$0xff] }
 0xdc0   : > { %v6691_v62 = vmul.f32 %v10500_v23, %v6677_v34  ;;  %v9002_v5 = vpack.c.bf16 %v6859_v3, %v6858_v1 }
 0xdc1   : > { %8839 = vmatprep.mubr.msk.f32.mxu0 %vm578_vm0, %v10513_v63  ;;  %v6690_v35 = vmul.f32 %v10500_v23, %v6676_v11 }
 0xdc2   : > { %8840 = vmatmul.mubr.msk.f32.vlgmr.msra.gmra.mrb[82].mxu0 %vm578_vm0, %v10517_v26  ;;  %v10529_v37 = vadd.f32 %v10507_v29, %v6691_v62  ;;  %9003 = vmatprep.subr.bf16.mxu1 %v9002_v5 }
 0xdc3   : > { %v10526_v8 = vadd.f32 %v10507_v29, %v6690_v35  ;;  %9005 = vmatpush3.bf16.msra.mxu1 %v9002_v5 }
 0xdc4   : > { %9007 = vmatprep.subr.bf16.mxu1 %v9006_v12 }
 0xdc5   : > { %8842 = vmatprep.mubr.msk.f32.mxu0 %vm578_vm0, %v10526_v8 }
 0xdc6   : > { %8843 = vmatmul.mubr.msk.f32.gmra.mrb[84].mxu0 %vm578_vm0, %v10529_v37 }
 0xdc7   : > { %9009 = vmatpush3.bf16.msra.mxu1 %v9006_v12 }
 0xdc8   : > { %9011 = vmatprep.subr.bf16.mxu1 %v9010_v41 }
 0xdcb   : > { %9013 = vmatpush3.bf16.msra.mxu1 %v9010_v41 }
 0xdcc   : > { %9015 = vmatprep.subr.bf16.mxu1 %v9014_v40 }
 0xdcf   : > { %9017 = vmatpush3.bf16.msra.mxu1 %v9014_v40 }
 0xe37   : > { %v6643_v42 = vpop.xlane.xlu0 %6642 }
 0xe38   : > { %v6655_v22 = vmul.f32 0.03125, %v6643_v42  ;;  %v6640_v43 = vpop.xlane.xlu1 %6639 }
 0xe39   : > { %v6654_v44 = vmul.f32 0.03125, %v6640_v43 }
 0xe3a   : > { %v6663_v46 = vadd.f32 1e-05, %v6655_v22 }
 0xe3b   : > { %v6662_v51 = vadd.f32 1e-05, %v6654_v44  ;;  %v6649_v16 = vpop.xlane.xlu0 %6648 }
 0xe3c   : > { %9293 = vrsqrt.f32 %v6663_v46  ;;  %v6657_v17 = vmul.f32 0.03125, %v6649_v16  ;;  %v6646_v18 = vpop.xlane.xlu1 %6645 }
 0xe3d   : > { %9295 = vrsqrt.f32 %v6662_v51  ;;  %v6656_v19 = vmul.f32 0.03125, %v6646_v18 }
 0xe3e   : > { %v6665_v9 = vadd.f32 1e-05, %v6657_v17 }
 0xe3f   : > { %v6664_v53 = vadd.f32 1e-05, %v6656_v19 }
 0xe40   : > { %9297 = vrsqrt.f32 %v6665_v9 }
 0xe41   : > { %9299 = vrsqrt.f32 %v6664_v53 }
 0xe46   : > { %v9294_v31 = vpop.eup %9293 }
 0xe47   : > { %v9296_v55 = vpop.eup %9295  ;;  %v6679_v38 = vmul.f32 %v9294_v31, %v10477_v48 }
 0xe48   : > { %v6678_v56 = vmul.f32 %v9296_v55, %v10479_v50 }
 0xe49   : > { %v6693_v45 = vmul.f32 %v10500_v23, %v6679_v38 }
 0xe4a   : > { %v9298_v60 = vpop.eup %9297  ;;  %v6692_v47 = vmul.f32 %v10500_v23, %v6678_v56 }
 0xe4b   : > { %v9300_v49 = vpop.eup %9299  ;;  %v6681_v52 = vmul.f32 %v9298_v60, %v10485_v24  ;;  %v10569_v4 = vadd.f32 %v10507_v29, %v6693_v45 }
 0xe4c   : > { %v10565_v57 = vadd.f32 %v10507_v29, %v6692_v47  ;;  %v6680_v0 = vmul.f32 %v9300_v49, %v10488_v54  ;;  %v8149_v54 = vld [vmem:[%s10791_s7] ss:$0 sm:$0xff] }
 0xe4d   : > { %v6695_v48 = vmul.f32 %v10500_v23, %v6681_v52 }
 0xe4e   : > { %8845 = vmatprep.mubr.msk.f32.mxu0 %vm578_vm0, %v10565_v57  ;;  %v6694_v50 = vmul.f32 %v10500_v23, %v6680_v0 }
 0xe4f   : > { %8846 = vmatmul.mubr.msk.f32.gmra.mrb[86].mxu0 %vm578_vm0, %v10569_v4  ;;  %v10581_v58 = vadd.f32 %v10507_v29, %v6695_v48 }
 0xe50   : > { %v10578_v24 = vadd.f32 %v10507_v29, %v6694_v50 }
 0xe52   : > { %8848 = vmatprep.mubr.msk.f32.mxu0 %vm578_vm0, %v10578_v24 }
 0xe53   : > { %8849 = vmatmul.mubr.msk.f32.gmra.mrb[88].mxu0 %vm578_vm0, %v10581_v58 }
 0xe54   : > { %8887 = vmatprep.mubr.msk.f32.mxu0 %vm9431_vm1, %v9430_v14 }
 0xe95   : > { %v8841_v6 = vpop.f32.mrb[82].mxu0 }
 0xe96   : > { %v6817_v59 = vadd.f32 %v8841_v6, %v8149_v54  ;;  %v6811_v7 = vpop.f32.mrb[83].mxu0 }
 0xe97   : > { %v6812_v2 = vadd.f32 %v8149_v54, %v6811_v7 }
 0xe98   : > { %v6851_v27 = vmax.f32 %v6817_v59, 0.0 }
 0xe99   : > { %v6850_v13 = vmax.f32 %v6812_v2, 0.0  ;;  %v8844_v23 = vpop.f32.mrb[84].mxu0 }
 0xe9a   : > { %v6827_v28 = vadd.f32 %v8844_v23, %v8149_v54  ;;  %v6821_v61 = vpop.f32.mrb[85].mxu0 }
 0xe9b   : > { %v6822_v29 = vadd.f32 %v8149_v54, %v6821_v61  ;;  %8867 = vmatprep.mubr.msk.f32.mxu1 %vm6873_vm3, %v6850_v13 }
 0xe9c   : > { %8868 = vmatmul.mubr.msk.f32.vlgmr.msra.gmra.mrb[62].mxu1 %vm6873_vm3, %v6851_v27  ;;  %v6853_v32 = vmax.f32 %v6827_v28, 0.0 }
 0xe9d   : > { %v6852_v30 = vmax.f32 %v6822_v29, 0.0 }
 0xe9f   : > { %8870 = vmatprep.mubr.msk.f32.mxu1 %vm6873_vm3, %v6852_v30 }
 0xea0   : > { %8871 = vmatmul.mubr.msk.f32.gmra.mrb[64].mxu1 %vm6873_vm3, %v6853_v32 }
 0xf22   : > { %v8847_v21 = vpop.f32.mrb[86].mxu0 }
 0xf23   : > { %v6837_v33 = vadd.f32 %v8847_v21, %v8149_v54  ;;  %v6831_v34 = vpop.f32.mrb[87].mxu0 }
 0xf24   : > { %v6832_v11 = vadd.f32 %v8149_v54, %v6831_v34 }
 0xf25   : > { %v6855_v1 = vmax.f32 %v6837_v33, 0.0 }
 0xf26   : > { %v6854_v62 = vmax.f32 %v6832_v11, 0.0  ;;  %v8850_v35 = vpop.f32.mrb[88].mxu0 }
 0xf27   : > { %v6847_v3 = vadd.f32 %v8850_v35, %v8149_v54  ;;  %v6841_v10 = vpop.f32.mrb[89].mxu0 }
 0xf28   : > { %v6842_v5 = vadd.f32 %v8149_v54, %v6841_v10  ;;  %8873 = vmatprep.mubr.msk.f32.mxu1 %vm6873_vm3, %v6854_v62 }
 0xf29   : > { %8874 = vmatmul.mubr.msk.f32.gmra.mrb[66].mxu1 %vm6873_vm3, %v6855_v1  ;;  %v6857_v12 = vmax.f32 %v6847_v3, 0.0 }
 0xf2a   : > { %v6856_v39 = vmax.f32 %v6842_v5, 0.0 }
 0xf2c   : > { %8876 = vmatprep.mubr.msk.f32.mxu1 %vm6873_vm3, %v6856_v39 }
 0xf2d   : > { %8877 = vmatmul.mubr.msk.f32.gmra.mrb[68].mxu1 %vm6873_vm3, %v6857_v12 }
 0xf2e   : > { %8909 = vmatprep.mubr.msk.f32.mxu1 %vm9431_vm1, %v9430_v14 }
 0xf6f   : > { %v8869_v15 = vpop.f32.mrb[62].mxu1 }
 0xf70   : > { %v6970_v41 = vadd.f32 %v8869_v15, %v8158_v36  ;;  %v6964_v25 = vpop.f32.mrb[63].mxu1 }
 0xf71   : > { %v6965_v20 = vadd.f32 %v8158_v36, %v6964_v25 }
 0xf72   : > { %v7004_v40 = vadd.f32 %v6970_v41, %v10517_v26 }
 0xf73   : > { %v7003_v42 = vadd.f32 %v6965_v20, %v10513_v63  ;;  %v8872_v22 = vpop.f32.mrb[64].mxu1 }
 0xf74   : > { %v6980_v43 = vadd.f32 %v8872_v22, %v8158_v36  ;;  %v6974_v44 = vpop.f32.mrb[65].mxu1  ;;  %v7016_v46 = vsel %vm578_vm0, %v7004_v40, 0.0 }
 0xf75   : > { %v6975_v51 = vadd.f32 %v8158_v36, %v6974_v44  ;;  %7017 = vadd.xlane.f32.xlu0 %v7016_v46  ;;  %v7013_v16 = vsel %vm578_vm0, %v7003_v42, 0.0 }
 0xf76   : > { %v7006_v17 = vadd.f32 %v6980_v43, %v10529_v37  ;;  %7014 = vadd.xlane.f32.xlu1 %v7013_v16 }
 0xf77   : > { %v7005_v18 = vadd.f32 %v6975_v51, %v10526_v8 }
 0xf78   : > { %v7022_v19 = vsel %vm578_vm0, %v7006_v17, 0.0 }
 0xf79   : > { %7023 = vadd.xlane.f32.xlu0 %v7022_v19  ;;  %v7019_v26 = vsel %vm578_vm0, %v7005_v18, 0.0 }
 0xf7a   : > { %7020 = vadd.xlane.f32.xlu1 %v7019_v26 }
 0xffc   : > { %v8875_v63 = vpop.f32.mrb[66].mxu1 }
 0xffd   : > { %v6990_v9 = vadd.f32 %v8875_v63, %v8158_v36  ;;  %v6984_v53 = vpop.f32.mrb[67].mxu1 }
 0xffe   : > { %v6985_v31 = vadd.f32 %v8158_v36, %v6984_v53 }
 0xfff   : > { %v7008_v55 = vadd.f32 %v6990_v9, %v10569_v4 }
0x1000   : > { %v7007_v38 = vadd.f32 %v6985_v31, %v10565_v57  ;;  %v8878_v56 = vpop.f32.mrb[68].mxu1 }
0x1001   : > { %v7000_v45 = vadd.f32 %v8878_v56, %v8158_v36  ;;  %v6994_v37 = vpop.f32.mrb[69].mxu1  ;;  %v7028_v60 = vsel %vm578_vm0, %v7008_v55, 0.0  ;;  %v10664_v56 = vld [vmem:[%s10794_s10] ss:$0 sm:$0xff] }
0x1002   : > { %v6995_v8 = vadd.f32 %v8158_v36, %v6994_v37  ;;  %v7018_v47 = vpop.xlane.xlu0 %7017  ;;  %7029 = vadd.xlane.f32.xlu0 %v7028_v60  ;;  %v7025_v49 = vsel %vm578_vm0, %v7007_v38, 0.0  ;;  %v10670_v60 = vld [vmem:[%s10795_s11] ss:$0 sm:$0xff] }
0x1003   : > { %v7010_v52 = vadd.f32 %v7000_v45, %v10581_v58  ;;  %v7038_v0 = vmul.f32 0.03125, %v7018_v47  ;;  %7026 = vadd.xlane.f32.xlu1 %v7025_v49  ;;  %v7015_v48 = vpop.xlane.xlu1 %7014 }
0x1004   : > { %v7009_v50 = vadd.f32 %v6995_v8, %v10578_v24  ;;  %v7037_v4 = vmul.f32 0.03125, %v7015_v48 }
0x1005   : > { %v10619_v54 = vsub.f32 %v7004_v40, %v7038_v0  ;;  %v7034_v57 = vsel %vm578_vm0, %v7010_v52, 0.0 }
0x1006   : > { %v10622_v6 = vsub.f32 %v7003_v42, %v7037_v4  ;;  %v7024_v59 = vpop.xlane.xlu0 %7023  ;;  %7035 = vadd.xlane.f32.xlu0 %v7034_v57  ;;  %v7031_v7 = vsel %vm578_vm0, %v7009_v50, 0.0 }
0x1007   : > { %v7040_v2 = vmul.f32 0.03125, %v7024_v59  ;;  %7032 = vadd.xlane.f32.xlu1 %v7031_v7  ;;  %v7021_v13 = vpop.xlane.xlu1 %7020  ;;  %v7054_v58 = vmul.f32 %v10619_v54, %v10619_v54 }
0x1008   : > { %v7039_v23 = vmul.f32 0.03125, %v7021_v13  ;;  %v7053_v24 = vmul.f32 %v10622_v6, %v10622_v6  ;;  %v7166_v13 = vld [vmem:[#allocation7 + $0x28] sm:$0xff] }
0x1009   : > { %v10629_v27 = vsub.f32 %v7006_v17, %v7040_v2  ;;  %v7064_v28 = vsel %vm578_vm0, %v7054_v58, 0.0  ;;  %v7165_v2 = vld [vmem:[#allocation7 + $0x20] sm:$0xff] }
0x100a   : > { %v10632_v61 = vsub.f32 %v7005_v18, %v7039_v23  ;;  %7065 = vadd.xlane.f32.xlu0 %v7064_v28  ;;  %v7061_v29 = vsel %vm578_vm0, %v7053_v24, 0.0  ;;  %v7320_v58 = vld [vmem:[#allocation7 + $0x40] sm:$0xff]  ;;  %v9443_v23 = vmov 0.0|0.0   ;;  %v9019_v24 = vpack.c.bf16 %v7166_v13, %v7165_v2  ;;  %v7167_v28 = vld [vmem:[#allocation7 + $0x30] sm:$0xff] }
0x100b   : > { %7062 = vadd.xlane.f32.xlu1 %v7061_v29  ;;  %v7056_v30 = vmul.f32 %v10629_v27, %v10629_v27  ;;  %9018 = vmatprep.subr.bf16.mxu0 %v9443_v23 }
0x100c   : > { %v7055_v32 = vmul.f32 %v10632_v61, %v10632_v61  ;;  %9030 = vmatprep.subr.bf16.mxu1 %v9443_v23  ;;  %9020 = vmatpush3.bf16.msra.mxu0 %v9019_v24 }
0x100d   : > { %v7070_v21 = vsel %vm578_vm0, %v7056_v30, 0.0  ;;  %v7322_v30 = vld [vmem:[#allocation7 + $0x50] sm:$0xff]  ;;  %9021 = vmatprep.subr.bf16.mxu0 %v9443_v23 }
0x100e   : > { %7071 = vadd.xlane.f32.xlu0 %v7070_v21  ;;  %v7067_v33 = vsel %vm578_vm0, %v7055_v32, 0.0  ;;  %v7323_v32 = vld [vmem:[#allocation7 + $0x58] sm:$0xff] }
0x100f   : > { %7068 = vadd.xlane.f32.xlu1 %v7067_v33  ;;  %v9034_v33 = vpack.c.bf16 %v7323_v32, %v7322_v30  ;;  %v7406_v32 = vld [vmem:[#allocation7 + $0x78] sm:$0xff] }
0x108f   : > { %v7030_v34 = vpop.xlane.xlu0 %7029 }
0x1090   : > { %v7042_v11 = vmul.f32 0.03125, %v7030_v34  ;;  %v7027_v62 = vpop.xlane.xlu1 %7026 }
0x1091   : > { %v7041_v35 = vmul.f32 0.03125, %v7027_v62 }
0x1092   : > { %v10641_v1 = vsub.f32 %v7008_v55, %v7042_v11 }
0x1093   : > { %v10643_v3 = vsub.f32 %v7007_v38, %v7041_v35  ;;  %v7036_v10 = vpop.xlane.xlu0 %7035 }
0x1094   : > { %v7044_v5 = vmul.f32 0.03125, %v7036_v10  ;;  %v7033_v39 = vpop.xlane.xlu1 %7032  ;;  %v7058_v12 = vmul.f32 %v10641_v1, %v10641_v1 }
0x1095   : > { %v7043_v36 = vmul.f32 0.03125, %v7033_v39  ;;  %v7057_v15 = vmul.f32 %v10643_v3, %v10643_v3 }
0x1096   : > { %v10649_v41 = vsub.f32 %v7010_v52, %v7044_v5  ;;  %v7076_v25 = vsel %vm578_vm0, %v7058_v12, 0.0 }
0x1097   : > { %v10652_v20 = vsub.f32 %v7009_v50, %v7043_v36  ;;  %7077 = vadd.xlane.f32.xlu0 %v7076_v25  ;;  %v7066_v40 = vpop.xlane.xlu0 %7065  ;;  %v7073_v42 = vsel %vm578_vm0, %v7057_v15, 0.0 }
0x1098   : > { %v7086_v22 = vmul.f32 0.03125, %v7066_v40  ;;  %7074 = vadd.xlane.f32.xlu1 %v7073_v42  ;;  %v7063_v43 = vpop.xlane.xlu1 %7062  ;;  %v7060_v44 = vmul.f32 %v10649_v41, %v10649_v41 }
0x1099   : > { %v7085_v46 = vmul.f32 0.03125, %v7063_v43  ;;  %v7059_v51 = vmul.f32 %v10652_v20, %v10652_v20 }
0x109a   : > { %v7094_v16 = vadd.f32 1e-05, %v7086_v22  ;;  %v7082_v17 = vsel %vm578_vm0, %v7060_v44, 0.0 }
0x109b   : > { %v7093_v18 = vadd.f32 1e-05, %v7085_v46  ;;  %7083 = vadd.xlane.f32.xlu0 %v7082_v17  ;;  %v7072_v19 = vpop.xlane.xlu0 %7071  ;;  %v7079_v26 = vsel %vm578_vm0, %v7059_v51, 0.0 }
0x109c   : > { %9301 = vrsqrt.f32 %v7094_v16  ;;  %v7088_v63 = vmul.f32 0.03125, %v7072_v19  ;;  %7080 = vadd.xlane.f32.xlu1 %v7079_v26  ;;  %v7069_v9 = vpop.xlane.xlu1 %7068 }
0x109d   : > { %9303 = vrsqrt.f32 %v7093_v18  ;;  %v7087_v53 = vmul.f32 0.03125, %v7069_v9 }
0x109e   : > { %v7096_v31 = vadd.f32 1e-05, %v7088_v63 }
0x109f   : > { %v7095_v55 = vadd.f32 1e-05, %v7087_v53 }
0x10a0   : > { %9305 = vrsqrt.f32 %v7096_v31  ;;  %v7157_v31 = vld [vmem:[#allocation7 + $0x8] sm:$0xff] }
0x10a1   : > { %9307 = vrsqrt.f32 %v7095_v55  ;;  %v7486_v55 = vld [vmem:[#allocation7 + $0x80] sm:$0xff] }
0x10a6   : > { %v9302_v38 = vpop.eup %9301 }
0x10a7   : > { %v9304_v45 = vpop.eup %9303  ;;  %v7110_v37 = vmul.f32 %v9302_v38, %v10619_v54 }
0x10a8   : > { %v7109_v8 = vmul.f32 %v9304_v45, %v10622_v6 }
0x10a9   : > { %v7124_v47 = vmul.f32 %v10664_v56, %v7110_v37  ;;  %v7158_v37 = vld [vmem:[#allocation7 + $0x10] sm:$0xff] }
0x10aa   : > { %v9306_v49 = vpop.eup %9305  ;;  %v7123_v52 = vmul.f32 %v10664_v56, %v7109_v8 }
0x10ab   : > { %v9308_v0 = vpop.eup %9307  ;;  %v7138_v48 = vadd.f32 %v10670_v60, %v7124_v47  ;;  %v7112_v50 = vmul.f32 %v9306_v49, %v10629_v27  ;;  %v7321_v27 = vld [vmem:[#allocation7 + $0x48] sm:$0xff] }
0x10ac   : > { %v7137_v4 = vadd.f32 %v10670_v60, %v7123_v52  ;;  %v7111_v54 = vmul.f32 %v9308_v0, %v10632_v61  ;;  %v7168_v61 = vld [vmem:[#allocation7 + $0x38] sm:$0xff]  ;;  %v9031_v29 = vpack.c.bf16 %v7321_v27, %v7320_v58 }
0x10ad   : > { %7146 = vst.msk [vmem:[#allocation2 + $0x8] sm:$0xff] %vm578_vm0, %v7138_v48  ;;  %v7126_v57 = vmul.f32 %v10664_v56, %v7112_v50  ;;  %v9022_v21 = vpack.c.bf16 %v7168_v61, %v7167_v28  ;;  %v7159_v48 = vld [vmem:[#allocation7 + $0x18] sm:$0xff]  ;;  %v7488_v50 = vld [vmem:[#allocation7 + $0x90] sm:$0xff] }
0x10ae   : > { %7145 = vst.msk [vmem:[#allocation2] sm:$0xff] %vm578_vm0, %v7137_v4  ;;  %v7125_v6 = vmul.f32 %v10664_v56, %v7111_v54  ;;  %9032 = vmatpush3.bf16.msra.mxu1 %v9031_v29  ;;  %v9028_v4 = vpack.c.bf16 %v7159_v48, %v7158_v37  ;;  %v7405_v61 = vld [vmem:[#allocation7 + $0x70] sm:$0xff] }
0x10af   : > { %v7140_v59 = vadd.f32 %v10670_v60, %v7126_v57  ;;  %9033 = vmatprep.subr.bf16.mxu1 %v9443_v23  ;;  %9023 = vmatpush3.bf16.msra.mxu0 %v9022_v21  ;;  %v7403_v57 = vld [vmem:[#allocation7 + $0x60] sm:$0xff]  ;;  %v7654_v21 = vld [vmem:[#allocation7 + $0xd0] sm:$0xff] }
0x10b0   : > { %v7139_v7 = vadd.f32 %v10670_v60, %v7125_v6  ;;  %9024 = vmatprep.subr.bf16.mxu0 %v9443_v23  ;;  %v7404_v6 = vld [vmem:[#allocation7 + $0x68] sm:$0xff]  ;;  %v7828_v37 = vld [vmem:[%s10798_s14 + $0x30] sm:$0xff] }
0x10b1   : > { %7148 = vst.msk [vmem:[#allocation2 + $0x18] sm:$0xff] %vm578_vm0, %v7140_v59  ;;  %v7652_v59 = vld [vmem:[#allocation7 + $0xc0] sm:$0xff]  ;;  %v9037_v27 = vpack.c.bf16 %v7404_v6, %v7403_v57 }
0x10b2   : > { %7147 = vst.msk [vmem:[#allocation2 + $0x10] sm:$0xff] %vm578_vm0, %v7139_v7  ;;  %9035 = vmatpush3.bf16.msra.mxu1 %v9034_v33  ;;  %v7653_v7 = vld [vmem:[#allocation7 + $0xc8] sm:$0xff]  ;;  %v7655_v33 = vld [vmem:[#allocation7 + $0xd8] sm:$0xff] }
0x10b3   : > { %9042 = vmatprep.subr.bf16.mxu1 %v9443_v23  ;;  %v9055_v28 = vpack.c.bf16 %v7653_v7, %v7652_v59 }
0x10b9   : > { %v7161_v38 = vld [vmem:[#allocation2 + $0x1] ss:$8 sm:$0xf]  ;;  %v7316_v45 = vld [vmem:[#allocation2 + $0x2] ss:$8 sm:$0xf] }
0x10ba   : > { %v7153_v58 = vld [vmem:[#allocation2] ss:$8 sm:$0xf]  ;;  %v7482_v24 = vld [vmem:[#allocation2 + $0x4] ss:$8 sm:$0xf] }
0x1124   : > { %v7078_v34 = vpop.xlane.xlu0 %7077 }
0x1125   : > { %v7090_v11 = vmul.f32 0.03125, %v7078_v34  ;;  %v7075_v62 = vpop.xlane.xlu1 %7074  ;;  %v9040_v34 = vpack.c.bf16 %v7406_v32, %v7405_v61 }
0x1126   : > { %v7089_v35 = vmul.f32 0.03125, %v7075_v62  ;;  %v7569_v62 = vld [vmem:[#allocation7 + $0xa0] sm:$0xff] }
0x1127   : > { %v7098_v10 = vadd.f32 1e-05, %v7090_v11  ;;  %v9058_v11 = vpack.c.bf16 %v7655_v33, %v7654_v21 }
0x1128   : > { %v7097_v5 = vadd.f32 1e-05, %v7089_v35  ;;  %v7084_v39 = vpop.xlane.xlu0 %7083  ;;  %v7570_v35 = vld [vmem:[#allocation7 + $0xa8] sm:$0xff] }
0x1129   : > { %9309 = vrsqrt.f32 %v7098_v10  ;;  %v7092_v12 = vmul.f32 0.03125, %v7084_v39  ;;  %v7081_v36 = vpop.xlane.xlu1 %7080  ;;  %v7399_v39 = vld [vmem:[#allocation2 + $0x3] ss:$8 sm:$0xf] }
0x112a   : > { %9311 = vrsqrt.f32 %v7097_v5  ;;  %v7091_v15 = vmul.f32 0.03125, %v7081_v36  ;;  %v9049_v36 = vpack.c.bf16 %v7570_v35, %v7569_v62 }
0x112b   : > { %v7100_v25 = vadd.f32 1e-05, %v7092_v12  ;;  %v7648_v12 = vld [vmem:[#allocation2 + $0x6] ss:$8 sm:$0xf] }
0x112c   : > { %v7099_v40 = vadd.f32 1e-05, %v7091_v15 }
0x112d   : > { %9313 = vrsqrt.f32 %v7100_v25 }
0x112e   : > { %9315 = vrsqrt.f32 %v7099_v40  ;;  %v7571_v40 = vld [vmem:[#allocation7 + $0xb0] sm:$0xff] }
0x1133   : > { %v9310_v42 = vpop.eup %9309 }
0x1134   : > { %v9312_v22 = vpop.eup %9311  ;;  %v7114_v43 = vmul.f32 %v9310_v42, %v10641_v1  ;;  %v7572_v42 = vld [vmem:[#allocation7 + $0xb8] sm:$0xff] }
0x1135   : > { %v7113_v44 = vmul.f32 %v9312_v22, %v10643_v3  ;;  %v9052_v22 = vpack.c.bf16 %v7572_v42, %v7571_v40 }
0x1136   : > { %v7128_v46 = vmul.f32 %v10664_v56, %v7114_v43  ;;  %v7735_v43 = vld [vmem:[#allocation7 + $0xe0] sm:$0xff] }
0x1137   : > { %v9314_v51 = vpop.eup %9313  ;;  %v7127_v16 = vmul.f32 %v10664_v56, %v7113_v44  ;;  %v7736_v44 = vld [vmem:[#allocation7 + $0xe8] sm:$0xff] }
0x1138   : > { %v9316_v17 = vpop.eup %9315  ;;  %v7142_v18 = vadd.f32 %v10670_v60, %v7128_v46  ;;  %v7116_v19 = vmul.f32 %v9314_v51, %v10649_v41  ;;  %v7156_v41 = vld [vmem:[#allocation7] sm:$0xff] }
0x1139   : > { %v7141_v26 = vadd.f32 %v10670_v60, %v7127_v16  ;;  %v7115_v63 = vmul.f32 %v9316_v17, %v10652_v20  ;;  %v7487_v20 = vld [vmem:[#allocation7 + $0x88] sm:$0xff]  ;;  %v9025_v47 = vpack.c.bf16 %v7157_v31, %v7156_v41  ;;  %v9061_v16 = vpack.c.bf16 %v7736_v44, %v7735_v43  ;;  %v7825_v31 = vld [vmem:[%s10798_s14 + $0x18] sm:$0xff] }
0x113a   : > { %7150 = vst.msk [vmem:[#allocation2 + $0x28] sm:$0xff] %vm578_vm0, %v7142_v18  ;;  %v7130_v1 = vmul.f32 %v10664_v56, %v7116_v19  ;;  %v9043_v52 = vpack.c.bf16 %v7487_v20, %v7486_v55  ;;  %v7565_v51 = vld [vmem:[#allocation2 + $0x5] ss:$8 sm:$0xf] }
0x113b   : > { %7149 = vst.msk [vmem:[#allocation2 + $0x20] sm:$0xff] %vm578_vm0, %v7141_v26  ;;  %v7129_v3 = vmul.f32 %v10664_v56, %v7115_v63  ;;  %v7737_v18 = vld [vmem:[#allocation7 + $0xf0] sm:$0xff]  ;;  %v7738_v19 = vld [vmem:[#allocation7 + $0xf8] sm:$0xff]  ;;  %v7826_v20 = vld [vmem:[%s10798_s14 + $0x20] sm:$0xff] }
0x113c   : > { %v7144_v9 = vadd.f32 %v10670_v60, %v7130_v1  ;;  %v9064_v26 = vpack.c.bf16 %v7738_v19, %v7737_v18  ;;  %v7731_v1 = vld [vmem:[#allocation2 + $0x7] ss:$8 sm:$0xf] }
0x113d   : > { %v7143_v53 = vadd.f32 %v10670_v60, %v7129_v3  ;;  %v7489_v60 = vld [vmem:[#allocation7 + $0x98] sm:$0xff] }
0x113e   : > { %7152 = vst.msk [vmem:[#allocation2 + $0x38] sm:$0xff] %vm578_vm0, %v7144_v9  ;;  %v9046_v54 = vpack.c.bf16 %v7489_v60, %v7488_v50  ;;  %v7822_v9 = vld [vmem:[%s10798_s14] sm:$0xff] }
0x113f   : > { %7151 = vst.msk [vmem:[#allocation2 + $0x30] sm:$0xff] %vm578_vm0, %v7143_v53  ;;  %v7823_v53 = vld [vmem:[%s10798_s14 + $0x8] sm:$0xff] }
0x1140   : > { %v9067_v41 = vpack.c.bf16 %v7823_v53, %v7822_v9 }
0x1146   : > { %v7162_v8 = vld [vmem:[#allocation2 + $0x1] ss:$8 sm:$0xf0]  ;;  %v7317_v49 = vld [vmem:[#allocation2 + $0x2] ss:$8 sm:$0xf0] }
0x1147   : > { %v7163_v56 = vor.u32 %v7162_v8, %v7161_v38  ;;  %v7318_v0 = vor.u32 %v7317_v49, %v7316_v45  ;;  %v7154_v2 = vld [vmem:[#allocation2] ss:$8 sm:$0xf0]  ;;  %v7483_v13 = vld [vmem:[#allocation2 + $0x4] ss:$8 sm:$0xf0] }
0x1148   : > { %v7155_v29 = vor.u32 %v7154_v2, %v7153_v58  ;;  %v7484_v30 = vor.u32 %v7483_v13, %v7482_v24  ;;  %v7400_v10 = vld [vmem:[#allocation2 + $0x3] ss:$8 sm:$0xf0]  ;;  %v7649_v5 = vld [vmem:[#allocation2 + $0x6] ss:$8 sm:$0xf0] }
0x1149   : > { %8888 = vmatmul.mubr.msk.f32.vlgmr.msra.gmra.mrb[90].mxu0 %vm578_vm0, %v7163_v56  ;;  %8910 = vmatmul.mubr.msk.f32.vlgmr.msra.gmra.mrb[70].mxu1 %vm578_vm0, %v7318_v0  ;;  %v7401_v15 = vor.u32 %v7400_v10, %v7399_v39  ;;  %v7650_v25 = vor.u32 %v7649_v5, %v7648_v12  ;;  %v7566_v46 = vld [vmem:[#allocation2 + $0x5] ss:$8 sm:$0xf0]  ;;  %v7732_v63 = vld [vmem:[#allocation2 + $0x7] ss:$8 sm:$0xf0] }
0x114a   : > { %9026 = vmatpush3.bf16.msra.mxu0 %v9025_v47  ;;  %9044 = vmatpush3.bf16.msra.mxu1 %v9043_v52  ;;  %v7567_v17 = vor.u32 %v7566_v46, %v7565_v51  ;;  %v7733_v3 = vor.u32 %v7732_v63, %v7731_v1  ;;  %v7827_v38 = vld [vmem:[%s10798_s14 + $0x28] sm:$0xff]  ;;  %v7829_v8 = vld [vmem:[%s10798_s14 + $0x38] sm:$0xff] }
0x114b   : > { %9027 = vmatprep.subr.bf16.mxu0 %v9443_v23  ;;  %9045 = vmatprep.subr.bf16.mxu1 %v9443_v23  ;;  %v9073_v45 = vpack.c.bf16 %v7827_v38, %v7826_v20  ;;  %v9076_v47 = vpack.c.bf16 %v7829_v8, %v7828_v37 }
0x114c   : > { %8898 = vmatprep.mubr.msk.f32.mxu0 %vm9431_vm1, %v9430_v14  ;;  %8931 = vmatprep.mubr.msk.f32.mxu1 %vm9431_vm1, %v9430_v14 }
0x114e   : > { %9029 = vmatpush3.bf16.msra.mxu0 %v9028_v4  ;;  %9047 = vmatpush3.bf16.msra.mxu1 %v9046_v54 }
0x114f   : > { %9036 = vmatprep.subr.bf16.mxu0 %v9443_v23  ;;  %9054 = vmatprep.subr.bf16.mxu1 %v9443_v23 }
0x1151   : > { %8899 = vmatmul.mubr.msk.f32.vlgmr.msra.gmra.mrb[92].mxu0 %vm578_vm0, %v7155_v29  ;;  %8932 = vmatmul.mubr.msk.f32.vlgmr.msra.gmra.mrb[72].mxu1 %vm578_vm0, %v7484_v30  ;;  %v8177_v29 = vld [vmem:[%s10818_s15] ss:$0 sm:$0xff] }
0x1152   : > { %9038 = vmatpush3.bf16.msra.mxu0 %v9037_v27  ;;  %9056 = vmatpush3.bf16.msra.mxu1 %v9055_v28 }
0x1153   : > { %9039 = vmatprep.subr.bf16.mxu0 %v9443_v23  ;;  %9057 = vmatprep.subr.bf16.mxu1 %v9443_v23 }
0x1154   : > { %8920 = vmatprep.mubr.msk.f32.mxu0 %vm9431_vm1, %v9430_v14  ;;  %8953 = vmatprep.mubr.msk.f32.mxu1 %vm9431_vm1, %v9430_v14 }
0x1156   : > { %9041 = vmatpush3.bf16.msra.mxu0 %v9040_v34  ;;  %9059 = vmatpush3.bf16.msra.mxu1 %v9058_v11  ;;  %v8178_v34 = vld [vmem:[%s10819_s20] ss:$0 sm:$0xff] }
0x1157   : > { %9048 = vmatprep.subr.bf16.mxu0 %v9443_v23  ;;  %9066 = vmatprep.subr.bf16.mxu1 %v9443_v23 }
0x1159   : > { %8921 = vmatmul.mubr.msk.f32.vlgmr.msra.gmra.mrb[94].mxu0 %vm578_vm0, %v7401_v15  ;;  %8954 = vmatmul.mubr.msk.f32.vlgmr.msra.gmra.mrb[74].mxu1 %vm578_vm0, %v7650_v25 }
0x115a   : > { %9050 = vmatpush3.bf16.msra.mxu0 %v9049_v36  ;;  %8942 = vmatprep.mubr.msk.f32.mxu0 %vm9431_vm1, %v9430_v14 }
0x115b   : > { %9051 = vmatprep.subr.bf16.mxu0 %v9443_v23  ;;  %8983 = vmatprep.mubr.msk.f32.mxu1 %vm9431_vm1, %v9430_v14 }
0x115c   : > { %9068 = vmatpush3.bf16.msra.mxu1 %v9067_v41 }
0x115d   : > { %9069 = vmatprep.subr.bf16.mxu1 %v9443_v23 }
0x115e   : > { %9053 = vmatpush3.bf16.msra.mxu0 %v9052_v22 }
0x115f   : > { %9060 = vmatprep.subr.bf16.mxu0 %v9443_v23 }
0x1161   : > { %8943 = vmatmul.mubr.msk.f32.vlgmr.msra.gmra.mrb[96].mxu0 %vm578_vm0, %v7567_v17 }
0x1162   : > { %9062 = vmatpush3.bf16.msra.mxu0 %v9061_v16  ;;  %8964 = vmatprep.mubr.msk.f32.mxu0 %vm9431_vm1, %v9430_v14  ;;  %v7824_v14 = vld [vmem:[%s10798_s14 + $0x10] sm:$0xff] }
0x1163   : > { %9063 = vmatprep.subr.bf16.mxu0 %v9443_v23  ;;  %v9070_v55 = vpack.c.bf16 %v7825_v31, %v7824_v14 }
0x1165   : > { %9071 = vmatpush3.bf16.msra.mxu1 %v9070_v55 }
0x1166   : > { %9065 = vmatpush3.bf16.msra.mxu0 %v9064_v26  ;;  %9072 = vmatprep.subr.bf16.mxu1 %v9443_v23 }
0x1169   : > { %8965 = vmatmul.mubr.msk.f32.vlgmr.msra.gmra.mrb[98].mxu0 %vm578_vm0, %v7733_v3  ;;  %9074 = vmatpush3.bf16.msra.mxu1 %v9073_v45 }
0x116a   : > { %9075 = vmatprep.subr.bf16.mxu1 %v9443_v23 }
0x116d   : > { %9077 = vmatpush3.bf16.msra.mxu1 %v9076_v47 }
0x121c   : > { %v7238_v49 = vpop.f32.mrb[90].mxu0  ;;  %v7393_v52 = vpop.f32.mrb[70].mxu1 }
0x121d   : > { %v8889_v56 = vpop.f32.mrb[91].mxu0  ;;  %v8911_v0 = vpop.f32.mrb[71].mxu1 }
0x1224   : > { %v7311_v48 = vpop.f32.mrb[92].mxu0  ;;  %v7559_v50 = vpop.f32.mrb[72].mxu1 }
0x1225   : > { %v7312_v60 = vadd.f32 %v7311_v48, %v7238_v49  ;;  %v8900_v4 = vpop.f32.mrb[93].mxu0  ;;  %v8933_v54 = vpop.f32.mrb[73].mxu1 }
0x1227   : > { %v7397_v23 = vadd.f32 %v7393_v52, %v7312_v60 }
0x122c   : > { %v7476_v57 = vpop.f32.mrb[94].mxu0  ;;  %v7725_v6 = vpop.f32.mrb[74].mxu1 }
0x122d   : > { %v7480_v59 = vadd.f32 %v7476_v57, %v7397_v23  ;;  %v8922_v7 = vpop.f32.mrb[95].mxu0  ;;  %v8955_v2 = vpop.f32.mrb[75].mxu1 }
0x122f   : > { %v7563_v13 = vadd.f32 %v7559_v50, %v7480_v59 }
0x1234   : > { %v7642_v58 = vpop.f32.mrb[96].mxu0 }
0x1235   : > { %v7646_v24 = vadd.f32 %v7642_v58, %v7563_v13  ;;  %v8944_v27 = vpop.f32.mrb[97].mxu0 }
0x1237   : > { %v7729_v28 = vadd.f32 %v7725_v6, %v7646_v24 }
0x123c   : > { %v7808_v61 = vpop.f32.mrb[98].mxu0 }
0x123d   : > { %v7812_v30 = vadd.f32 %v7808_v61, %v7729_v28  ;;  %v8966_v32 = vpop.f32.mrb[99].mxu0 }
0x123f   : > { %v7820_v21 = vadd.f32 %v8177_v29, %v7812_v30 }
0x1241   : > { %v7821_v33 = vmax.f32 %v7820_v21, 0.0 }
0x1243   : > { %8984 = vmatmul.mubr.msk.f32.vlgmr.msra.gmra.mrb[76].mxu1 %vm6873_vm3, %v7821_v33 }
0x1316   : > { %v7906_v11 = vpop.f32.mrb[76].mxu1 }
0x1317   : > { %v7907_v62 = vadd.f32 %v8178_v34, %v7906_v11  ;;  %v8985_v35 = vpop.f32.mrb[77].mxu1 }
0x1319   : > { %7911 = vst.msk [vmem:[%s565_s0] sm:$0xff] %vm7910_vm4, %v7907_v62 }
0x131a PF: > { %s10821_s27 = sld [smem:[#allocation10_spill]] }
0x1320   : > { %s28_s21 = sadd.s32 1, %s10821_s27  }
0x1321   : > { %p25_p10 = scmp.ge.s32.totalorder %s28_s21, 4  }
0x1323   :  { %27 = sbr.rel (!%p25_p10) target bundleno = 7 (0x7), region = 144 }
0x132a   :  { %7931 = vsyncpa [#allocation4], 1 }
0x132b   :  { %7933 = vsyncpa [#allocation4 + $0x1], 1 }
0x132c   :  { %7934 = vsyncpa [#allocation6], 1 }

</bundles_post_ra>
